<compile_context>
chip_gen: v5e
topology: v5e:2x2
jax: 0.10.0
libtpu: 0.0.40
codegen_flags: <defaults>
</compile_context>

<pallas_src>
import functools

import jax
import jax.numpy as jnp
import numpy as np
from jax.experimental import pallas as pl
from jax.experimental.pallas import tpu as pltpu

EPS = 1e-5


def _pick_vmem_limit():
    """Generation-aware VMEM scoped limit: 3/4 of physical, capped at 100 MiB."""
    cap = 64 * 1024 * 1024  # conservative default (v7x physical VMEM)
    try:
        cap = int(pltpu.get_tpu_info().vmem_capacity_bytes)
    except Exception:
        pass
    return int(min(max(cap * 3 // 4, 32 * 1024 * 1024), 100 * 1024 * 1024))


_VMEM_LIMIT = _pick_vmem_limit()


# ------------------------------ kernel bodies ------------------------------ #

def _conv_stage_kernel(x_ref, sc_ref, bi_ref, w_ref, y_ref, stats_ref, *, relu):
    """Fused [affine (+ReLU)] -> reflect-pad(1) -> 3x3 conv -> partial BN stats.

    x_ref     : [1, H, W, Cin]   f32 (stage 1) or bf16 (stage 2)
    sc_ref    : [1, Cin]         f32   per-channel scale (identity in stage 1)
    bi_ref    : [1, Cin]         f32   per-channel bias
    w_ref     : [3, 3*Cin, Cout] bf16  kh-major, (kw, cin)-flattened 3x3 weights
    y_ref     : [1, H, W, Cout]  bf16  raw conv output (pre-BN)
    stats_ref : [1, 2, Cout]     f32   per-image (sum, centered sum-of-squares)
    """
    _, H, W, Cin = x_ref.shape
    Cout = w_ref.shape[-1]

    # BN math stays in f32; drop to bf16 before pad/im2col so every staging
    # copy and the MXU operands are 16-bit.
    sc = sc_ref[...].reshape(1, 1, Cin)
    bi = bi_ref[...].reshape(1, 1, Cin)
    h = x_ref[0].astype(jnp.float32) * sc + bi                           # [H, W, Cin] f32
    if relu:
        h = jnp.maximum(h, 0.0)
    h = h.astype(jnp.bfloat16)

    # Reflection pad by 1: H pad is a cheap major-axis concat; W pad is one
    # sublane concat of the bf16 tile (half the store pressure of the old f32).
    hp = jnp.concatenate([h[1:2], h, h[H - 2:H - 1]], axis=0)            # [H+2, W,   Cin]
    hp = jnp.concatenate([hp[:, 1:2], hp, hp[:, W - 2:W - 1]], axis=1)   # [H+2, W+2, Cin]

    # dx (kw) staging: ONE [H+2, W, 3*Cin] bf16 buffer instead of the old
    # [H*W, 9*Cin] f32 patch matrix (~6x smaller peak VMEM temp).
    wide = jnp.concatenate(
        [hp[:, 0:W, :], hp[:, 1:W + 1, :], hp[:, 2:W + 2, :]], axis=-1)  # [H+2, W, 3*Cin]

    # kh (dy) accumulation: three K=3*Cin matmuls (MXU, f32 accumulate).
    # The per-dy operand is a free major-axis slice of `wide`.
    acc = jnp.zeros((H * W, Cout), jnp.float32)
    for dy in range(3):
        patch = wide[dy:dy + H].reshape(H * W, 3 * Cin)
        acc = acc + jnp.dot(patch, w_ref[dy], preferred_element_type=jnp.float32)

    # Per-image BN partials from the f32 accumulator (BEFORE the bf16 cast).
    # Centered (shifted) sum-of-squares avoids E[x^2]-E[x]^2 cancellation; the
    # wrapper combines partials with the standard parallel-variance formula.
    cnt = jnp.float32(H * W)
    s = jnp.sum(acc, axis=0, keepdims=True)                              # [1, Cout]
    sq = jnp.sum(jnp.square(acc - s / cnt), axis=0, keepdims=True)       # [1, Cout]
    stats_ref[...] = jnp.concatenate([s, sq], axis=0).reshape(1, 2, Cout)

    # Raw (pre-BN) conv output goes back to HBM as bf16 (halves HBM traffic).
    y_ref[...] = acc.reshape(1, H, W, Cout).astype(y_ref.dtype)


def _finalize_kernel(x_ref, y2_ref, sc_ref, bi_ref, o_ref):
    """out = x + BN2_affine(conv2_raw) — elementwise, per-image block, f32."""
    C = sc_ref.shape[-1]
    sc = sc_ref[...].reshape(1, 1, 1, C)
    bi = bi_ref[...].reshape(1, 1, 1, C)
    o_ref[...] = x_ref[...] + y2_ref[...].astype(jnp.float32) * sc + bi


# ----------------------------- pallas wrappers ------------------------------ #

def _compiler_params():
    return pltpu.CompilerParams(
        dimension_semantics=("parallel",),       # batch axis: independent per image
        vmem_limit_bytes=_VMEM_LIMIT,
    )


def _conv_stage(x, scale, bias, w_mat, *, relu):
    N, H, W, Cin = x.shape
    Cout = w_mat.shape[-1]
    kernel = functools.partial(_conv_stage_kernel, relu=relu)
    flops = 2 * N * H * W * 9 * Cin * Cout
    bytes_accessed = (x.size * x.dtype.itemsize
                      + w_mat.size * w_mat.dtype.itemsize
                      + N * H * W * Cout * 2                # bf16 y out
                      + N * 2 * Cout * 4)                   # f32 stats out
    y, stats = pl.pallas_call(
        kernel,
        grid=(N,),
        in_specs=[
            pl.BlockSpec((1, H, W, Cin), lambda n: (n, 0, 0, 0)),
            pl.BlockSpec((1, Cin), lambda n: (0, 0)),
            pl.BlockSpec((1, Cin), lambda n: (0, 0)),
            pl.BlockSpec((3, 3 * Cin, Cout), lambda n: (0, 0, 0)),
        ],
        out_specs=(
            pl.BlockSpec((1, H, W, Cout), lambda n: (n, 0, 0, 0)),
            pl.BlockSpec((1, 2, Cout), lambda n: (n, 0, 0)),
        ),
        out_shape=(
            jax.ShapeDtypeStruct((N, H, W, Cout), jnp.bfloat16),
            jax.ShapeDtypeStruct((N, 2, Cout), jnp.float32),
        ),
        compiler_params=_compiler_params(),
        cost_estimate=pl.CostEstimate(flops=int(flops), transcendentals=0,
                                      bytes_accessed=int(bytes_accessed)),
    )(x, scale, bias, w_mat)
    return y, stats


def _finalize(x, y2, scale2, bias2):
    N, H, W, C = x.shape
    return pl.pallas_call(
        _finalize_kernel,
        grid=(N,),
        in_specs=[
            pl.BlockSpec((1, H, W, C), lambda n: (n, 0, 0, 0)),
            pl.BlockSpec((1, H, W, C), lambda n: (n, 0, 0, 0)),
            pl.BlockSpec((1, C), lambda n: (0, 0)),
            pl.BlockSpec((1, C), lambda n: (0, 0)),
        ],
        out_specs=pl.BlockSpec((1, H, W, C), lambda n: (n, 0, 0, 0)),
        out_shape=jax.ShapeDtypeStruct((N, H, W, C), jnp.float32),
        input_output_aliases={0: 0},     # write the result in place over x (its last use)
        compiler_params=_compiler_params(),
    )(x, y2, scale2, bias2)


def _stats_to_affine(stats, gamma, beta, per_image_count, num_images):
    """Combine per-image (sum, centered sumsq) partials into BN (scale, bias)."""
    stats = stats.astype(jnp.float32)
    cnt = jnp.float32(per_image_count)
    total = jnp.float32(per_image_count * num_images)
    mean_i = stats[:, 0, :] / cnt                                  # [N, C] per-image means
    mean = jnp.sum(mean_i, axis=0) / num_images                    # [C] (equal counts)
    ss_within = jnp.sum(stats[:, 1, :], axis=0)                    # [C]
    ss_between = cnt * jnp.sum(jnp.square(mean_i - mean[None, :]), axis=0)
    var = jnp.maximum((ss_within + ss_between) / total, 0.0)       # biased (train-mode)
    scale = gamma.astype(jnp.float32) * jax.lax.rsqrt(var + EPS)
    bias = beta.astype(jnp.float32) - mean * scale
    return scale[None, :], bias[None, :]                           # (1, C) each


@jax.jit
def resnet_block_pallas(x_nchw, w1, g1, b1, w2, g2, b2):
    """x + conv_block(x). NCHW in / NCHW out (PyTorch convention); NHWC inside."""
    x = jnp.transpose(x_nchw, (0, 2, 3, 1)).astype(jnp.float32)    # NHWC, channels on lanes
    N, H, W, C = x.shape
    c_mid = w1.shape[-1]
    c_out = w2.shape[-1]

    # kh-major [3, 3*Cin, Cout] bf16 weights: one K=3*Cin matmul per row band.
    w1m = w1.reshape(3, 3 * C, c_mid).astype(jnp.bfloat16)
    w2m = w2.reshape(3, 3 * c_mid, c_out).astype(jnp.bfloat16)

    ident_sc = jnp.ones((1, C), jnp.float32)
    ident_bi = jnp.zeros((1, C), jnp.float32)

    # Stage 1: conv1 raw output (bf16) + exact per-image stats.
    y1, st1 = _conv_stage(x, ident_sc, ident_bi, w1m, relu=False)
    sc1, bi1 = _stats_to_affine(st1, g1, b1, H * W, N)

    # Stage 2: BN1-affine + ReLU + conv2, fused; raw conv2 output (bf16) + stats.
    y2, st2 = _conv_stage(y1, sc1, bi1, w2m, relu=True)
    sc2, bi2 = _stats_to_affine(st2, g2, b2, H * W, N)

    # Finalize: BN2-affine + residual add (output aliased onto x's buffer).
    out = _finalize(x, y2, sc2, bi2)
    return jnp.transpose(out, (0, 3, 1, 2))                        # -> NCHW


# ------------------------------- pure-JAX ref -------------------------------- #

def _reflect_pad1(x_nhwc):
    return jnp.pad(x_nhwc, ((0, 0), (1, 1), (1, 1), (0, 0)), mode="reflect")


def resnet_block_ref(x_nchw, w1, g1, b1, w2, g2, b2, conv_dtype=jnp.float32):
    x = jnp.transpose(x_nchw, (0, 2, 3, 1))

    def conv_bn(h, w, g, b, relu):
        hp = _reflect_pad1(h)
        y = jax.lax.conv_general_dilated(
            hp.astype(conv_dtype), w.astype(conv_dtype),
            window_strides=(1, 1), padding="VALID",
            dimension_numbers=("NHWC", "HWIO", "NHWC"),
            preferred_element_type=jnp.float32)
        mean = jnp.mean(y, axis=(0, 1, 2), keepdims=True)
        var = jnp.mean(jnp.square(y - mean), axis=(0, 1, 2), keepdims=True)
        y = (y - mean) * jax.lax.rsqrt(var + EPS)
        y = y * g.reshape(1, 1, 1, -1) + b.reshape(1, 1, 1, -1)
        return jnp.maximum(y, 0.0) if relu else y

    h = conv_bn(x, w1, g1, b1, relu=True)
    h = conv_bn(h, w2, g2, b2, relu=False)
    return jnp.transpose(x + h, (0, 3, 1, 2))


# ----------------------------------- main ------------------------------------ #

if __name__ == "__main__":
    N, C, H, W = 2, 4, 16, 16          # dim == dim_out (required by the residual)

    key = jax.random.PRNGKey(0)
    ks = jax.random.split(key, 7)
    x = jax.random.normal(ks[0], (N, C, H, W), jnp.float32)
    # Conv weights in HWIO [3,3,Cin,Cout]; module uses bias=False.
    w1 = 0.2 * jax.random.normal(ks[1], (3, 3, C, C), jnp.float32)
    w2 = 0.2 * jax.random.normal(ks[2], (3, 3, C, C), jnp.float32)
    # BatchNorm affine params (near PyTorch defaults 1 / 0).
    g1 = 1.0 + 0.1 * jax.random.normal(ks[3], (C,), jnp.float32)
    b1 = 0.1 * jax.random.normal(ks[4], (C,), jnp.float32)
    g2 = 1.0 + 0.1 * jax.random.normal(ks[5], (C,), jnp.float32)
    b2 = 0.1 * jax.random.normal(ks[6], (C,), jnp.float32)

    out = jax.block_until_ready(resnet_block_pallas(x, w1, g1, b1, w2, g2, b2))
    assert out.shape == (N, C, H, W)

    # Check vs a reference that also uses bf16 conv operands (isolates kernel bugs;
    # slightly looser than before because y1/y2 now round-trip HBM as bf16).
    ref_bf16 = jax.block_until_ready(
        resnet_block_ref(x, w1, g1, b1, w2, g2, b2, conv_dtype=jnp.bfloat16))
    assert np.allclose(np.asarray(out), np.asarray(ref_bf16), atol=2e-2, rtol=2e-2), (
        "mismatch vs bf16-operand reference")

    # Looser check vs the full-f32 reference (bf16 MXU inputs introduce ~1e-2 noise).
    ref_f32 = jax.block_until_ready(
        resnet_block_ref(x, w1, g1, b1, w2, g2, b2, conv_dtype=jnp.float32))
    assert np.allclose(np.asarray(out), np.asarray(ref_f32), atol=5e-2, rtol=5e-2), (
        "mismatch vs f32 reference")

    print("KERNEL_OK")
</pallas_src>

<mosaic_0001>
module attributes {stable_mosaic.version = 11 : i64} {
  func.func @_conv_stage_kernel(%arg0: i32, %arg1: memref<1x16x16x4xf32, #tpu.memory_space<vmem>>, %arg2: memref<1x4xf32, #tpu.memory_space<vmem>>, %arg3: memref<1x4xf32, #tpu.memory_space<vmem>>, %arg4: memref<3x12x4xbf16, #tpu.memory_space<vmem>>, %arg5: memref<1x16x16x4xbf16, #tpu.memory_space<vmem>>, %arg6: memref<1x2x4xf32, #tpu.memory_space<vmem>>) attributes {dimension_semantics = [#tpu.dimension_semantics<parallel>], iteration_bounds = array<i64: 2>, scalar_prefetch = 0 : i64, scratch_operands = 0 : i64, tpu.core_type = #tpu.core_type<tc>, window_params = [{transform_indices = @transform_0, window_bounds = array<i64: 1, 16, 16, 4>}, {pipeline_mode = #tpu.pipeline_mode<synchronous>, transform_indices = @transform_1, window_bounds = array<i64: 1, 4>}, {pipeline_mode = #tpu.pipeline_mode<synchronous>, transform_indices = @transform_2, window_bounds = array<i64: 1, 4>}, {pipeline_mode = #tpu.pipeline_mode<synchronous>, transform_indices = @transform_3, window_bounds = array<i64: 3, 12, 4>}, {transform_indices = @transform_4, window_bounds = array<i64: 1, 16, 16, 4>}, {transform_indices = @transform_5, window_bounds = array<i64: 1, 2, 4>}]} {
    %c0 = arith.constant 0 : index
    %c0_0 = arith.constant 0 : index
    %0 = vector.load %arg2[%c0, %c0_0] : memref<1x4xf32, #tpu.memory_space<vmem>>, vector<1x4xf32>
    %1 = vector.shape_cast %0 : vector<1x4xf32> to vector<1x1x4xf32>
    %c0_1 = arith.constant 0 : index
    %c0_2 = arith.constant 0 : index
    %2 = vector.load %arg3[%c0_1, %c0_2] : memref<1x4xf32, #tpu.memory_space<vmem>>, vector<1x4xf32>
    %3 = vector.shape_cast %2 : vector<1x4xf32> to vector<1x1x4xf32>
    %c0_3 = arith.constant 0 : index
    %c0_4 = arith.constant 0 : index
    %c0_5 = arith.constant 0 : index
    %c0_6 = arith.constant 0 : index
    %4 = vector.load %arg1[%c0_3, %c0_4, %c0_5, %c0_6] : memref<1x16x16x4xf32, #tpu.memory_space<vmem>>, vector<1x16x16x4xf32>
    %5 = vector.shape_cast %4 : vector<1x16x16x4xf32> to vector<16x16x4xf32>
    %6 = vector.broadcast %1 : vector<1x1x4xf32> to vector<16x16x4xf32>
    %7 = arith.mulf %5, %6 : vector<16x16x4xf32>
    %8 = vector.broadcast %3 : vector<1x1x4xf32> to vector<16x16x4xf32>
    %9 = arith.addf %7, %8 : vector<16x16x4xf32>
    %10 = arith.truncf %9 : vector<16x16x4xf32> to vector<16x16x4xbf16>
    %11 = vector.extract_strided_slice %10 {offsets = [1, 0, 0], sizes = [1, 16, 4], strides = [1, 1, 1]} : vector<16x16x4xbf16> to vector<1x16x4xbf16>
    %12 = vector.extract_strided_slice %10 {offsets = [14, 0, 0], sizes = [1, 16, 4], strides = [1, 1, 1]} : vector<16x16x4xbf16> to vector<1x16x4xbf16>
    %13 = tpu.concatenate %11, %10, %12 in 0 : vector<1x16x4xbf16>, vector<16x16x4xbf16>, vector<1x16x4xbf16> -> vector<18x16x4xbf16>
    %14 = vector.extract_strided_slice %13 {offsets = [0, 1, 0], sizes = [18, 1, 4], strides = [1, 1, 1]} : vector<18x16x4xbf16> to vector<18x1x4xbf16>
    %15 = vector.extract_strided_slice %13 {offsets = [0, 14, 0], sizes = [18, 1, 4], strides = [1, 1, 1]} : vector<18x16x4xbf16> to vector<18x1x4xbf16>
    %16 = tpu.concatenate %14, %13, %15 in 1 : vector<18x1x4xbf16>, vector<18x16x4xbf16>, vector<18x1x4xbf16> -> vector<18x18x4xbf16>
    %17 = vector.extract_strided_slice %16 {offsets = [0, 0, 0], sizes = [18, 16, 4], strides = [1, 1, 1]} : vector<18x18x4xbf16> to vector<18x16x4xbf16>
    %18 = vector.extract_strided_slice %16 {offsets = [0, 1, 0], sizes = [18, 16, 4], strides = [1, 1, 1]} : vector<18x18x4xbf16> to vector<18x16x4xbf16>
    %19 = vector.extract_strided_slice %16 {offsets = [0, 2, 0], sizes = [18, 16, 4], strides = [1, 1, 1]} : vector<18x18x4xbf16> to vector<18x16x4xbf16>
    %20 = tpu.concatenate %17, %18, %19 in 2 : vector<18x16x4xbf16>, vector<18x16x4xbf16>, vector<18x16x4xbf16> -> vector<18x16x12xbf16>
    %cst = arith.constant 0.000000e+00 : f32
    %21 = vector.broadcast %cst : f32 to vector<256x4xf32>
    %22 = vector.extract_strided_slice %20 {offsets = [0, 0, 0], sizes = [16, 16, 12], strides = [1, 1, 1]} : vector<18x16x12xbf16> to vector<16x16x12xbf16>
    %23 = vector.shape_cast %22 : vector<16x16x12xbf16> to vector<256x12xbf16>
    %c0_7 = arith.constant 0 : index
    %c0_8 = arith.constant 0 : index
    %c0_9 = arith.constant 0 : index
    %24 = vector.load %arg4[%c0_7, %c0_8, %c0_9] : memref<3x12x4xbf16, #tpu.memory_space<vmem>>, vector<1x12x4xbf16>
    %25 = vector.shape_cast %24 : vector<1x12x4xbf16> to vector<12x4xbf16>
    %cst_10 = arith.constant dense<0.000000e+00> : vector<256x4xf32>
    %26 = tpu.matmul %23, %25, %cst_10 {dimension_numbers = #tpu.dot_dimension_numbers<[1], [0], [0], [1], [0, 0, 1, 1], [], []>} : vector<256x12xbf16>, vector<12x4xbf16>, vector<256x4xf32> -> vector<256x4xf32>
    %27 = arith.addf %21, %26 : vector<256x4xf32>
    %28 = vector.extract_strided_slice %20 {offsets = [1, 0, 0], sizes = [16, 16, 12], strides = [1, 1, 1]} : vector<18x16x12xbf16> to vector<16x16x12xbf16>
    %29 = vector.shape_cast %28 : vector<16x16x12xbf16> to vector<256x12xbf16>
    %c1 = arith.constant 1 : index
    %c0_11 = arith.constant 0 : index
    %c0_12 = arith.constant 0 : index
    %30 = vector.load %arg4[%c1, %c0_11, %c0_12] : memref<3x12x4xbf16, #tpu.memory_space<vmem>>, vector<1x12x4xbf16>
    %31 = vector.shape_cast %30 : vector<1x12x4xbf16> to vector<12x4xbf16>
    %cst_13 = arith.constant dense<0.000000e+00> : vector<256x4xf32>
    %32 = tpu.matmul %29, %31, %cst_13 {dimension_numbers = #tpu.dot_dimension_numbers<[1], [0], [0], [1], [0, 0, 1, 1], [], []>} : vector<256x12xbf16>, vector<12x4xbf16>, vector<256x4xf32> -> vector<256x4xf32>
    %33 = arith.addf %27, %32 : vector<256x4xf32>
    %34 = vector.extract_strided_slice %20 {offsets = [2, 0, 0], sizes = [16, 16, 12], strides = [1, 1, 1]} : vector<18x16x12xbf16> to vector<16x16x12xbf16>
    %35 = vector.shape_cast %34 : vector<16x16x12xbf16> to vector<256x12xbf16>
    %c2 = arith.constant 2 : index
    %c0_14 = arith.constant 0 : index
    %c0_15 = arith.constant 0 : index
    %36 = vector.load %arg4[%c2, %c0_14, %c0_15] : memref<3x12x4xbf16, #tpu.memory_space<vmem>>, vector<1x12x4xbf16>
    %37 = vector.shape_cast %36 : vector<1x12x4xbf16> to vector<12x4xbf16>
    %cst_16 = arith.constant dense<0.000000e+00> : vector<256x4xf32>
    %38 = tpu.matmul %35, %37, %cst_16 {dimension_numbers = #tpu.dot_dimension_numbers<[1], [0], [0], [1], [0, 0, 1, 1], [], []>} : vector<256x12xbf16>, vector<12x4xbf16>, vector<256x4xf32> -> vector<256x4xf32>
    %39 = arith.addf %33, %38 : vector<256x4xf32>
    %cst_17 = arith.constant dense<0.000000e+00> : vector<4xf32>
    %40 = vector.multi_reduction <add>, %39, %cst_17 [0] : vector<256x4xf32> to vector<4xf32>
    %41 = vector.shape_cast %40 : vector<4xf32> to vector<1x4xf32>
    %cst_18 = arith.constant 2.560000e+02 : f32
    %42 = vector.broadcast %cst_18 : f32 to vector<1x4xf32>
    %43 = arith.divf %41, %42 : vector<1x4xf32>
    %44 = vector.broadcast %43 : vector<1x4xf32> to vector<256x4xf32>
    %45 = arith.subf %39, %44 : vector<256x4xf32>
    %46 = arith.mulf %45, %45 : vector<256x4xf32>
    %cst_19 = arith.constant dense<0.000000e+00> : vector<4xf32>
    %47 = vector.multi_reduction <add>, %46, %cst_19 [0] : vector<256x4xf32> to vector<4xf32>
    %48 = vector.shape_cast %47 : vector<4xf32> to vector<1x4xf32>
    %49 = tpu.concatenate %41, %48 in 0 : vector<1x4xf32>, vector<1x4xf32> -> vector<2x4xf32>
    %50 = vector.shape_cast %49 : vector<2x4xf32> to vector<1x2x4xf32>
    %c0_20 = arith.constant 0 : index
    %c0_21 = arith.constant 0 : index
    %c0_22 = arith.constant 0 : index
    %51 = vector.load %arg6[%c0_20, %c0_21, %c0_22] : memref<1x2x4xf32, #tpu.memory_space<vmem>>, vector<1x2x4xf32>
    tpu.vector_store %arg6[%c0_20, %c0_21, %c0_22], %50 {strides = array<i32>} : memref<1x2x4xf32, #tpu.memory_space<vmem>>, vector<1x2x4xf32>,
    %52 = vector.shape_cast %39 : vector<256x4xf32> to vector<1x16x16x4xf32>
    %53 = arith.truncf %52 : vector<1x16x16x4xf32> to vector<1x16x16x4xbf16>
    %c0_23 = arith.constant 0 : index
    %c0_24 = arith.constant 0 : index
    %c0_25 = arith.constant 0 : index
    %c0_26 = arith.constant 0 : index
    %54 = vector.load %arg5[%c0_23, %c0_24, %c0_25, %c0_26] : memref<1x16x16x4xbf16, #tpu.memory_space<vmem>>, vector<1x16x16x4xbf16>
    tpu.vector_store %arg5[%c0_23, %c0_24, %c0_25, %c0_26], %53 {strides = array<i32>} : memref<1x16x16x4xbf16, #tpu.memory_space<vmem>>, vector<1x16x16x4xbf16>,
    return
  }
  func.func @transform_0(%arg0: i32) -> (i32, i32, i32, i32) {
    %c0_i32 = arith.constant 0 : i32
    %c0_i32_0 = arith.constant 0 : i32
    %c0_i32_1 = arith.constant 0 : i32
    %c0_i32_2 = arith.constant 0 : i32
    return %arg0, %c0_i32, %c0_i32_0, %c0_i32_1 : i32, i32, i32, i32
  }
  func.func @transform_1(%arg0: i32) -> (i32, i32) {
    %c0_i32 = arith.constant 0 : i32
    %c0_i32_0 = arith.constant 0 : i32
    %c0_i32_1 = arith.constant 0 : i32
    return %c0_i32, %c0_i32_0 : i32, i32
  }
  func.func @transform_2(%arg0: i32) -> (i32, i32) {
    %c0_i32 = arith.constant 0 : i32
    %c0_i32_0 = arith.constant 0 : i32
    %c0_i32_1 = arith.constant 0 : i32
    return %c0_i32, %c0_i32_0 : i32, i32
  }
  func.func @transform_3(%arg0: i32) -> (i32, i32, i32) {
    %c0_i32 = arith.constant 0 : i32
    %c0_i32_0 = arith.constant 0 : i32
    %c0_i32_1 = arith.constant 0 : i32
    %c0_i32_2 = arith.constant 0 : i32
    return %c0_i32, %c0_i32_0, %c0_i32_1 : i32, i32, i32
  }
  func.func @transform_4(%arg0: i32) -> (i32, i32, i32, i32) {
    %c0_i32 = arith.constant 0 : i32
    %c0_i32_0 = arith.constant 0 : i32
    %c0_i32_1 = arith.constant 0 : i32
    %c0_i32_2 = arith.constant 0 : i32
    return %arg0, %c0_i32, %c0_i32_0, %c0_i32_1 : i32, i32, i32, i32
  }
  func.func @transform_5(%arg0: i32) -> (i32, i32, i32) {
    %c0_i32 = arith.constant 0 : i32
    %c0_i32_0 = arith.constant 0 : i32
    %c0_i32_1 = arith.constant 0 : i32
    return %arg0, %c0_i32, %c0_i32_0 : i32, i32, i32
  }
}

module attributes {stable_mosaic.version = 11 : i64} {
  func.func @_conv_stage_kernel(%arg0: i32, %arg1: memref<1x16x16x4xbf16, #tpu.memory_space<vmem>>, %arg2: memref<1x4xf32, #tpu.memory_space<vmem>>, %arg3: memref<1x4xf32, #tpu.memory_space<vmem>>, %arg4: memref<3x12x4xbf16, #tpu.memory_space<vmem>>, %arg5: memref<1x16x16x4xbf16, #tpu.memory_space<vmem>>, %arg6: memref<1x2x4xf32, #tpu.memory_space<vmem>>) attributes {dimension_semantics = [#tpu.dimension_semantics<parallel>], iteration_bounds = array<i64: 2>, scalar_prefetch = 0 : i64, scratch_operands = 0 : i64, tpu.core_type = #tpu.core_type<tc>, window_params = [{transform_indices = @transform_0, window_bounds = array<i64: 1, 16, 16, 4>}, {pipeline_mode = #tpu.pipeline_mode<synchronous>, transform_indices = @transform_1, window_bounds = array<i64: 1, 4>}, {pipeline_mode = #tpu.pipeline_mode<synchronous>, transform_indices = @transform_2, window_bounds = array<i64: 1, 4>}, {pipeline_mode = #tpu.pipeline_mode<synchronous>, transform_indices = @transform_3, window_bounds = array<i64: 3, 12, 4>}, {transform_indices = @transform_4, window_bounds = array<i64: 1, 16, 16, 4>}, {transform_indices = @transform_5, window_bounds = array<i64: 1, 2, 4>}]} {
    %c0 = arith.constant 0 : index
    %c0_0 = arith.constant 0 : index
    %0 = vector.load %arg2[%c0, %c0_0] : memref<1x4xf32, #tpu.memory_space<vmem>>, vector<1x4xf32>
    %1 = vector.shape_cast %0 : vector<1x4xf32> to vector<1x1x4xf32>
    %c0_1 = arith.constant 0 : index
    %c0_2 = arith.constant 0 : index
    %2 = vector.load %arg3[%c0_1, %c0_2] : memref<1x4xf32, #tpu.memory_space<vmem>>, vector<1x4xf32>
    %3 = vector.shape_cast %2 : vector<1x4xf32> to vector<1x1x4xf32>
    %c0_3 = arith.constant 0 : index
    %c0_4 = arith.constant 0 : index
    %c0_5 = arith.constant 0 : index
    %c0_6 = arith.constant 0 : index
    %4 = vector.load %arg1[%c0_3, %c0_4, %c0_5, %c0_6] : memref<1x16x16x4xbf16, #tpu.memory_space<vmem>>, vector<1x16x16x4xbf16>
    %5 = vector.shape_cast %4 : vector<1x16x16x4xbf16> to vector<16x16x4xbf16>
    %6 = arith.extf %5 : vector<16x16x4xbf16> to vector<16x16x4xf32>
    %7 = vector.broadcast %1 : vector<1x1x4xf32> to vector<16x16x4xf32>
    %8 = arith.mulf %6, %7 : vector<16x16x4xf32>
    %9 = vector.broadcast %3 : vector<1x1x4xf32> to vector<16x16x4xf32>
    %10 = arith.addf %8, %9 : vector<16x16x4xf32>
    %cst = arith.constant 0.000000e+00 : f32
    %11 = vector.broadcast %cst : f32 to vector<16x16x4xf32>
    %12 = arith.maximumf %10, %11 : vector<16x16x4xf32>
    %13 = arith.truncf %12 : vector<16x16x4xf32> to vector<16x16x4xbf16>
    %14 = vector.extract_strided_slice %13 {offsets = [1, 0, 0], sizes = [1, 16, 4], strides = [1, 1, 1]} : vector<16x16x4xbf16> to vector<1x16x4xbf16>
    %15 = vector.extract_strided_slice %13 {offsets = [14, 0, 0], sizes = [1, 16, 4], strides = [1, 1, 1]} : vector<16x16x4xbf16> to vector<1x16x4xbf16>
    %16 = tpu.concatenate %14, %13, %15 in 0 : vector<1x16x4xbf16>, vector<16x16x4xbf16>, vector<1x16x4xbf16> -> vector<18x16x4xbf16>
    %17 = vector.extract_strided_slice %16 {offsets = [0, 1, 0], sizes = [18, 1, 4], strides = [1, 1, 1]} : vector<18x16x4xbf16> to vector<18x1x4xbf16>
    %18 = vector.extract_strided_slice %16 {offsets = [0, 14, 0], sizes = [18, 1, 4], strides = [1, 1, 1]} : vector<18x16x4xbf16> to vector<18x1x4xbf16>
    %19 = tpu.concatenate %17, %16, %18 in 1 : vector<18x1x4xbf16>, vector<18x16x4xbf16>, vector<18x1x4xbf16> -> vector<18x18x4xbf16>
    %20 = vector.extract_strided_slice %19 {offsets = [0, 0, 0], sizes = [18, 16, 4], strides = [1, 1, 1]} : vector<18x18x4xbf16> to vector<18x16x4xbf16>
    %21 = vector.extract_strided_slice %19 {offsets = [0, 1, 0], sizes = [18, 16, 4], strides = [1, 1, 1]} : vector<18x18x4xbf16> to vector<18x16x4xbf16>
    %22 = vector.extract_strided_slice %19 {offsets = [0, 2, 0], sizes = [18, 16, 4], strides = [1, 1, 1]} : vector<18x18x4xbf16> to vector<18x16x4xbf16>
    %23 = tpu.concatenate %20, %21, %22 in 2 : vector<18x16x4xbf16>, vector<18x16x4xbf16>, vector<18x16x4xbf16> -> vector<18x16x12xbf16>
    %cst_7 = arith.constant 0.000000e+00 : f32
    %24 = vector.broadcast %cst_7 : f32 to vector<256x4xf32>
    %25 = vector.extract_strided_slice %23 {offsets = [0, 0, 0], sizes = [16, 16, 12], strides = [1, 1, 1]} : vector<18x16x12xbf16> to vector<16x16x12xbf16>
    %26 = vector.shape_cast %25 : vector<16x16x12xbf16> to vector<256x12xbf16>
    %c0_8 = arith.constant 0 : index
    %c0_9 = arith.constant 0 : index
    %c0_10 = arith.constant 0 : index
    %27 = vector.load %arg4[%c0_8, %c0_9, %c0_10] : memref<3x12x4xbf16, #tpu.memory_space<vmem>>, vector<1x12x4xbf16>
    %28 = vector.shape_cast %27 : vector<1x12x4xbf16> to vector<12x4xbf16>
    %cst_11 = arith.constant dense<0.000000e+00> : vector<256x4xf32>
    %29 = tpu.matmul %26, %28, %cst_11 {dimension_numbers = #tpu.dot_dimension_numbers<[1], [0], [0], [1], [0, 0, 1, 1], [], []>} : vector<256x12xbf16>, vector<12x4xbf16>, vector<256x4xf32> -> vector<256x4xf32>
    %30 = arith.addf %24, %29 : vector<256x4xf32>
    %31 = vector.extract_strided_slice %23 {offsets = [1, 0, 0], sizes = [16, 16, 12], strides = [1, 1, 1]} : vector<18x16x12xbf16> to vector<16x16x12xbf16>
    %32 = vector.shape_cast %31 : vector<16x16x12xbf16> to vector<256x12xbf16>
    %c1 = arith.constant 1 : index
    %c0_12 = arith.constant 0 : index
    %c0_13 = arith.constant 0 : index
    %33 = vector.load %arg4[%c1, %c0_12, %c0_13] : memref<3x12x4xbf16, #tpu.memory_space<vmem>>, vector<1x12x4xbf16>
    %34 = vector.shape_cast %33 : vector<1x12x4xbf16> to vector<12x4xbf16>
    %cst_14 = arith.constant dense<0.000000e+00> : vector<256x4xf32>
    %35 = tpu.matmul %32, %34, %cst_14 {dimension_numbers = #tpu.dot_dimension_numbers<[1], [0], [0], [1], [0, 0, 1, 1], [], []>} : vector<256x12xbf16>, vector<12x4xbf16>, vector<256x4xf32> -> vector<256x4xf32>
    %36 = arith.addf %30, %35 : vector<256x4xf32>
    %37 = vector.extract_strided_slice %23 {offsets = [2, 0, 0], sizes = [16, 16, 12], strides = [1, 1, 1]} : vector<18x16x12xbf16> to vector<16x16x12xbf16>
    %38 = vector.shape_cast %37 : vector<16x16x12xbf16> to vector<256x12xbf16>
    %c2 = arith.constant 2 : index
    %c0_15 = arith.constant 0 : index
    %c0_16 = arith.constant 0 : index
    %39 = vector.load %arg4[%c2, %c0_15, %c0_16] : memref<3x12x4xbf16, #tpu.memory_space<vmem>>, vector<1x12x4xbf16>
    %40 = vector.shape_cast %39 : vector<1x12x4xbf16> to vector<12x4xbf16>
    %cst_17 = arith.constant dense<0.000000e+00> : vector<256x4xf32>
    %41 = tpu.matmul %38, %40, %cst_17 {dimension_numbers = #tpu.dot_dimension_numbers<[1], [0], [0], [1], [0, 0, 1, 1], [], []>} : vector<256x12xbf16>, vector<12x4xbf16>, vector<256x4xf32> -> vector<256x4xf32>
    %42 = arith.addf %36, %41 : vector<256x4xf32>
    %cst_18 = arith.constant dense<0.000000e+00> : vector<4xf32>
    %43 = vector.multi_reduction <add>, %42, %cst_18 [0] : vector<256x4xf32> to vector<4xf32>
    %44 = vector.shape_cast %43 : vector<4xf32> to vector<1x4xf32>
    %cst_19 = arith.constant 2.560000e+02 : f32
    %45 = vector.broadcast %cst_19 : f32 to vector<1x4xf32>
    %46 = arith.divf %44, %45 : vector<1x4xf32>
    %47 = vector.broadcast %46 : vector<1x4xf32> to vector<256x4xf32>
    %48 = arith.subf %42, %47 : vector<256x4xf32>
    %49 = arith.mulf %48, %48 : vector<256x4xf32>
    %cst_20 = arith.constant dense<0.000000e+00> : vector<4xf32>
    %50 = vector.multi_reduction <add>, %49, %cst_20 [0] : vector<256x4xf32> to vector<4xf32>
    %51 = vector.shape_cast %50 : vector<4xf32> to vector<1x4xf32>
    %52 = tpu.concatenate %44, %51 in 0 : vector<1x4xf32>, vector<1x4xf32> -> vector<2x4xf32>
    %53 = vector.shape_cast %52 : vector<2x4xf32> to vector<1x2x4xf32>
    %c0_21 = arith.constant 0 : index
    %c0_22 = arith.constant 0 : index
    %c0_23 = arith.constant 0 : index
    %54 = vector.load %arg6[%c0_21, %c0_22, %c0_23] : memref<1x2x4xf32, #tpu.memory_space<vmem>>, vector<1x2x4xf32>
    tpu.vector_store %arg6[%c0_21, %c0_22, %c0_23], %53 {strides = array<i32>} : memref<1x2x4xf32, #tpu.memory_space<vmem>>, vector<1x2x4xf32>,
    %55 = vector.shape_cast %42 : vector<256x4xf32> to vector<1x16x16x4xf32>
    %56 = arith.truncf %55 : vector<1x16x16x4xf32> to vector<1x16x16x4xbf16>
    %c0_24 = arith.constant 0 : index
    %c0_25 = arith.constant 0 : index
    %c0_26 = arith.constant 0 : index
    %c0_27 = arith.constant 0 : index
    %57 = vector.load %arg5[%c0_24, %c0_25, %c0_26, %c0_27] : memref<1x16x16x4xbf16, #tpu.memory_space<vmem>>, vector<1x16x16x4xbf16>
    tpu.vector_store %arg5[%c0_24, %c0_25, %c0_26, %c0_27], %56 {strides = array<i32>} : memref<1x16x16x4xbf16, #tpu.memory_space<vmem>>, vector<1x16x16x4xbf16>,
    return
  }
  func.func @transform_0(%arg0: i32) -> (i32, i32, i32, i32) {
    %c0_i32 = arith.constant 0 : i32
    %c0_i32_0 = arith.constant 0 : i32
    %c0_i32_1 = arith.constant 0 : i32
    %c0_i32_2 = arith.constant 0 : i32
    return %arg0, %c0_i32, %c0_i32_0, %c0_i32_1 : i32, i32, i32, i32
  }
  func.func @transform_1(%arg0: i32) -> (i32, i32) {
    %c0_i32 = arith.constant 0 : i32
    %c0_i32_0 = arith.constant 0 : i32
    %c0_i32_1 = arith.constant 0 : i32
    return %c0_i32, %c0_i32_0 : i32, i32
  }
  func.func @transform_2(%arg0: i32) -> (i32, i32) {
    %c0_i32 = arith.constant 0 : i32
    %c0_i32_0 = arith.constant 0 : i32
    %c0_i32_1 = arith.constant 0 : i32
    return %c0_i32, %c0_i32_0 : i32, i32
  }
  func.func @transform_3(%arg0: i32) -> (i32, i32, i32) {
    %c0_i32 = arith.constant 0 : i32
    %c0_i32_0 = arith.constant 0 : i32
    %c0_i32_1 = arith.constant 0 : i32
    %c0_i32_2 = arith.constant 0 : i32
    return %c0_i32, %c0_i32_0, %c0_i32_1 : i32, i32, i32
  }
  func.func @transform_4(%arg0: i32) -> (i32, i32, i32, i32) {
    %c0_i32 = arith.constant 0 : i32
    %c0_i32_0 = arith.constant 0 : i32
    %c0_i32_1 = arith.constant 0 : i32
    %c0_i32_2 = arith.constant 0 : i32
    return %arg0, %c0_i32, %c0_i32_0, %c0_i32_1 : i32, i32, i32, i32
  }
  func.func @transform_5(%arg0: i32) -> (i32, i32, i32) {
    %c0_i32 = arith.constant 0 : i32
    %c0_i32_0 = arith.constant 0 : i32
    %c0_i32_1 = arith.constant 0 : i32
    return %arg0, %c0_i32, %c0_i32_0 : i32, i32, i32
  }
}

module attributes {stable_mosaic.version = 11 : i64} {
  func.func @_finalize_kernel(%arg0: i32, %arg1: memref<1x16x16x4xf32, #tpu.memory_space<vmem>>, %arg2: memref<1x16x16x4xbf16, #tpu.memory_space<vmem>>, %arg3: memref<1x4xf32, #tpu.memory_space<vmem>>, %arg4: memref<1x4xf32, #tpu.memory_space<vmem>>, %arg5: memref<1x16x16x4xf32, #tpu.memory_space<vmem>>) attributes {dimension_semantics = [#tpu.dimension_semantics<parallel>], iteration_bounds = array<i64: 2>, scalar_prefetch = 0 : i64, scratch_operands = 0 : i64, tpu.core_type = #tpu.core_type<tc>, window_params = [{transform_indices = @transform_0, window_bounds = array<i64: 1, 16, 16, 4>}, {transform_indices = @transform_1, window_bounds = array<i64: 1, 16, 16, 4>}, {pipeline_mode = #tpu.pipeline_mode<synchronous>, transform_indices = @transform_2, window_bounds = array<i64: 1, 4>}, {pipeline_mode = #tpu.pipeline_mode<synchronous>, transform_indices = @transform_3, window_bounds = array<i64: 1, 4>}, {transform_indices = @transform_4, window_bounds = array<i64: 1, 16, 16, 4>}]} {
    %c0 = arith.constant 0 : index
    %c0_0 = arith.constant 0 : index
    %0 = vector.load %arg3[%c0, %c0_0] : memref<1x4xf32, #tpu.memory_space<vmem>>, vector<1x4xf32>
    %1 = vector.shape_cast %0 : vector<1x4xf32> to vector<1x1x1x4xf32>
    %c0_1 = arith.constant 0 : index
    %c0_2 = arith.constant 0 : index
    %2 = vector.load %arg4[%c0_1, %c0_2] : memref<1x4xf32, #tpu.memory_space<vmem>>, vector<1x4xf32>
    %3 = vector.shape_cast %2 : vector<1x4xf32> to vector<1x1x1x4xf32>
    %c0_3 = arith.constant 0 : index
    %c0_4 = arith.constant 0 : index
    %c0_5 = arith.constant 0 : index
    %c0_6 = arith.constant 0 : index
    %4 = vector.load %arg1[%c0_3, %c0_4, %c0_5, %c0_6] : memref<1x16x16x4xf32, #tpu.memory_space<vmem>>, vector<1x16x16x4xf32>
    %c0_7 = arith.constant 0 : index
    %c0_8 = arith.constant 0 : index
    %c0_9 = arith.constant 0 : index
    %c0_10 = arith.constant 0 : index
    %5 = vector.load %arg2[%c0_7, %c0_8, %c0_9, %c0_10] : memref<1x16x16x4xbf16, #tpu.memory_space<vmem>>, vector<1x16x16x4xbf16>
    %6 = arith.extf %5 : vector<1x16x16x4xbf16> to vector<1x16x16x4xf32>
    %7 = vector.broadcast %1 : vector<1x1x1x4xf32> to vector<1x16x16x4xf32>
    %8 = arith.mulf %6, %7 : vector<1x16x16x4xf32>
    %9 = arith.addf %4, %8 : vector<1x16x16x4xf32>
    %10 = vector.broadcast %3 : vector<1x1x1x4xf32> to vector<1x16x16x4xf32>
    %11 = arith.addf %9, %10 : vector<1x16x16x4xf32>
    %c0_11 = arith.constant 0 : index
    %c0_12 = arith.constant 0 : index
    %c0_13 = arith.constant 0 : index
    %c0_14 = arith.constant 0 : index
    %12 = vector.load %arg5[%c0_11, %c0_12, %c0_13, %c0_14] : memref<1x16x16x4xf32, #tpu.memory_space<vmem>>, vector<1x16x16x4xf32>
    tpu.vector_store %arg5[%c0_11, %c0_12, %c0_13, %c0_14], %11 {strides = array<i32>} : memref<1x16x16x4xf32, #tpu.memory_space<vmem>>, vector<1x16x16x4xf32>,
    return
  }
  func.func @transform_0(%arg0: i32) -> (i32, i32, i32, i32) {
    %c0_i32 = arith.constant 0 : i32
    %c0_i32_0 = arith.constant 0 : i32
    %c0_i32_1 = arith.constant 0 : i32
    %c0_i32_2 = arith.constant 0 : i32
    return %arg0, %c0_i32, %c0_i32_0, %c0_i32_1 : i32, i32, i32, i32
  }
  func.func @transform_1(%arg0: i32) -> (i32, i32, i32, i32) {
    %c0_i32 = arith.constant 0 : i32
    %c0_i32_0 = arith.constant 0 : i32
    %c0_i32_1 = arith.constant 0 : i32
    %c0_i32_2 = arith.constant 0 : i32
    return %arg0, %c0_i32, %c0_i32_0, %c0_i32_1 : i32, i32, i32, i32
  }
  func.func @transform_2(%arg0: i32) -> (i32, i32) {
    %c0_i32 = arith.constant 0 : i32
    %c0_i32_0 = arith.constant 0 : i32
    %c0_i32_1 = arith.constant 0 : i32
    return %c0_i32, %c0_i32_0 : i32, i32
  }
  func.func @transform_3(%arg0: i32) -> (i32, i32) {
    %c0_i32 = arith.constant 0 : i32
    %c0_i32_0 = arith.constant 0 : i32
    %c0_i32_1 = arith.constant 0 : i32
    return %c0_i32, %c0_i32_0 : i32, i32
  }
  func.func @transform_4(%arg0: i32) -> (i32, i32, i32, i32) {
    %c0_i32 = arith.constant 0 : i32
    %c0_i32_0 = arith.constant 0 : i32
    %c0_i32_1 = arith.constant 0 : i32
    %c0_i32_2 = arith.constant 0 : i32
    return %arg0, %c0_i32, %c0_i32_0, %c0_i32_1 : i32, i32, i32, i32
  }
}

</mosaic_0001>

<bundles_post_ra>
// kernel: resnet_block_pallas.5
= control target key start
LH: loop header
LB: loop body
LE: loop exit
PB: predicated region body
PF: predicated region fallthrough
CT: control target
= control target key end

     0   :  { %s656_s15 = smov 0   ;;  %s945_s0 = inlined_call_operand.vmem [shape: f32[2,16,16,4], index: 0, kind: input, shape index: {}, may-alias: {0,4}]   ;;  %s946_s1 = inlined_call_operand.vmem [shape: bf16[2,16,16,4], index: 1, kind: input, shape index: {}]   ;;  %s947_s2 = inlined_call_operand.vmem [shape: f32[1,4], index: 2, kind: input, shape index: {}]   ;;  %s948_s3 = inlined_call_operand.vmem [shape: f32[1,4], index: 3, kind: input, shape index: {}]   ;;  %s949_s4 = inlined_call_operand.vmem [shape: f32[2,16,16,4], index: 4, kind: output, shape index: {}, may-alias: {0,4}]  }
   0x1 LB: > { %s518_s16 = sadd.s32 4294967295, %s629_s15   ;;  %p522_p0 = scmp.ge.s32.totalorder %s629_s15, 1  ;;  %s629_s15 = sphi %s656_s15, %s14_s15  }
   0x2   : > { %p172_p1 = scmp.lt.s32.totalorder %s629_s15, 3 }
   0x4   : > { %p173_p2 = pnand %p522_p0, %p172_p1 }
   0x5   : > { %p203_p3 = scmp.lt.s32.totalorder (!%p173_p2), %s518_s16, 1 }
   0x6   : > { %176 = sbr.rel (%p173_p2) target bundleno = 60 (0x3c), region = 36 }
   0xb   : > { %s951_s16 = smov (!%p203_p3, %s518_s16), 1  ;;  %v679_v5 = vld [vmem:[%s947_s2] ss:$0 sm:$0xff]  ;;  %vm418_vm0 = vcmask 31744  }
   0xc   : > { %s532_s17 = sshll.u32 %s951_s16, 7  ;;  %s531_s21 = sshll.u32 %s951_s16, 8  ;;  %v716_v35 = vld [vmem:[%s948_s3] ss:$0 sm:$0xff] }
   0xd   : > { %s670_s20 = scalar_lea.vmem %s946_s1, %s532_s17  ;;  %s687_s26 = scalar_lea.vmem %s945_s0, %s531_s21 }
   0xe   : > { %v535_v0 = vld [vmem:[%s670_s20] sm:$0xff]   ;;  %v598_v1 = vld [vmem:[%s670_s20 + $0x8] sm:$0xff]   ;;  %v599_v2 = vld [vmem:[%s670_s20 + $0x10] sm:$0xff]   ;;  %s732_s5 = scalar_lea.vmem %s949_s4, %s531_s21 }
   0xf   : > { %v536_v3 = vunpack.c.l.bf16 %v535_v0  ;;  %v537_v4 = vunpack.c.h.bf16 %v535_v0  ;;  %v540_v6 = vunpack.c.l.bf16 %v598_v1  ;;  %v541_v7 = vunpack.c.h.bf16 %v598_v1  ;;  %v600_v8 = vld [vmem:[%s670_s20 + $0x18] sm:$0xff]   ;;  %v601_v11 = vld [vmem:[%s670_s20 + $0x20] sm:$0xff]   ;;  %v221_v16 = vld [vmem:[%s687_s26 + $0x8] sm:$0xff] }
  0x10   : > { %v544_v9 = vunpack.c.l.bf16 %v599_v2  ;;  %v545_v10 = vunpack.c.h.bf16 %v599_v2  ;;  %v548_v12 = vunpack.c.l.bf16 %v600_v8  ;;  %v220_v15 = vld [vmem:[%s687_s26] sm:$0xff]  ;;  %v549_v17 = vunpack.c.h.bf16 %v600_v8  ;;  %v695_v18 = vld [vmem:[%s670_s20 + $0x28] sm:$0xff]   ;;  %v222_v21 = vld [vmem:[%s687_s26 + $0x10] sm:$0xff] }
  0x11   : > { %v319_v13 = vmul.f32 %v679_v5, %v536_v3  ;;  %v320_v14 = vmul.f32 %v679_v5, %v537_v4  ;;  %v321_v19 = vmul.f32 %v679_v5, %v540_v6  ;;  %v322_v20 = vmul.f32 %v679_v5, %v541_v7  ;;  %v223_v22 = vld [vmem:[%s687_s26 + $0x18] sm:$0xff]  ;;  %v224_v25 = vld [vmem:[%s687_s26 + $0x20] sm:$0xff]  ;;  %v704_v27 = vld [vmem:[%s670_s20 + $0x30] sm:$0xff]  }
  0x12   : > { %v552_v23 = vunpack.c.l.bf16 %v601_v11  ;;  %v323_v24 = vmul.f32 %v679_v5, %v544_v9  ;;  %v553_v26 = vunpack.c.h.bf16 %v601_v11  ;;  %v324_v28 = vmul.f32 %v679_v5, %v545_v10  ;;  %v225_v29 = vld [vmem:[%s687_s26 + $0x28] sm:$0xff]  ;;  %v710_v31 = vld [vmem:[%s670_s20 + $0x38] sm:$0xff]   ;;  %v226_v36 = vld [vmem:[%s687_s26 + $0x30] sm:$0xff] }
  0x13   : > { %v556_v30 = vunpack.c.l.bf16 %v695_v18  ;;  %v325_v32 = vmul.f32 %v679_v5, %v548_v12  ;;  %v351_v33 = vadd.f32 %v319_v13, %v220_v15  ;;  %v352_v34 = vadd.f32 %v320_v14, %v221_v16  ;;  %v227_v41 = vld [vmem:[%s687_s26 + $0x38] sm:$0xff]  ;;  %v228_v42 = vld [vmem:[%s687_s26 + $0x40] sm:$0xff]  ;;  %v229_v43 = vld [vmem:[%s687_s26 + $0x48] sm:$0xff] }
  0x14   : > { %v557_v37 = vunpack.c.h.bf16 %v695_v18  ;;  %v326_v38 = vmul.f32 %v679_v5, %v549_v17  ;;  %v353_v39 = vadd.f32 %v321_v19, %v222_v21  ;;  %v354_v40 = vadd.f32 %v322_v20, %v223_v22  ;;  %v230_v48 = vld [vmem:[%s687_s26 + $0x50] sm:$0xff]  ;;  %v231_v49 = vld [vmem:[%s687_s26 + $0x58] sm:$0xff]  ;;  %v232_v50 = vld [vmem:[%s687_s26 + $0x60] sm:$0xff] }
  0x15   : > { %v560_v44 = vunpack.c.l.bf16 %v704_v27  ;;  %v561_v45 = vunpack.c.h.bf16 %v704_v27  ;;  %v327_v46 = vmul.f32 %v679_v5, %v552_v23  ;;  %v355_v47 = vadd.f32 %v323_v24, %v224_v25  ;;  %v738_v51 = vld [vmem:[%s687_s26 + $0x68] sm:$0xff]  ;;  %v741_v52 = vld [vmem:[%s687_s26 + $0x70] sm:$0xff]  ;;  %v744_v53 = vld [vmem:[%s687_s26 + $0x78] sm:$0xff] }
  0x16   : > { %v747_v54 = vld [vmem:[%s687_s26 + $0x80] sm:$0xff]  ;;  %v750_v55 = vld [vmem:[%s687_s26 + $0x88] sm:$0xff]  ;;  %v753_v56 = vld [vmem:[%s687_s26 + $0x90] sm:$0xff]  ;;  %v564_v1 = vunpack.c.l.bf16 %v710_v31  ;;  %v565_v2 = vunpack.c.h.bf16 %v710_v31  ;;  %v328_v4 = vmul.f32 %v679_v5, %v553_v26  ;;  %v356_v6 = vadd.f32 %v324_v28, %v225_v29 }
  0x17   : > { %v756_v57 = vld [vmem:[%s687_s26 + $0x98] sm:$0xff]  ;;  %v759_v58 = vld [vmem:[%s687_s26 + $0xa0] sm:$0xff]  ;;  %v762_v59 = vld [vmem:[%s687_s26 + $0xa8] sm:$0xff]  ;;  %v329_v10 = vmul.f32 %v679_v5, %v556_v30  ;;  %v357_v11 = vadd.f32 %v325_v32, %v226_v36  ;;  %v386_v12 = vadd.f32 %v716_v35, %v351_v33  ;;  %v387_v13 = vadd.f32 %v716_v35, %v352_v34 }
  0x18   : > { %v765_v60 = vld [vmem:[%s687_s26 + $0xb0] sm:$0xff]  ;;  %v768_v61 = vld [vmem:[%s687_s26 + $0xb8] sm:$0xff]  ;;  %v771_v62 = vld [vmem:[%s687_s26 + $0xc0] sm:$0xff]  ;;  %v330_v17 = vmul.f32 %v679_v5, %v557_v37  ;;  %v358_v18 = vadd.f32 %v326_v38, %v227_v41  ;;  %v388_v19 = vadd.f32 %v716_v35, %v353_v39  ;;  %v389_v20 = vadd.f32 %v716_v35, %v354_v40 }
  0x19   : > { %v774_v63 = vld [vmem:[%s687_s26 + $0xc8] sm:$0xff]  ;;  %v777_v0 = vld [vmem:[%s687_s26 + $0xd0] sm:$0xff]  ;;  %v605_v3 = vld [vmem:[%s670_s20 + $0x40] sm:$0xff]   ;;  %v331_v22 = vmul.f32 %v679_v5, %v560_v44  ;;  %v359_v23 = vadd.f32 %v327_v46, %v228_v42  ;;  %v390_v24 = vadd.f32 %v716_v35, %v355_v47  ;;  %v332_v27 = vmul.f32 %v679_v5, %v561_v45 }
  0x1a   : > { %v784_v7 = vld [vmem:[%s687_s26 + $0xd8] sm:$0xff]  ;;  %v787_v8 = vld [vmem:[%s687_s26 + $0xe0] sm:$0xff]  ;;  %v790_v9 = vld [vmem:[%s687_s26 + $0xe8] sm:$0xff]  ;;  %v568_v21 = vunpack.c.l.bf16 %v605_v3  ;;  %v569_v25 = vunpack.c.h.bf16 %v605_v3  ;;  %v360_v28 = vadd.f32 %v328_v4, %v229_v43  ;;  %v391_v29 = vadd.f32 %v716_v35, %v356_v6 }
  0x1b   : > { %v796_v14 = vld [vmem:[%s687_s26 + $0xf0] sm:$0xff]  ;;  %v799_v15 = vld [vmem:[%s687_s26 + $0xf8] sm:$0xff]  ;;  %v606_v16 = vld [vmem:[%s670_s20 + $0x48] sm:$0xff]   ;;  %v333_v31 = vmul.f32 %v679_v5, %v564_v1  ;;  %v361_v32 = vadd.f32 %v329_v10, %v230_v48  ;;  %v392_v33 = vadd.f32 %v716_v35, %v357_v11  ;;  %v334_v37 = vmul.f32 %v679_v5, %v565_v2 }
  0x1c   : > { %419 = vst.msk [vmem:[%s732_s5] sm:$0xff] %vm418_vm0, %v386_v12  ;;  %v607_v26 = vld [vmem:[%s670_s20 + $0x50] sm:$0xff]   ;;  %v572_v30 = vunpack.c.l.bf16 %v606_v16  ;;  %v573_v34 = vunpack.c.h.bf16 %v606_v16  ;;  %v608_v36 = vld [vmem:[%s670_s20 + $0x58] sm:$0xff]   ;;  %v362_v38 = vadd.f32 %v330_v17, %v231_v49  ;;  %v393_v39 = vadd.f32 %v716_v35, %v358_v18  ;;  %v609_v45 = vld [vmem:[%s670_s20 + $0x60] sm:$0xff]  }
  0x1d   : > { %420 = vst.msk [vmem:[%s732_s5 + $0x8] sm:$0xff] %vm418_vm0, %v387_v13  ;;  %v576_v40 = vunpack.c.l.bf16 %v607_v26  ;;  %v335_v41 = vmul.f32 %v679_v5, %v568_v21  ;;  %v363_v42 = vadd.f32 %v331_v22, %v232_v50  ;;  %v394_v43 = vadd.f32 %v716_v35, %v359_v23  ;;  %v610_v4 = vld [vmem:[%s670_s20 + $0x68] sm:$0xff]   ;;  %v611_v17 = vld [vmem:[%s670_s20 + $0x70] sm:$0xff]  }
  0x1e   : > { %421 = vst.msk [vmem:[%s732_s5 + $0x10] sm:$0xff] %vm418_vm0, %v388_v19  ;;  %v577_v44 = vunpack.c.h.bf16 %v607_v26  ;;  %v336_v46 = vmul.f32 %v679_v5, %v569_v25  ;;  %v364_v47 = vadd.f32 %v332_v27, %v738_v51  ;;  %v395_v48 = vadd.f32 %v716_v35, %v360_v28 }
  0x1f   : > { %422 = vst.msk [vmem:[%s732_s5 + $0x18] sm:$0xff] %vm418_vm0, %v389_v20  ;;  %v580_v49 = vunpack.c.l.bf16 %v608_v36  ;;  %v337_v1 = vmul.f32 %v679_v5, %v572_v30  ;;  %v365_v50 = vadd.f32 %v333_v31, %v741_v52  ;;  %v396_v2 = vadd.f32 %v716_v35, %v361_v32 }
  0x20   : > { %423 = vst.msk [vmem:[%s732_s5 + $0x20] sm:$0xff] %vm418_vm0, %v390_v24  ;;  %v581_v3 = vunpack.c.h.bf16 %v608_v36  ;;  %v338_v51 = vmul.f32 %v679_v5, %v573_v34  ;;  %v366_v6 = vadd.f32 %v334_v37, %v744_v53  ;;  %v397_v10 = vadd.f32 %v716_v35, %v362_v38  ;;  %v612_v24 = vld [vmem:[%s670_s20 + $0x78] sm:$0xff]  }
  0x21   : > { %424 = vst.msk [vmem:[%s732_s5 + $0x28] sm:$0xff] %vm418_vm0, %v391_v29  ;;  %v584_v11 = vunpack.c.l.bf16 %v609_v45  ;;  %v339_v12 = vmul.f32 %v679_v5, %v576_v40  ;;  %v367_v52 = vadd.f32 %v335_v41, %v747_v54  ;;  %v398_v13 = vadd.f32 %v716_v35, %v363_v42 }
  0x22   : > { %425 = vst.msk [vmem:[%s732_s5 + $0x30] sm:$0xff] %vm418_vm0, %v392_v33  ;;  %v585_v16 = vunpack.c.h.bf16 %v609_v45  ;;  %v340_v53 = vmul.f32 %v679_v5, %v577_v44  ;;  %v368_v18 = vadd.f32 %v336_v46, %v750_v55  ;;  %v399_v19 = vadd.f32 %v716_v35, %v364_v47 }
  0x23   : > { %426 = vst.msk [vmem:[%s732_s5 + $0x38] sm:$0xff] %vm418_vm0, %v393_v39  ;;  %v588_v20 = vunpack.c.l.bf16 %v610_v4  ;;  %v341_v21 = vmul.f32 %v679_v5, %v580_v49  ;;  %v369_v54 = vadd.f32 %v337_v1, %v753_v56  ;;  %v400_v22 = vadd.f32 %v716_v35, %v365_v50 }
  0x24   : > { %427 = vst.msk [vmem:[%s732_s5 + $0x40] sm:$0xff] %vm418_vm0, %v394_v43  ;;  %v589_v23 = vunpack.c.h.bf16 %v610_v4  ;;  %v342_v25 = vmul.f32 %v679_v5, %v581_v3  ;;  %v370_v55 = vadd.f32 %v338_v51, %v756_v57  ;;  %v401_v26 = vadd.f32 %v716_v35, %v366_v6 }
  0x25   : > { %428 = vst.msk [vmem:[%s732_s5 + $0x48] sm:$0xff] %vm418_vm0, %v395_v48  ;;  %v592_v27 = vunpack.c.l.bf16 %v611_v17  ;;  %v343_v28 = vmul.f32 %v679_v5, %v584_v11  ;;  %v371_v56 = vadd.f32 %v339_v12, %v759_v58  ;;  %v402_v29 = vadd.f32 %v716_v35, %v367_v52 }
  0x26   : > { %429 = vst.msk [vmem:[%s732_s5 + $0x50] sm:$0xff] %vm418_vm0, %v396_v2  ;;  %v593_v30 = vunpack.c.h.bf16 %v611_v17  ;;  %v344_v31 = vmul.f32 %v679_v5, %v585_v16  ;;  %v372_v57 = vadd.f32 %v340_v53, %v762_v59  ;;  %v403_v32 = vadd.f32 %v716_v35, %v368_v18 }
  0x27   : > { %430 = vst.msk [vmem:[%s732_s5 + $0x58] sm:$0xff] %vm418_vm0, %v397_v10  ;;  %v596_v33 = vunpack.c.l.bf16 %v612_v24  ;;  %v345_v34 = vmul.f32 %v679_v5, %v588_v20  ;;  %v373_v58 = vadd.f32 %v341_v21, %v765_v60  ;;  %v404_v36 = vadd.f32 %v716_v35, %v369_v54 }
  0x28   : > { %431 = vst.msk [vmem:[%s732_s5 + $0x60] sm:$0xff] %vm418_vm0, %v398_v13  ;;  %v597_v37 = vunpack.c.h.bf16 %v612_v24  ;;  %v346_v38 = vmul.f32 %v679_v5, %v589_v23  ;;  %v374_v59 = vadd.f32 %v342_v25, %v768_v61  ;;  %v405_v39 = vadd.f32 %v716_v35, %v370_v55 }
  0x29   : > { %432 = vst.msk [vmem:[%s732_s5 + $0x68] sm:$0xff] %vm418_vm0, %v399_v19  ;;  %v347_v40 = vmul.f32 %v679_v5, %v592_v27  ;;  %v375_v41 = vadd.f32 %v343_v28, %v771_v62  ;;  %v406_v60 = vadd.f32 %v716_v35, %v371_v56  ;;  %v348_v42 = vmul.f32 %v679_v5, %v593_v30 }
  0x2a   : > { %433 = vst.msk [vmem:[%s732_s5 + $0x70] sm:$0xff] %vm418_vm0, %v400_v22  ;;  %v376_v43 = vadd.f32 %v344_v31, %v774_v63  ;;  %v407_v61 = vadd.f32 %v716_v35, %v372_v57  ;;  %v349_v44 = vmul.f32 %v679_v5, %v596_v33  ;;  %v377_v45 = vadd.f32 %v345_v34, %v777_v0 }
  0x2b   : > { %434 = vst.msk [vmem:[%s732_s5 + $0x78] sm:$0xff] %vm418_vm0, %v401_v26  ;;  %v408_v62 = vadd.f32 %v716_v35, %v373_v58  ;;  %v350_v46 = vmul.f32 %v679_v5, %v597_v37  ;;  %v378_v47 = vadd.f32 %v346_v38, %v784_v7  ;;  %v409_v63 = vadd.f32 %v716_v35, %v374_v59 }
  0x2c   : > { %435 = vst.msk [vmem:[%s732_s5 + $0x80] sm:$0xff] %vm418_vm0, %v402_v29  ;;  %v379_v48 = vadd.f32 %v347_v40, %v787_v8  ;;  %v410_v49 = vadd.f32 %v716_v35, %v375_v41  ;;  %v380_v0 = vadd.f32 %v348_v42, %v790_v9  ;;  %v411_v5 = vadd.f32 %v716_v35, %v376_v43 }
  0x2d   : > { %436 = vst.msk [vmem:[%s732_s5 + $0x88] sm:$0xff] %vm418_vm0, %v403_v32  ;;  %v381_v7 = vadd.f32 %v349_v44, %v796_v14  ;;  %v412_v1 = vadd.f32 %v716_v35, %v377_v45  ;;  %v382_v8 = vadd.f32 %v350_v46, %v799_v15  ;;  %v413_v50 = vadd.f32 %v716_v35, %v378_v47 }
  0x2e   : > { %437 = vst.msk [vmem:[%s732_s5 + $0x90] sm:$0xff] %vm418_vm0, %v404_v36  ;;  %v414_v9 = vadd.f32 %v716_v35, %v379_v48  ;;  %v415_v2 = vadd.f32 %v716_v35, %v380_v0 }
  0x2f   : > { %438 = vst.msk [vmem:[%s732_s5 + $0x98] sm:$0xff] %vm418_vm0, %v405_v39  ;;  %v416_v14 = vadd.f32 %v716_v35, %v381_v7  ;;  %v417_v3 = vadd.f32 %v716_v35, %v382_v8 }
  0x30   : > { %439 = vst.msk [vmem:[%s732_s5 + $0xa0] sm:$0xff] %vm418_vm0, %v406_v60 }
  0x31   : > { %440 = vst.msk [vmem:[%s732_s5 + $0xa8] sm:$0xff] %vm418_vm0, %v407_v61 }
  0x32   : > { %441 = vst.msk [vmem:[%s732_s5 + $0xb0] sm:$0xff] %vm418_vm0, %v408_v62 }
  0x33   : > { %442 = vst.msk [vmem:[%s732_s5 + $0xb8] sm:$0xff] %vm418_vm0, %v409_v63 }
  0x34   : > { %443 = vst.msk [vmem:[%s732_s5 + $0xc0] sm:$0xff] %vm418_vm0, %v410_v49 }
  0x35   : > { %444 = vst.msk [vmem:[%s732_s5 + $0xc8] sm:$0xff] %vm418_vm0, %v411_v5 }
  0x36   : > { %445 = vst.msk [vmem:[%s732_s5 + $0xd0] sm:$0xff] %vm418_vm0, %v412_v1 }
  0x37   : > { %446 = vst.msk [vmem:[%s732_s5 + $0xd8] sm:$0xff] %vm418_vm0, %v413_v50 }
  0x38   : > { %447 = vst.msk [vmem:[%s732_s5 + $0xe0] sm:$0xff] %vm418_vm0, %v414_v9 }
  0x39   : > { %448 = vst.msk [vmem:[%s732_s5 + $0xe8] sm:$0xff] %vm418_vm0, %v415_v2 }
  0x3a   : > { %449 = vst.msk [vmem:[%s732_s5 + $0xf0] sm:$0xff] %vm418_vm0, %v416_v14 }
  0x3b   : > { %450 = vst.msk [vmem:[%s732_s5 + $0xf8] sm:$0xff] %vm418_vm0, %v417_v3 }
  0x3c PF: > { %s14_s15 = sadd.s32 1, %s629_s15  }
  0x3d   : > { %p11_p4 = scmp.ge.s32.totalorder %s14_s15, 4  }
  0x3f   :  { %13 = sbr.rel (!%p11_p4) target bundleno = 1 (0x1), region = 69 }

// kernel: resnet_block_pallas.3
= control target key start
LH: loop header
LB: loop body
LE: loop exit
PB: predicated region body
PF: predicated region fallthrough
CT: control target
= control target key end

     0   :  { %s2084_s18 = smov 0   ;;  %s3008_s0 = inlined_call_operand.vmem [shape: f32[2,16,16,4], index: 0, kind: input, shape index: {}]   ;;  %s3009_s1 = inlined_call_operand.vmem [shape: f32[1,4], index: 1, kind: input, shape index: {}]   ;;  %s3010_s2 = inlined_call_operand.vmem [shape: f32[1,4], index: 2, kind: input, shape index: {}]   ;;  %s3011_s3 = inlined_call_operand.vmem [shape: bf16[3,12,4], index: 3, kind: input, shape index: {}]   ;;  %s3012_s4 = inlined_call_operand.vmem [shape: bf16[2,16,16,4], index: 4, kind: output, shape index: {0}]   ;;  %s3013_s5 = inlined_call_operand.vmem [shape: f32[2,2,4], index: 5, kind: output, shape index: {1}]  }
   0x1 LB: > { %s1942_s19 = sadd.s32 4294967295, %s2049_s18   ;;  %p1946_p0 = scmp.ge.s32.totalorder %s2049_s18, 1  ;;  %s2049_s18 = sphi %s2084_s18, %s16_s18  }
   0x2   : > { %p190_p1 = scmp.lt.s32.totalorder %s2049_s18, 3 }
   0x4   : > { %p191_p2 = pnand %p1946_p0, %p190_p1 }
   0x5   : > { %p222_p3 = scmp.lt.s32.totalorder (!%p191_p2), %s1942_s19, 1  ;;  %s2051_s28 = smov (!%p191_p2), 4  }
   0x6   : > { %194 = sbr.rel (%p191_p2) target bundleno = 596 (0x254), region = 36  ;;  %s2052_s29 = smov (!%p191_p2), 8  }
   0xb   : > { %s3017_s19 = smov (!%p222_p3, %s1942_s19), 1  ;;  %v2097_v0 = vld [vmem:[%s3009_s1] ss:$0 sm:$0xff]  ;;  %vm773_vm0 = vcmask 1040384   ;;  %vm774_vm1 = vsmask.f32 256 }
   0xc   : > { %s2018_s22 = sshll.u32 %s3017_s19, 8  ;;  %v2108_v1 = vld [vmem:[%s3010_s2] ss:$0 sm:$0xff]  ;;  %vm1065_vm2 = vcmask 1046528   ;;  %vm808_vm3 = vsmask.f32 7424  ;;  %vm2140_vm4 = vmand %vm773_vm0, %vm774_vm1 }
   0xd   : > { %s2103_s25 = scalar_lea.vmem %s3008_s0, %s2018_s22  ;;  %vm1255_vm5 = vcmask 1045504   ;;  %vm1146_vm6 = vcmask 31744   ;;  %vm1179_vm7 = vcmask 64512   ;;  %vm1222_vm8 = vcmask 97280   ;;  %s2019_s23 = sshll.u32 %s3017_s19, 7 }
   0xe   : > { %v241_v2 = vld [vmem:[%s2103_s25 + $0x10] sm:$0xff]  ;;  %v242_v3 = vld [vmem:[%s2103_s25 + $0x18] sm:$0xff]  ;;  %v239_v4 = vld [vmem:[%s2103_s25] sm:$0xff]  ;;  %s2571_s26 = scalar_lea.vmem %s3012_s4, %s2019_s23  ;;  %vm1823_vm9 = vcmask 27648   ;;  %s1951_s27 = sshll.u32 %s3017_s19, 1  ;;  %vm1789_vm11 = vcmask 25600  }
   0xf   : > { %v276_v5 = vmul.f32 %v2097_v0, %v241_v2  ;;  %v277_v6 = vmul.f32 %v2097_v0, %v242_v3  ;;  %v240_v7 = vld [vmem:[%s2103_s25 + $0x8] sm:$0xff]  ;;  %v274_v8 = vmul.f32 %v2097_v0, %v239_v4  ;;  %v243_v9 = vld [vmem:[%s2103_s25 + $0x20] sm:$0xff]  ;;  %s235_s30 = scalar_lea.vmem %s3013_s5, %s1951_s27 }
  0x10   : > { %v244_v10 = vld [vmem:[%s2103_s25 + $0x28] sm:$0xff]  ;;  %v275_v11 = vmul.f32 %v2097_v0, %v240_v7  ;;  %v278_v12 = vmul.f32 %v2097_v0, %v243_v9  ;;  %v263_v14 = vld [vmem:[%s2103_s25 + $0xc0] sm:$0xff] }
  0x11   : > { %v279_v13 = vmul.f32 %v2097_v0, %v244_v10  ;;  %v264_v15 = vld [vmem:[%s2103_s25 + $0xc8] sm:$0xff]  ;;  %v311_v16 = vadd.f32 %v2108_v1, %v276_v5  ;;  %v312_v17 = vadd.f32 %v2108_v1, %v277_v6  ;;  %v309_v18 = vadd.f32 %v2108_v1, %v274_v8 }
  0x12   : > { %v298_v19 = vmul.f32 %v2097_v0, %v263_v14  ;;  %v310_v20 = vadd.f32 %v2108_v1, %v275_v11  ;;  %v313_v21 = vadd.f32 %v2108_v1, %v278_v12  ;;  %v299_v23 = vmul.f32 %v2097_v0, %v264_v15 }
  0x13   : > { %v314_v22 = vadd.f32 %v2108_v1, %v279_v13  ;;  %v343_v24 = vpack.c.bf16 %v311_v16, %v311_v16  ;;  %v344_v25 = vpack.c.bf16 %v312_v17, %v312_v17  ;;  %v341_v26 = vpack.c.bf16 %v309_v18, %v309_v18 }
  0x14   : > { %v333_v27 = vadd.f32 %v2108_v1, %v298_v19  ;;  %v342_v28 = vpack.c.bf16 %v310_v20, %v310_v20  ;;  %v345_v29 = vpack.c.bf16 %v313_v21, %v313_v21  ;;  %v2134_v31 = vadd.f32 %v2108_v1, %v299_v23 }
  0x15   : > { %v346_v30 = vpack.c.bf16 %v314_v22, %v314_v22  ;;  %v389_v32 = vunpack.c.l.b16 %v343_v24  ;;  %v501_v33 = vunpack.c.l.b16 %v344_v25  ;;  %v390_v34 = vunpack.c.l.b16 %v341_v26 }
  0x16   : > { %v365_v35 = vpack.c.bf16 %v333_v27, %v333_v27  ;;  %v502_v36 = vunpack.c.l.b16 %v342_v28  ;;  %v391_v37 = vunpack.c.l.b16 %v345_v29  ;;  %v366_v39 = vpack.c.bf16 %v2134_v31, %v2134_v31 }
  0x17   : > { %v503_v38 = vunpack.c.l.b16 %v346_v30  ;;  %v405_v40 = vpack.c.b16 %v389_v32, %v389_v32  ;;  %v517_v41 = vpack.c.b16 %v501_v33, %v389_v32  ;;  %v677_v42 = vpack.c.b16 %v501_v33, %v501_v33 }
  0x18   : > { %v406_v43 = vpack.c.b16 %v390_v34, %v390_v34  ;;  %v518_v44 = vpack.c.b16 %v502_v36, %v390_v34  ;;  %v678_v45 = vpack.c.b16 %v502_v36, %v502_v36  ;;  %v407_v46 = vpack.c.b16 %v391_v37, %v391_v37 }
  0x19   : > { %v519_v47 = vpack.c.b16 %v503_v38, %v391_v37  ;;  %v422_v48 = vshrl.u32 %v405_v40, 16  ;;  %v534_v49 = vshrl.u32 %v517_v41, 16  ;;  %v537_v50 = vshll.u32 %v517_v41, 16  ;;  %v265_v40 = vld [vmem:[%s2103_s25 + $0xd0] sm:$0xff] }
  0x1a   : > { %v694_v51 = vshll.u32 %v677_v42, 16  ;;  %v425_v52 = vshrl.u32 %v406_v43, 16  ;;  %v541_v53 = vshrl.u32 %v518_v44, 16  ;;  %v544_v54 = vshll.u32 %v518_v44, 16 }
  0x1b   : > { %v698_v55 = vshll.u32 %v678_v45, 16  ;;  %v536_v56 = vrot.slane %v534_v49, 7  ;;  %v428_v58 = vshrl.u32 %v407_v46, 16  ;;  %v548_v59 = vshrl.u32 %v519_v47, 16  ;;  %v266_v45 = vld [vmem:[%s2103_s25 + $0xd8] sm:$0xff]  ;;  %v245_v49 = vld [vmem:[%s2103_s25 + $0x30] sm:$0xff] }
  0x1c   : > { %v696_v57 = vrot.slane %v694_v51, 3  ;;  %v543_v61 = vrot.slane %v541_v53, 7  ;;  %v551_v63 = vshll.u32 %v519_v47, 16  ;;  %v679_v2 = vpack.c.b16 %v503_v38, %v503_v38 }
  0x1d   : > { %v700_v62 = vrot.slane %v698_v55, 3  ;;  %v539_v3 = vor.u32 %v537_v50, %v536_v56  ;;  %v550_v5 = vrot.slane %v548_v59, 7  ;;  %v401_v6 = vunpack.c.l.b16 %v365_v35  ;;  %v247_v55 = vld [vmem:[%s2103_s25 + $0x40] sm:$0xff] }
  0x1e   : > { %v792_v4 = vsel %vm2140_vm4, %v536_v56, %v696_v57  ;;  %v546_v8 = vor.u32 %v544_v54, %v543_v61  ;;  %v702_v25 = vshll.u32 %v679_v2, 16  ;;  %v513_v34 = vunpack.c.l.b16 %v366_v39  ;;  %v246_v54 = vld [vmem:[%s2103_s25 + $0x38] sm:$0xff] }
  0x1f   : > { %v817_v7 = vshll.u32 %v792_v4, 16  ;;  %v793_v9 = vsel %vm2140_vm4, %v543_v61, %v700_v62  ;;  %v1067_v10 = vrot.slane %v792_v4, 1  ;;  %v2150_v11 = vsel %vm2140_vm4, %v422_v48, %v539_v3 }
  0x20   : > { %v829_v12 = vshll.u32 %v793_v9, 16  ;;  %v1070_v13 = vrot.slane %v793_v9, 1  ;;  %v553_v14 = vor.u32 %v551_v63, %v550_v5  ;;  %v810_v15 = vshrl.u32 %v2150_v11, 16 }
  0x21   : > { %v812_v16 = vshll.u32 %v2150_v11, 16  ;;  %v819_v17 = vrot.slane %v817_v7, 1  ;;  %v2156_v18 = vsel %vm2140_vm4, %v425_v52, %v546_v8  ;;  %v1066_v22 = vrot.slane %v2150_v11, 1 }
  0x22   : > { %v822_v19 = vshrl.u32 %v2156_v18, 16  ;;  %v824_v20 = vshll.u32 %v2156_v18, 16  ;;  %v831_v21 = vrot.slane %v829_v12, 1  ;;  %v1069_v24 = vrot.slane %v2156_v18, 1 }
  0x23   : > { %v814_v23 = vrot.slane %v812_v16, 1  ;;  %v2164_v26 = vsel %vm2140_vm4, %v428_v58, %v553_v14  ;;  %v1068_v28 = vsel %vm1065_vm2, %v1066_v22, %v1067_v10  ;;  %v417_v30 = vpack.c.b16 %v401_v6, %v401_v6 }
  0x24   : > { %v826_v27 = vrot.slane %v824_v20, 1  ;;  %v1072_v29 = vrot.slane %v2164_v26, 1  ;;  %v1071_v32 = vsel %vm1065_vm2, %v1069_v24, %v1070_v13  ;;  %v704_v33 = vrot.slane %v702_v25, 3 }
  0x25   : > { %v815_v31 = vor.u32 %v814_v23, %v810_v15  ;;  %v458_v36 = vshrl.u32 %v417_v30, 16  ;;  %v834_v37 = vshrl.u32 %v2164_v26, 16  ;;  %v836_v38 = vshll.u32 %v2164_v26, 16 }
  0x26   : > { %v827_v35 = vor.u32 %v826_v27, %v822_v19  ;;  %v794_v42 = vsel %vm2140_vm4, %v550_v5, %v704_v33  ;;  %v529_v43 = vpack.c.b16 %v513_v34, %v401_v6  ;;  %v689_v44 = vpack.c.b16 %v513_v34, %v513_v34  ;;  %v248_v6 = vld [vmem:[%s2103_s25 + $0x48] sm:$0xff] }
  0x27   : > { %v820_v41 = vsel %vm808_vm3, %v815_v31, %v819_v17  ;;  %v1073_v46 = vrot.slane %v794_v42, 1  ;;  %v838_v47 = vrot.slane %v836_v38, 1  ;;  %v841_v48 = vshll.u32 %v794_v42, 16 }
  0x28   : > { %1001 = vrot.lane.b32.xlu0 %v820_v41, %s2051_s28  ;;  %v832_v39 = vsel %vm808_vm3, %v827_v35, %v831_v21  ;;  %v618_v50 = vshrl.u32 %v529_v43, 16  ;;  %v621_v51 = vshll.u32 %v529_v43, 16  ;;  %v742_v52 = vshll.u32 %v689_v44, 16 }
  0x29   : > { %1003 = vrot.lane.b32.xlu1 %v832_v39, %s2051_s28  ;;  %v300_v53 = vmul.f32 %v2097_v0, %v265_v40  ;;  %v1074_v56 = vsel %vm1065_vm2, %v1072_v29, %v1073_v46  ;;  %v839_v57 = vor.u32 %v838_v47, %v834_v37  ;;  %v843_v58 = vrot.slane %v841_v48, 1  ;;  %v267_v47 = vld [vmem:[%s2103_s25 + $0xe0] sm:$0xff] }
  0x2a   : > { %v301_v59 = vmul.f32 %v2097_v0, %v266_v45  ;;  %v620_v61 = vrot.slane %v618_v50, 7  ;;  %v744_v62 = vrot.slane %v742_v52, 3  ;;  %v280_v2 = vmul.f32 %v2097_v0, %v245_v49 }
  0x2b   : > { %v335_v63 = vadd.f32 %v2108_v1, %v300_v53  ;;  %v844_v3 = vsel %vm808_vm3, %v839_v57, %v843_v58  ;;  %v281_v5 = vmul.f32 %v2097_v0, %v246_v54  ;;  %v282_v7 = vmul.f32 %v2097_v0, %v247_v55  ;;  %v268_v57 = vld [vmem:[%s2103_s25 + $0xe8] sm:$0xff] }
  0x2c   : > { %v336_v4 = vadd.f32 %v2108_v1, %v301_v59  ;;  %v623_v8 = vor.u32 %v621_v51, %v620_v61  ;;  %v804_v9 = vsel %vm2140_vm4, %v620_v61, %v744_v62  ;;  %1005 = vrot.lane.b32.xlu2 %v844_v3, %s2051_s28  ;;  %v315_v12 = vadd.f32 %v2108_v1, %v280_v2 }
  0x2d   : > { %v367_v10 = vpack.c.bf16 %v335_v63, %v335_v63  ;;  %v1103_v13 = vrot.slane %v804_v9, 1  ;;  %v316_v15 = vadd.f32 %v2108_v1, %v281_v5  ;;  %v961_v16 = vshll.u32 %v804_v9, 16 }
  0x2e   : > { %v368_v14 = vpack.c.bf16 %v336_v4, %v336_v4  ;;  %v2199_v17 = vsel %vm2140_vm4, %v458_v36, %v623_v8  ;;  %v347_v20 = vpack.c.bf16 %v315_v12, %v315_v12  ;;  %v283_v21 = vmul.f32 %v2097_v0, %v248_v6 }
  0x2f   : > { %v402_v19 = vunpack.c.l.b16 %v367_v10  ;;  %v1102_v22 = vrot.slane %v2199_v17, 1  ;;  %v348_v24 = vpack.c.bf16 %v316_v15, %v316_v15  ;;  %v954_v25 = vshrl.u32 %v2199_v17, 16 }
  0x30   : > { %1114 = vrot.lane.b32.xlu0 %v1068_v28, %s2052_s29  ;;  %v514_v23 = vunpack.c.l.b16 %v368_v14  ;;  %v392_v29 = vunpack.c.l.b16 %v347_v20  ;;  %v956_v30 = vshll.u32 %v2199_v17, 16  ;;  %v963_v31 = vrot.slane %v961_v16, 1 }
  0x31   : > { %1116 = vrot.lane.b32.xlu1 %v1071_v32, %s2052_s29  ;;  %v418_v27 = vpack.c.b16 %v402_v19, %v402_v19  ;;  %v1104_v33 = vsel %vm1065_vm2, %v1102_v22, %v1103_v13  ;;  %v504_v36 = vunpack.c.l.b16 %v348_v24  ;;  %v317_v40 = vadd.f32 %v2108_v1, %v282_v7 }
  0x32   : > { %v530_v34 = vpack.c.b16 %v514_v23, %v402_v19  ;;  %v690_v35 = vpack.c.b16 %v514_v23, %v514_v23  ;;  %v408_v37 = vpack.c.b16 %v392_v29, %v392_v29  ;;  %v958_v38 = vrot.slane %v956_v30, 1 }
  0x33   : > { %v461_v28 = vshrl.u32 %v418_v27, 16  ;;  %v520_v43 = vpack.c.b16 %v504_v36, %v392_v29  ;;  %v680_v45 = vpack.c.b16 %v504_v36, %v504_v36  ;;  %v318_v46 = vadd.f32 %v2108_v1, %v283_v21 }
  0x34   : > { %v625_v41 = vshrl.u32 %v530_v34, 16  ;;  %v628_v42 = vshll.u32 %v530_v34, 16  ;;  %v746_v32 = vshll.u32 %v690_v35, 16  ;;  %v431_v44 = vshrl.u32 %v408_v37, 16 }
  0x35   : > { %v959_v39 = vor.u32 %v958_v38, %v954_v25  ;;  %v555_v50 = vshrl.u32 %v520_v43, 16  ;;  %v558_v51 = vshll.u32 %v520_v43, 16  ;;  %v706_v52 = vshll.u32 %v680_v45, 16 }
  0x36   : > { %v627_v48 = vrot.slane %v625_v41, 7  ;;  %v748_v49 = vrot.slane %v746_v32, 3  ;;  %v349_v54 = vpack.c.bf16 %v317_v40, %v317_v40  ;;  %v350_v55 = vpack.c.bf16 %v318_v46, %v318_v46 }
  0x37   : > { %v964_v53 = vsel %vm808_vm3, %v959_v39, %v963_v31  ;;  %v557_v61 = vrot.slane %v555_v50, 7  ;;  %v302_v62 = vmul.f32 %v2097_v0, %v267_v47  ;;  %v708_v2 = vrot.slane %v706_v52, 3  ;;  %v249_v52 = vld [vmem:[%s2103_s25 + $0x50] sm:$0xff] }
  0x38   : > { %1118 = vrot.lane.b32.xlu0 %v1074_v56, %s2052_s29  ;;  %v630_v58 = vor.u32 %v628_v42, %v627_v48  ;;  %v2216_v59 = vsel %vm2140_vm4, %v627_v48, %v748_v49  ;;  %1025 = vrot.lane.b32.xlu2 %v964_v53, %s2051_s28  ;;  %v393_v3 = vunpack.c.l.b16 %v349_v54  ;;  %v505_v4 = vunpack.c.l.b16 %v350_v55  ;;  %v250_v53 = vld [vmem:[%s2103_s25 + $0x58] sm:$0xff] }
  0x39   : > { %1138 = vrot.lane.b32.xlu1 %v1104_v33, %s2052_s29  ;;  %v973_v63 = vshll.u32 %v2216_v59, 16  ;;  %v560_v5 = vor.u32 %v558_v51, %v557_v61  ;;  %v303_v6 = vmul.f32 %v2097_v0, %v268_v57  ;;  %v337_v7 = vadd.f32 %v2108_v1, %v302_v62  ;;  %v270_v62 = vld [vmem:[%s2103_s25 + $0xf8] sm:$0xff] }
  0x3a   : > { %v2224_v56 = vsel %vm2140_vm4, %v461_v28, %v630_v58  ;;  %v795_v12 = vsel %vm2140_vm4, %v557_v61, %v708_v2  ;;  %v409_v15 = vpack.c.b16 %v393_v3, %v393_v3  ;;  %v521_v16 = vpack.c.b16 %v505_v4, %v393_v3  ;;  %v269_v61 = vld [vmem:[%s2103_s25 + $0xf0] sm:$0xff] }
  0x3b   : > { %v966_v8 = vshrl.u32 %v2224_v56, 16  ;;  %v968_v9 = vshll.u32 %v2224_v56, 16  ;;  %v975_v10 = vrot.slane %v973_v63, 1  ;;  %v2234_v13 = vsel %vm2140_vm4, %v431_v44, %v560_v5 }
  0x3c   : > { %v1076_v14 = vrot.slane %v795_v12, 1  ;;  %v1075_v20 = vrot.slane %v2234_v13, 1  ;;  %v681_v21 = vpack.c.b16 %v505_v4, %v505_v4  ;;  %v338_v22 = vadd.f32 %v2108_v1, %v303_v6 }
  0x3d   : > { %v970_v19 = vrot.slane %v968_v9, 1  ;;  %v434_v23 = vshrl.u32 %v409_v15, 16  ;;  %v562_v24 = vshrl.u32 %v521_v16, 16  ;;  %v565_v25 = vshll.u32 %v521_v16, 16 }
  0x3e   : > { %v369_v27 = vpack.c.bf16 %v337_v7, %v337_v7  ;;  %v1077_v30 = vsel %vm1065_vm2, %v1075_v20, %v1076_v14  ;;  %v710_v31 = vshll.u32 %v681_v21, 16  ;;  %v370_v33 = vpack.c.bf16 %v338_v22, %v338_v22 }
  0x3f   : > { %v971_v29 = vor.u32 %v970_v19, %v966_v8  ;;  %v564_v34 = vrot.slane %v562_v24, 7  ;;  %v846_v36 = vshrl.u32 %v2234_v13, 16  ;;  %v848_v28 = vshll.u32 %v2234_v13, 16 }
  0x40   : > { %v403_v35 = vunpack.c.l.b16 %v369_v27  ;;  %v712_v38 = vrot.slane %v710_v31, 3  ;;  %v515_v40 = vunpack.c.l.b16 %v370_v33  ;;  %v853_v41 = vshll.u32 %v795_v12, 16 }
  0x41   : > { %v976_v37 = vsel %vm808_vm3, %v971_v29, %v975_v10  ;;  %1120 = vrot.lane.b32.xlu1 %v1077_v30, %s2052_s29  ;;  %v567_v42 = vor.u32 %v565_v25, %v564_v34  ;;  %v850_v43 = vrot.slane %v848_v28, 1  ;;  %v1105_v44 = vrot.slane %v2224_v56, 1 }
  0x42   : > { %1027 = vrot.lane.b32.xlu0 %v976_v37, %s2051_s28  ;;  %v419_v32 = vpack.c.b16 %v403_v35, %v403_v35  ;;  %v2247_v45 = vsel %vm2140_vm4, %v564_v34, %v712_v38  ;;  %v531_v39 = vpack.c.b16 %v515_v40, %v403_v35  ;;  %v691_v46 = vpack.c.b16 %v515_v40, %v515_v40  ;;  %v261_v34 = vld [vmem:[%s2103_s25 + $0xb0] sm:$0xff]  ;;  %v262_v38 = vld [vmem:[%s2103_s25 + $0xb8] sm:$0xff] }
  0x43   : > { %v855_v47 = vrot.slane %v853_v41, 1  ;;  %v2251_v48 = vsel %vm2140_vm4, %v434_v23, %v567_v42  ;;  %v865_v49 = vshll.u32 %v2247_v45, 16  ;;  %v851_v51 = vor.u32 %v850_v43, %v846_v36 }
  0x44   : > { %v464_v50 = vshrl.u32 %v419_v32, 16  ;;  %v858_v54 = vshrl.u32 %v2251_v48, 16  ;;  %v860_v55 = vshll.u32 %v2251_v48, 16  ;;  %v632_v57 = vshrl.u32 %v531_v39, 16 }
  0x45   : > { %v635_v58 = vshll.u32 %v531_v39, 16  ;;  %v867_v63 = vrot.slane %v865_v49, 1  ;;  %v750_v2 = vshll.u32 %v691_v46, 16  ;;  %v856_v3 = vsel %vm808_vm3, %v851_v51, %v855_v47 }
  0x46   : > { %v1106_v4 = vrot.slane %v2216_v59, 1  ;;  %v862_v5 = vrot.slane %v860_v55, 1  ;;  %v634_v6 = vrot.slane %v632_v57, 7  ;;  %1007 = vrot.lane.b32.xlu2 %v856_v3, %s2051_s28  ;;  %v284_v7 = vmul.f32 %v2097_v0, %v249_v52 }
  0x47   : > { %v285_v8 = vmul.f32 %v2097_v0, %v250_v53  ;;  %v752_v9 = vrot.slane %v750_v2, 3  ;;  %v304_v10 = vmul.f32 %v2097_v0, %v269_v61  ;;  %v305_v12 = vmul.f32 %v2097_v0, %v270_v62  ;;  %v251_v62 = vld [vmem:[%s2103_s25 + $0x60] sm:$0xff] }
  0x48   : > { %v863_v14 = vor.u32 %v862_v5, %v858_v54  ;;  %v637_v15 = vor.u32 %v635_v58, %v634_v6  ;;  %v319_v16 = vadd.f32 %v2108_v1, %v284_v7  ;;  %v1107_v20 = vsel %vm1065_vm2, %v1105_v44, %v1106_v4 }
  0x49   : > { %v320_v59 = vadd.f32 %v2108_v1, %v285_v8  ;;  %v806_v19 = vsel %vm2140_vm4, %v634_v6, %v752_v9  ;;  %v339_v21 = vadd.f32 %v2108_v1, %v304_v10  ;;  %v340_v22 = vadd.f32 %v2108_v1, %v305_v12  ;;  %v252_v9 = vld [vmem:[%s2103_s25 + $0x68] sm:$0xff] }
  0x4a   : > { %v868_v23 = vsel %vm808_vm3, %v863_v14, %v867_v63  ;;  %v2277_v24 = vsel %vm2140_vm4, %v464_v50, %v637_v15  ;;  %v985_v25 = vshll.u32 %v806_v19, 16  ;;  %v1109_v27 = vrot.slane %v806_v19, 1 }
  0x4b   : > { %1009 = vrot.lane.b32.xlu0 %v868_v23, %s2051_s28  ;;  %v978_v29 = vshrl.u32 %v2277_v24, 16  ;;  %v980_v30 = vshll.u32 %v2277_v24, 16  ;;  %v1108_v31 = vrot.slane %v2277_v24, 1  ;;  %v351_v33 = vpack.c.bf16 %v319_v16, %v319_v16 }
  0x4c   : > { %v352_v35 = vpack.c.bf16 %v320_v59, %v320_v59  ;;  %v371_v36 = vpack.c.bf16 %v339_v21, %v339_v21  ;;  %v372_v28 = vpack.c.bf16 %v340_v22, %v340_v22  ;;  %v1078_v37 = vrot.slane %v2251_v48, 1 }
  0x4d   : > { %v982_v40 = vrot.slane %v980_v30, 1  ;;  %v987_v41 = vrot.slane %v985_v25, 1  ;;  %v394_v42 = vunpack.c.l.b16 %v351_v33  ;;  %v1079_v32 = vrot.slane %v2247_v45, 1 }
  0x4e   : > { %1140 = vrot.lane.b32.xlu2 %v1107_v20, %s2052_s29  ;;  %v506_v43 = vunpack.c.l.b16 %v352_v35  ;;  %v404_v44 = vunpack.c.l.b16 %v371_v36  ;;  %v516_v39 = vunpack.c.l.b16 %v372_v28  ;;  %v296_v46 = vmul.f32 %v2097_v0, %v261_v34 }
  0x4f   : > { %v983_v47 = vor.u32 %v982_v40, %v978_v29  ;;  %v1110_v49 = vsel %vm1065_vm2, %v1108_v31, %v1109_v27  ;;  %v410_v50 = vpack.c.b16 %v394_v42, %v394_v42  ;;  %v297_v51 = vmul.f32 %v2097_v0, %v262_v38 }
  0x50   : > { %v522_v52 = vpack.c.b16 %v506_v43, %v394_v42  ;;  %v682_v53 = vpack.c.b16 %v506_v43, %v506_v43  ;;  %v532_v54 = vpack.c.b16 %v516_v39, %v404_v44  ;;  %v1080_v55 = vsel %vm1065_vm2, %v1078_v37, %v1079_v32 }
  0x51   : > { %v988_v45 = vsel %vm808_vm3, %v983_v47, %v987_v41  ;;  %v420_v57 = vpack.c.b16 %v404_v44, %v404_v44  ;;  %v692_v58 = vpack.c.b16 %v516_v39, %v516_v39  ;;  %v331_v61 = vadd.f32 %v2108_v1, %v296_v46 }
  0x52   : > { %1029 = vrot.lane.b32.xlu1 %v988_v45, %s2051_s28  ;;  %v437_v63 = vshrl.u32 %v410_v50, 16  ;;  %v569_v2 = vshrl.u32 %v522_v52, 16  ;;  %v572_v3 = vshll.u32 %v522_v52, 16  ;;  %v714_v4 = vshll.u32 %v682_v53, 16 }
  0x53   : > { %1142 = vrot.lane.b32.xlu0 %v1110_v49, %s2052_s29  ;;  %v639_v5 = vshrl.u32 %v532_v54, 16  ;;  %v642_v6 = vshll.u32 %v532_v54, 16  ;;  %v754_v7 = vshll.u32 %v692_v58, 16  ;;  %v332_v8 = vadd.f32 %v2108_v1, %v297_v51 }
  0x54   : > { %v571_v10 = vrot.slane %v569_v2, 7  ;;  %v716_v12 = vrot.slane %v714_v4, 3  ;;  %v363_v14 = vpack.c.bf16 %v331_v61, %v331_v61  ;;  %v286_v15 = vmul.f32 %v2097_v0, %v251_v62 }
  0x55   : > { %v467_v16 = vshrl.u32 %v420_v57, 16  ;;  %v641_v59 = vrot.slane %v639_v5, 7  ;;  %v756_v19 = vrot.slane %v754_v7, 3  ;;  %v364_v20 = vpack.c.bf16 %v332_v8, %v332_v8  ;;  %v253_v57 = vld [vmem:[%s2103_s25 + $0x70] sm:$0xff] }
  0x56   : > { %v574_v21 = vor.u32 %v572_v3, %v571_v10  ;;  %v797_v22 = vsel %vm2140_vm4, %v571_v10, %v716_v12  ;;  %1122 = vrot.lane.b32.xlu2 %v1080_v55, %s2052_s29  ;;  %v400_v23 = vunpack.c.l.b16 %v363_v14  ;;  %v287_v25 = vmul.f32 %v2097_v0, %v252_v9 }
  0x57   : > { %v877_v27 = vshll.u32 %v797_v22, 16  ;;  %v644_v29 = vor.u32 %v642_v6, %v641_v59  ;;  %v807_v30 = vsel %vm2140_vm4, %v641_v59, %v756_v19  ;;  %v321_v31 = vadd.f32 %v2108_v1, %v286_v15  ;;  %v254_v6 = vld [vmem:[%s2103_s25 + $0x78] sm:$0xff] }
  0x58   : > { %v2309_v33 = vsel %vm2140_vm4, %v437_v63, %v574_v21  ;;  %v1082_v34 = vrot.slane %v797_v22, 1  ;;  %v416_v35 = vpack.c.b16 %v400_v23, %v400_v23  ;;  %v512_v36 = vunpack.c.l.b16 %v364_v20 }
  0x59   : > { %v870_v28 = vshrl.u32 %v2309_v33, 16  ;;  %v872_v37 = vshll.u32 %v2309_v33, 16  ;;  %v2315_v38 = vsel %vm2140_vm4, %v467_v16, %v644_v29  ;;  %v1112_v40 = vrot.slane %v807_v30, 1 }
  0x5a   : > { %v879_v41 = vrot.slane %v877_v27, 1  ;;  %v1111_v42 = vrot.slane %v2315_v38, 1  ;;  %v1081_v32 = vrot.slane %v2309_v33, 1  ;;  %v528_v43 = vpack.c.b16 %v512_v36, %v400_v23 }
  0x5b   : > { %v874_v44 = vrot.slane %v872_v37, 1  ;;  %v688_v39 = vpack.c.b16 %v512_v36, %v512_v36  ;;  %v322_v46 = vadd.f32 %v2108_v1, %v287_v25  ;;  %v353_v47 = vpack.c.bf16 %v321_v31, %v321_v31 }
  0x5c   : > { %v1083_v49 = vsel %vm1065_vm2, %v1081_v32, %v1082_v34  ;;  %v455_v50 = vshrl.u32 %v416_v35, 16  ;;  %v611_v51 = vshrl.u32 %v528_v43, 16  ;;  %v614_v52 = vshll.u32 %v528_v43, 16 }
  0x5d   : > { %v875_v53 = vor.u32 %v874_v44, %v870_v28  ;;  %1124 = vrot.lane.b32.xlu0 %v1083_v49, %s2052_s29  ;;  %v738_v54 = vshll.u32 %v688_v39, 16  ;;  %v354_v55 = vpack.c.bf16 %v322_v46, %v322_v46  ;;  %v395_v45 = vunpack.c.l.b16 %v353_v47 }
  0x5e   : > { %v613_v58 = vrot.slane %v611_v51, 7  ;;  %v990_v61 = vshrl.u32 %v2315_v38, 16  ;;  %v992_v62 = vshll.u32 %v2315_v38, 16  ;;  %v997_v63 = vshll.u32 %v807_v30, 16 }
  0x5f   : > { %v880_v2 = vsel %vm808_vm3, %v875_v53, %v879_v41  ;;  %v740_v3 = vrot.slane %v738_v54, 3  ;;  %v411_v4 = vpack.c.b16 %v395_v45, %v395_v45  ;;  %v507_v5 = vunpack.c.l.b16 %v354_v55  ;;  %v255_v55 = vld [vmem:[%s2103_s25 + $0x80] sm:$0xff] }
  0x60   : > { %1011 = vrot.lane.b32.xlu1 %v880_v2, %s2051_s28  ;;  %v616_v7 = vor.u32 %v614_v52, %v613_v58  ;;  %v994_v8 = vrot.slane %v992_v62, 1  ;;  %v999_v9 = vrot.slane %v997_v63, 1  ;;  %v288_v10 = vmul.f32 %v2097_v0, %v253_v57 }
  0x61   : > { %v1113_v12 = vsel %vm1065_vm2, %v1111_v42, %v1112_v40  ;;  %v2332_v14 = vsel %vm2140_vm4, %v613_v58, %v740_v3  ;;  %v523_v15 = vpack.c.b16 %v507_v5, %v395_v45  ;;  %v683_v16 = vpack.c.b16 %v507_v5, %v507_v5  ;;  %v256_v45 = vld [vmem:[%s2103_s25 + $0x88] sm:$0xff] }
  0x62   : > { %v2336_v59 = vsel %vm2140_vm4, %v455_v50, %v616_v7  ;;  %v949_v19 = vshll.u32 %v2332_v14, 16  ;;  %v995_v20 = vor.u32 %v994_v8, %v990_v61  ;;  %v289_v21 = vmul.f32 %v2097_v0, %v254_v6 }
  0x63   : > { %v942_v22 = vshrl.u32 %v2336_v59, 16  ;;  %v944_v23 = vshll.u32 %v2336_v59, 16  ;;  %v576_v25 = vshrl.u32 %v523_v15, 16  ;;  %v579_v27 = vshll.u32 %v523_v15, 16 }
  0x64   : > { %v440_v29 = vshrl.u32 %v411_v4, 16  ;;  %v718_v30 = vshll.u32 %v683_v16, 16  ;;  %v1000_v31 = vsel %vm808_vm3, %v995_v20, %v999_v9  ;;  %v323_v34 = vadd.f32 %v2108_v1, %v288_v10 }
  0x65   : > { %v946_v35 = vrot.slane %v944_v23, 1  ;;  %v951_v36 = vrot.slane %v949_v19, 1  ;;  %v578_v28 = vrot.slane %v576_v25, 7  ;;  %1031 = vrot.lane.b32.xlu2 %v1000_v31, %s2051_s28  ;;  %v324_v37 = vadd.f32 %v2108_v1, %v289_v21 }
  0x66   : > { %v720_v40 = vrot.slane %v718_v30, 3  ;;  %v355_v41 = vpack.c.bf16 %v323_v34, %v323_v34  ;;  %v290_v62 = vmul.f32 %v2097_v0, %v255_v55  ;;  %v291_v4 = vmul.f32 %v2097_v0, %v256_v45 }
  0x67   : > { %v947_v42 = vor.u32 %v946_v35, %v942_v22  ;;  %v581_v32 = vor.u32 %v579_v27, %v578_v28  ;;  %v356_v43 = vpack.c.bf16 %v324_v37, %v324_v37  ;;  %v1099_v15 = vrot.slane %v2336_v59, 1 }
  0x68   : > { %1144 = vrot.lane.b32.xlu1 %v1113_v12, %s2052_s29  ;;  %v798_v44 = vsel %vm2140_vm4, %v578_v28, %v720_v40  ;;  %v396_v39 = vunpack.c.l.b16 %v355_v41  ;;  %v325_v6 = vadd.f32 %v2108_v1, %v290_v62  ;;  %v326_v10 = vadd.f32 %v2108_v1, %v291_v4 }
  0x69   : > { %v952_v46 = vsel %vm808_vm3, %v947_v42, %v951_v36  ;;  %v2352_v47 = vsel %vm2140_vm4, %v440_v29, %v581_v32  ;;  %v1085_v49 = vrot.slane %v798_v44, 1  ;;  %v889_v50 = vshll.u32 %v798_v44, 16  ;;  %v257_v42 = vld [vmem:[%s2103_s25 + $0x90] sm:$0xff]  ;;  %v258_v32 = vld [vmem:[%s2103_s25 + $0x98] sm:$0xff] }
  0x6a   : > { %1023 = vrot.lane.b32.xlu0 %v952_v46, %s2051_s28  ;;  %v1084_v51 = vrot.slane %v2352_v47, 1  ;;  %v882_v52 = vshrl.u32 %v2352_v47, 16  ;;  %v884_v53 = vshll.u32 %v2352_v47, 16  ;;  %v508_v54 = vunpack.c.l.b16 %v356_v43 }
  0x6b   : > { %v891_v58 = vrot.slane %v889_v50, 1  ;;  %v412_v61 = vpack.c.b16 %v396_v39, %v396_v39  ;;  %v1100_v16 = vrot.slane %v2332_v14, 1  ;;  %v357_v19 = vpack.c.bf16 %v325_v6, %v325_v6  ;;  %v1998_v6 = vld [vmem:[%s3011_s3 + $0x10] sm:$0xf] }
  0x6c   : > { %v886_v57 = vrot.slane %v884_v53, 1  ;;  %v1086_v63 = vsel %vm1065_vm2, %v1084_v51, %v1085_v49  ;;  %v524_v2 = vpack.c.b16 %v508_v54, %v396_v39  ;;  %v684_v3 = vpack.c.b16 %v508_v54, %v508_v54 }
  0x6d   : > { %v443_v20 = vshrl.u32 %v412_v61, 16  ;;  %v358_v23 = vpack.c.bf16 %v326_v10, %v326_v10  ;;  %v397_v25 = vunpack.c.l.b16 %v357_v19  ;;  %v1101_v35 = vsel %vm1065_vm2, %v1099_v15, %v1100_v16 }
  0x6e   : > { %v887_v5 = vor.u32 %v886_v57, %v882_v52  ;;  %v583_v7 = vshrl.u32 %v524_v2, 16  ;;  %v586_v8 = vshll.u32 %v524_v2, 16  ;;  %v722_v9 = vshll.u32 %v684_v3, 16 }
  0x6f   : > { %v509_v30 = vunpack.c.l.b16 %v358_v23  ;;  %v292_v39 = vmul.f32 %v2097_v0, %v257_v42  ;;  %v293_v46 = vmul.f32 %v2097_v0, %v258_v32  ;;  %v413_v51 = vpack.c.b16 %v397_v25, %v397_v25  ;;  %v1956_v0 = vld [vmem:[%s3011_s3 + $0x8] sm:$0xf]  ;;  %v2041_v32 = vld [vmem:[%s3009_s1] ss:$0 sm:$0xff] }
  0x70   : > { %1126 = vrot.lane.b32.xlu1 %v1086_v63, %s2052_s29  ;;  %v892_v12 = vsel %vm808_vm3, %v887_v5, %v891_v58  ;;  %v585_v21 = vrot.slane %v583_v7, 7  ;;  %v724_v22 = vrot.slane %v722_v9, 3  ;;  %v2021_v63 = vld [vmem:[%s3011_s3 + $0x8] sm:$0x30]  ;;  %v2020_v5 = vld [vmem:[%s3011_s3] sm:$0x30] }
  0x71   : > { %1013 = vrot.lane.b32.xlu2 %v892_v12, %s2051_s28  ;;  %v525_v36 = vpack.c.b16 %v509_v30, %v397_v25  ;;  %v685_v44 = vpack.c.b16 %v509_v30, %v509_v30  ;;  %v327_v55 = vadd.f32 %v2108_v1, %v292_v39  ;;  %v328_v45 = vadd.f32 %v2108_v1, %v293_v46  ;;  %v1976_v1 = vld [vmem:[%s3011_s3] sm:$0xf]  ;;  %v2022_v12 = vld [vmem:[%s3011_s3 + $0x10] sm:$0x30] }
  0x72   : > { %v588_v27 = vor.u32 %v586_v8, %v585_v21  ;;  %v799_v29 = vsel %vm2140_vm4, %v585_v21, %v724_v22  ;;  %v446_v58 = vshrl.u32 %v413_v51, 16  ;;  %v1957_v4 = vor.u32 %v2021_v63, %v1956_v0 }
  0x73   : > { %v901_v31 = vshll.u32 %v799_v29, 16  ;;  %v1088_v34 = vrot.slane %v799_v29, 1  ;;  %v590_v43 = vshrl.u32 %v525_v36, 16  ;;  %v593_v52 = vshll.u32 %v525_v36, 16 }
  0x74   : > { %v2374_v14 = vsel %vm2140_vm4, %v443_v20, %v588_v27  ;;  %v726_v54 = vshll.u32 %v685_v44, 16  ;;  %v359_v2 = vpack.c.bf16 %v327_v55, %v327_v55  ;;  %v360_v7 = vpack.c.bf16 %v328_v45, %v328_v45 }
  0x75   : > { %v894_v28 = vshrl.u32 %v2374_v14, 16  ;;  %v896_v37 = vshll.u32 %v2374_v14, 16  ;;  %v903_v40 = vrot.slane %v901_v31, 1  ;;  %v1087_v41 = vrot.slane %v2374_v14, 1 }
  0x76   : > { %v592_v53 = vrot.slane %v590_v43, 7  ;;  %v728_v62 = vrot.slane %v726_v54, 3  ;;  %v1977_v10 = vor.u32 %v2020_v5, %v1976_v1  ;;  %v1257_v19 = vsel %vm1255_vm5, %v1957_v4, 0 }
  0x77   : > { %v898_v49 = vrot.slane %v896_v37, 1  ;;  %v1089_v50 = vsel %vm1065_vm2, %v1087_v41, %v1088_v34  ;;  %v1999_v20 = vor.u32 %v2022_v12, %v1998_v6  ;;  %1266 = vmatpush.bf16.msra.mxu0 %v1257_v19  ;;  %2023 = vmatpush.bf16.msra.mxu3 %v1257_v19  ;;  %v398_v22 = vunpack.c.l.b16 %v359_v2  ;;  %v260_v41 = vld [vmem:[%s2103_s25 + $0xa8] sm:$0xff] }
  0x78   : > { %1128 = vrot.lane.b32.xlu1 %v1089_v50, %s2052_s29  ;;  %v595_v61 = vor.u32 %v593_v52, %v592_v53  ;;  %v800_v9 = vsel %vm2140_vm4, %v592_v53, %v728_v62  ;;  %v1354_v21 = vsel %vm1255_vm5, %v1977_v10, 0  ;;  %v510_v23 = vunpack.c.l.b16 %v360_v7 }
  0x79   : > { %1136 = vrot.lane.b32.xlu2 %v1101_v35, %s2052_s29  ;;  %v899_v57 = vor.u32 %v898_v49, %v894_v28  ;;  %v1091_v16 = vrot.slane %v800_v9, 1  ;;  %1363 = vmatpush.bf16.msra.mxu1 %v1354_v21  ;;  %v2419_v25 = vsel %vm1255_vm5, %v1999_v20, 0  ;;  %v414_v30 = vpack.c.b16 %v398_v22, %v398_v22  ;;  %v2042_v49 = vld [vmem:[%s3010_s2] ss:$0 sm:$0xff] }
  0x7a   : > { %v2408_v8 = vsel %vm2140_vm4, %v446_v58, %v595_v61  ;;  %1463 = vmatpush.bf16.msra.mxu2 %v2419_v25  ;;  %v526_v27 = vpack.c.b16 %v510_v23, %v398_v22  ;;  %v686_v35 = vpack.c.b16 %v510_v23, %v510_v23  ;;  %v295_v44 = vmul.f32 %v2041_v32, %v260_v41 }
  0x7b   : > { %v904_v3 = vsel %vm808_vm3, %v899_v57, %v903_v40  ;;  %v1090_v15 = vrot.slane %v2408_v8, 1  ;;  %2024 = vmatpush.bf16.msrb.mxu3 %v1354_v21  ;;  %v449_v36 = vshrl.u32 %v414_v30, 16  ;;  %v259_v40 = vld [vmem:[%s2103_s25 + $0xa0] sm:$0xff]  ;;  %v908_v4 = vshll.u32 %v2408_v8, 16 }
  0x7c   : > { %1015 = vrot.lane.b32.xlu0 %v904_v3, %s2051_s28  ;;  %v597_v31 = vshrl.u32 %v526_v27, 16  ;;  %v600_v34 = vshll.u32 %v526_v27, 16  ;;  %v730_v37 = vshll.u32 %v686_v35, 16  ;;  %v294_v43 = vmul.f32 %v2041_v32, %v259_v40 }
  0x7d   : > { %v1092_v29 = vsel %vm1065_vm2, %v1090_v15, %v1091_v16  ;;  %v330_v51 = vadd.f32 %v2042_v49, %v295_v44  ;;  %v906_v5 = vshrl.u32 %v2408_v8, 16  ;;  %v910_v6 = vrot.slane %v908_v4, 1 }
  0x7e   : > { %v599_v28 = vrot.slane %v597_v31, 7  ;;  %v732_v39 = vrot.slane %v730_v37, 3  ;;  %v329_v50 = vadd.f32 %v2042_v49, %v294_v43  ;;  %v913_v7 = vshll.u32 %v800_v9, 16 }
  0x7f   : > { %v362_v57 = vpack.c.bf16 %v330_v51, %v330_v51  ;;  %v911_v19 = vor.u32 %v910_v6, %v906_v5 }
  0x80   : > { %v602_v42 = vor.u32 %v600_v34, %v599_v28  ;;  %v2438_v52 = vsel %vm2140_vm4, %v599_v28, %v732_v39  ;;  %v361_v45 = vpack.c.bf16 %v329_v50, %v329_v50  ;;  %v915_v20 = vrot.slane %v913_v7, 1 }
  0x81   : > { %v925_v55 = vshll.u32 %v2438_v52, 16  ;;  %v511_v0 = vunpack.c.l.b16 %v362_v57 }
  0x82   : > { %v2431_v46 = vsel %vm2140_vm4, %v449_v36, %v602_v42  ;;  %v399_v62 = vunpack.c.l.b16 %v361_v45  ;;  %v916_v27 = vsel %vm808_vm3, %v911_v19, %v915_v20 }
  0x83   : > { %v918_v53 = vshrl.u32 %v2431_v46, 16  ;;  %v920_v54 = vshll.u32 %v2431_v46, 16  ;;  %v927_v61 = vrot.slane %v925_v55, 1  ;;  %v687_v16 = vpack.c.b16 %v511_v0, %v511_v0  ;;  %1017 = vrot.lane.b32.xlu2 %v916_v27, %s2051_s28 }
  0x84   : > { %1130 = vrot.lane.b32.xlu0 %v1092_v29, %s2052_s29  ;;  %v527_v2 = vpack.c.b16 %v511_v0, %v399_v62  ;;  %v415_v10 = vpack.c.b16 %v399_v62, %v399_v62  ;;  %v1093_v45 = vrot.slane %v2431_v46, 1 }
  0x85   : > { %v922_v58 = vrot.slane %v920_v54, 1  ;;  %v734_v23 = vshll.u32 %v687_v16, 16 }
  0x86   : > { %v604_v1 = vshrl.u32 %v527_v2, 16  ;;  %v607_v15 = vshll.u32 %v527_v2, 16  ;;  %v452_v21 = vshrl.u32 %v415_v10, 16  ;;  %v1006_v31 = vpop.permute.xlu2 %1005 }
  0x87   : > { %v923_v63 = vor.u32 %v922_v58, %v918_v53  ;;  %v736_v29 = vrot.slane %v734_v23, 3 }
  0x88   : > { %v606_v12 = vrot.slane %v604_v1, 7 }
  0x89   : > { %v928_v3 = vsel %vm808_vm3, %v923_v63, %v927_v61 }
  0x8a   : > { %1019 = vrot.lane.b32.xlu1 %v928_v3, %s2051_s28  ;;  %v609_v22 = vor.u32 %v607_v15, %v606_v12  ;;  %v802_v35 = vsel %vm2140_vm4, %v606_v12, %v736_v29 }
  0x8b   : > { %v937_v40 = vshll.u32 %v802_v35, 16  ;;  %v1097_v43 = vrot.slane %v802_v35, 1 }
  0x8c   : > { %v2451_v30 = vsel %vm2140_vm4, %v452_v21, %v609_v22 }
  0x8d   : > { %v932_v9 = vshll.u32 %v2451_v30, 16  ;;  %v930_v28 = vshrl.u32 %v2451_v30, 16  ;;  %v939_v42 = vrot.slane %v937_v40, 1  ;;  %v1096_v32 = vrot.slane %v2451_v30, 1 }
  0x8f   : > { %v934_v37 = vrot.slane %v932_v9, 1  ;;  %v1098_v39 = vsel %vm1065_vm2, %v1096_v32, %v1097_v43 }
  0x91   : > { %v935_v41 = vor.u32 %v934_v37, %v930_v28 }
  0x92   : > { %1134 = vrot.lane.b32.xlu1 %v1098_v39, %s2052_s29  ;;  %v1026_v54 = vpop.permute.xlu2 %1025 }
  0x93   : > { %v940_v44 = vsel %vm808_vm3, %v935_v41, %v939_v42 }
  0x94   : > { %1021 = vrot.lane.b32.xlu0 %v940_v44, %s2051_s28 }
  0x9a   : > { %v1002_v34 = vpop.permute.xlu0 %1001 }
  0x9b   : > { %v1004_v36 = vpop.permute.xlu1 %1003  ;;  %v1148_v60 = vsel %vm1146_vm6, %v2150_v11, %v1002_v34  ;;  %v1094_v11 = vrot.slane %v2438_v52, 1  ;;  %v1152_v52 = vsel %vm1146_vm6, %v2164_v26, %v1006_v31 }
  0x9c   : > { %v1150_v50 = vsel %vm1146_vm6, %v2156_v18, %v1004_v36  ;;  %v1172_v18 = vsel %vm1146_vm6, %v2199_v17, %v1026_v54 }
  0x9d   : > { %v1095_v57 = vsel %vm1065_vm2, %v1093_v45, %v1094_v11 }
  0x9e   : > { %1132 = vrot.lane.b32.xlu2 %v1095_v57, %s2052_s29 }
  0xa0   : > { %v1008_v0 = vpop.permute.xlu2 %1007 }
  0xa1   : > { %v1154_v1 = vsel %vm1146_vm6, %v2234_v13, %v1008_v0 }
  0xa2   : > { %v1115_v49 = vpop.permute.xlu0 %1114 }
  0xa3   : > { %v1181_v51 = vsel %vm1179_vm7, %v1148_v60, %v1115_v49  ;;  %v1117_v53 = vpop.permute.xlu1 %1116 }
  0xa4   : > { %v1183_v55 = vsel %vm1179_vm7, %v1150_v50, %v1117_v53  ;;  %1978 = vmatmul.msk.bf16.vlgmr.msra.gmra.mxu1 %vm1222_vm8, %v1181_v51  ;;  %2000 = vmatmul.msk.bf16.vlgmr.msra.gmra.mxu2 %vm1222_vm8, %v1181_v51 }
  0xa5   : > { %1958 = vmatmul.msk.bf16.vlgmr.msra.gmra.mxu0 %vm1222_vm8, %v1183_v55 }
  0xa8   : > { %v1141_v3 = vpop.permute.xlu2 %1140 }
  0xaa   : > { %v1119_v61 = vpop.permute.xlu0 %1118 }
  0xab   : > { %v1139_v58 = vpop.permute.xlu1 %1138  ;;  %v1185_v63 = vsel %vm1179_vm7, %v1152_v52, %v1119_v61 }
  0xac   : > { %v2478_v62 = vsel %vm1179_vm7, %v1172_v18, %v1139_v58 }
  0xad   : > { %1970 = vmatmul.msk.bf16.vlgmr.msra.gmra.mxu3 %vm1222_vm8, %v2478_v62 }
  0xae   : > { %2025 = vmatpush.bf16.msra.mxu3 %v2419_v25 }
  0xb0   : > { %v1123_v12 = vpop.permute.xlu2 %1122 }
  0xb3   : > { %v1121_v25 = vpop.permute.xlu1 %1120 }
  0xb4   : > { %1979 = vmatmul.msk.bf16.gmra.mxu1 %vm1222_vm8, %v1183_v55  ;;  %2001 = vmatmul.msk.bf16.gmra.mxu2 %vm1222_vm8, %v1185_v63  ;;  %v1028_v17 = vpop.permute.xlu0 %1027  ;;  %v1187_v5 = vsel %vm1179_vm7, %v1154_v1, %v1121_v25 }
  0xb5   : > { %1959 = vmatmul.msk.bf16.gmra.mxu0 %vm1222_vm8, %v1181_v51  ;;  %v1174_v2 = vsel %vm1146_vm6, %v2224_v56, %v1028_v17 }
  0xb6   : > { %v2492_v4 = vsel %vm1179_vm7, %v1174_v2, %v1141_v3 }
  0xbd   : > { %1971 = vmatmul.msk.bf16.gmra.mxu3 %vm1222_vm8, %v2492_v4  ;;  %v1010_v26 = vpop.permute.xlu0 %1009 }
  0xbe   : > { %v1156_v13 = vsel %vm1146_vm6, %v2251_v48, %v1010_v26 }
  0xbf   : > { %v1189_v16 = vsel %vm1179_vm7, %v1156_v13, %v1123_v12  ;;  %v1032_v19 = vpop.permute.xlu2 %1031 }
  0xc4   : > { %1980 = vmatmul.msk.bf16.gmra.mxu1 %vm1222_vm8, %v1181_v51  ;;  %2002 = vmatmul.msk.bf16.gmra.mxu2 %vm1222_vm8, %v1187_v5  ;;  %v1030_v56 = vpop.permute.xlu1 %1029 }
  0xc5   : > { %1960 = vmatmul.msk.bf16.gmra.mxu0 %vm1222_vm8, %v1185_v63  ;;  %v1176_v6 = vsel %vm1146_vm6, %v2277_v24, %v1030_v56  ;;  %v1143_v7 = vpop.permute.xlu0 %1142  ;;  %v1178_v24 = vsel %vm1146_vm6, %v2315_v38, %v1032_v19 }
  0xc6   : > { %v2505_v10 = vsel %vm1179_vm7, %v1176_v6, %v1143_v7 }
  0xcb   : > { %v1014_v48 = vpop.permute.xlu2 %1013 }
  0xcd   : > { %1972 = vmatmul.msk.bf16.gmra.mxu3 %vm1222_vm8, %v2505_v10 }
  0xcf   : > { %v1125_v21 = vpop.permute.xlu0 %1124 }
  0xd2   : > { %v1012_v15 = vpop.permute.xlu1 %1011 }
  0xd3   : > { %v1158_v23 = vsel %vm1146_vm6, %v2309_v33, %v1012_v15  ;;  %v1137_v31 = vpop.permute.xlu2 %1136  ;;  %v1160_v33 = vsel %vm1146_vm6, %v2352_v47, %v1014_v48 }
  0xd4   : > { %1981 = vmatmul.msk.bf16.gmra.mxu1 %vm1222_vm8, %v1185_v63  ;;  %2003 = vmatmul.msk.bf16.gmra.mxu2 %vm1222_vm8, %v1189_v16  ;;  %v1191_v27 = vsel %vm1179_vm7, %v1158_v23, %v1125_v21 }
  0xd5   : > { %1961 = vmatmul.msk.bf16.gmra.mxu0 %vm1222_vm8, %v1187_v5 }
  0xda   : > { %v1145_v20 = vpop.permute.xlu1 %1144 }
  0xdb   : > { %v2518_v22 = vsel %vm1179_vm7, %v1178_v24, %v1145_v20 }
  0xdc   : > { %v1024_v29 = vpop.permute.xlu0 %1023 }
  0xdd   : > { %1973 = vmatmul.msk.bf16.gmra.mxu3 %vm1222_vm8, %v2518_v22  ;;  %v1170_v38 = vsel %vm1146_vm6, %v2336_v59, %v1024_v29  ;;  %v1018_v47 = vpop.permute.xlu2 %1017 }
  0xde   : > { %v2531_v9 = vsel %vm1179_vm7, %v1170_v38, %v1137_v31  ;;  %v1164_v40 = vsel %vm1146_vm6, %v2408_v8, %v1018_v47 }
  0xe2   : > { %v1127_v34 = vpop.permute.xlu1 %1126 }
  0xe3   : > { %v1193_v35 = vsel %vm1179_vm7, %v1160_v33, %v1127_v34 }
  0xe4   : > { %1982 = vmatmul.msk.bf16.gmra.mxu1 %vm1222_vm8, %v1187_v5  ;;  %2004 = vmatmul.msk.bf16.gmra.mxu2 %vm1222_vm8, %v1191_v27 }
  0xe5   : > { %1962 = vmatmul.msk.bf16.gmra.mxu0 %vm1222_vm8, %v1189_v16 }
  0xea   : > { %v1129_v28 = vpop.permute.xlu1 %1128 }
  0xed   : > { %1990 = vmatmul.msk.bf16.vlgmr.msrb.gmra.mxu3 %vm1222_vm8, %v2531_v9 }
  0xee   : > { %v1016_v59 = vpop.permute.xlu0 %1015 }
  0xef   : > { %v1162_v36 = vsel %vm1146_vm6, %v2374_v14, %v1016_v59 }
  0xf0   : > { %v1195_v37 = vsel %vm1179_vm7, %v1162_v36, %v1129_v28 }
  0xf4   : > { %1983 = vmatmul.msk.bf16.gmra.mxu1 %vm1222_vm8, %v1189_v16  ;;  %2005 = vmatmul.msk.bf16.gmra.mxu2 %vm1222_vm8, %v1193_v35 }
  0xf5   : > { %1963 = vmatmul.msk.bf16.gmra.mxu0 %vm1222_vm8, %v1191_v27 }
  0xf6   : > { %v1131_v41 = vpop.permute.xlu0 %1130 }
  0xf7   : > { %v1197_v14 = vsel %vm1179_vm7, %v1164_v40, %v1131_v41 }
  0xf8   : > { %v1133_v43 = vpop.permute.xlu2 %1132 }
  0xfc   : > { %v1020_v42 = vpop.permute.xlu1 %1019 }
  0xfd   : > { %1991 = vmatmul.msk.bf16.gmra.mxu3 %vm1222_vm8, %v2478_v62  ;;  %v1166_v32 = vsel %vm1146_vm6, %v2431_v46, %v1020_v42 }
  0xfe   : > { %v1199_v8 = vsel %vm1179_vm7, %v1166_v32, %v1133_v43 }
 0x104   : > { %1984 = vmatmul.msk.bf16.gmra.mxu1 %vm1222_vm8, %v1191_v27  ;;  %2006 = vmatmul.msk.bf16.gmra.mxu2 %vm1222_vm8, %v1195_v37  ;;  %v1135_v11 = vpop.permute.xlu1 %1134 }
 0x105   : > { %1964 = vmatmul.msk.bf16.gmra.mxu0 %vm1222_vm8, %v1193_v35 }
 0x106   : > { %v1022_v54 = vpop.permute.xlu0 %1021 }
 0x107   : > { %v1168_v45 = vsel %vm1146_vm6, %v2451_v30, %v1022_v54 }
 0x108   : > { %v1201_v0 = vsel %vm1179_vm7, %v1168_v45, %v1135_v11 }
 0x10d   : > { %1992 = vmatmul.msk.bf16.gmra.mxu3 %vm1222_vm8, %v2492_v4 }
 0x114   : > { %1985 = vmatmul.msk.bf16.gmra.mxu1 %vm1222_vm8, %v1193_v35  ;;  %2007 = vmatmul.msk.bf16.gmra.mxu2 %vm1222_vm8, %v1197_v14 }
 0x115   : > { %1965 = vmatmul.msk.bf16.gmra.mxu0 %vm1222_vm8, %v1195_v37 }
 0x11d   : > { %1993 = vmatmul.msk.bf16.gmra.mxu3 %vm1222_vm8, %v2505_v10 }
 0x121   : > { %v1365_v44 = vpop.f32.mrf.mxu1 }
 0x122   : > { %v1268_v39 = vpop.f32.mrf.mxu0 }
 0x123   : > { %v1366_v60 = vadd.f32 %v1365_v44, %v1268_v39 }
 0x124   : > { %1986 = vmatmul.msk.bf16.gmra.mxu1 %vm1222_vm8, %v1195_v37  ;;  %2008 = vmatmul.msk.bf16.gmra.mxu2 %vm1222_vm8, %v1199_v8 }
 0x125   : > { %1966 = vmatmul.msk.bf16.gmra.mxu0 %vm1222_vm8, %v1197_v14 }
 0x127   : > { %v1465_v49 = vpop.f32.mrf.mxu2 }
 0x128   : > { %v2566_v50 = vadd.f32 %v1465_v49, %v1366_v60 }
 0x129   : > { %v1367_v46 = vpop.f32.mrf.mxu1 }
 0x12a   : > { %v1791_v51 = vpack.c.bf16 %v2566_v50, %v2566_v50  ;;  %v1270_v53 = vpop.f32.mrf.mxu0 }
 0x12b   : > { %v1368_v55 = vadd.f32 %v1367_v46, %v1270_v53 }
 0x12c   : > { %1824 = vst.msk [vmem:[%s2571_s26] sm:$0xf] %vm1823_vm9, %v1791_v51 }
 0x12d   : > { %2012 = vmatmul.msk.bf16.vlgmr.msra.gmra.mxu3 %vm1222_vm8, %v2492_v4 }
 0x12f   : > { %v1467_v57 = vpop.f32.mrf.mxu2 }
 0x130   : > { %v2581_v18 = vpop.f32.mrf.mxu3  ;;  %v2583_v58 = vadd.f32 %v1467_v57, %v1368_v55 }
 0x131   : > { %v1370_v61 = vpop.f32.mrf.mxu1 }
 0x132   : > { %v1792_v52 = vpack.c.bf16 %v2583_v58, %v2583_v58  ;;  %v1273_v63 = vpop.f32.mrf.mxu0 }
 0x133   : > { %v1371_v30 = vadd.f32 %v1370_v61, %v1273_v63 }
 0x134   : > { %1825 = vst.msk [vmem:[%s2571_s26 + $0x4] sm:$0xf] %vm1823_vm9, %v1792_v52  ;;  %1987 = vmatmul.msk.bf16.gmra.mxu1 %vm1222_vm8, %v1197_v14  ;;  %2009 = vmatmul.msk.bf16.gmra.mxu2 %vm1222_vm8, %v1201_v0 }
 0x135   : > { %1967 = vmatmul.msk.bf16.gmra.mxu0 %vm1222_vm8, %v1199_v8 }
 0x137   : > { %v1470_v17 = vpop.f32.mrf.mxu2 }
 0x138   : > { %v2593_v2 = vpop.f32.mrf.mxu3  ;;  %v2595_v3 = vadd.f32 %v1470_v17, %v1371_v30 }
 0x139   : > { %v1372_v4 = vpop.f32.mrf.mxu1 }
 0x13a   : > { %v1793_v25 = vpack.c.bf16 %v2595_v3, %v2595_v3  ;;  %v1275_v26 = vpop.f32.mrf.mxu0 }
 0x13b   : > { %v1373_v1 = vadd.f32 %v1372_v4, %v1275_v26 }
 0x13c   : > { %1826 = vst.msk [vmem:[%s2571_s26 + $0x8] sm:$0xf] %vm1823_vm9, %v1793_v25 }
 0x13d   : > { %2013 = vmatmul.msk.bf16.gmra.mxu3 %vm1222_vm8, %v2505_v10 }
 0x13f   : > { %v1472_v5 = vpop.f32.mrf.mxu2 }
 0x140   : > { %v2603_v56 = vpop.f32.mrf.mxu3  ;;  %v2605_v6 = vadd.f32 %v1472_v5, %v1373_v1 }
 0x141   : > { %v1375_v7 = vpop.f32.mrf.mxu1 }
 0x142   : > { %v1794_v12 = vpack.c.bf16 %v2605_v6, %v2605_v6  ;;  %v1278_v13 = vpop.f32.mrf.mxu0 }
 0x143   : > { %v1376_v15 = vadd.f32 %v1375_v7, %v1278_v13 }
 0x144   : > { %1827 = vst.msk [vmem:[%s2571_s26 + $0xc] sm:$0xf] %vm1823_vm9, %v1794_v12  ;;  %1988 = vmatmul.msk.bf16.gmra.mxu1 %vm1222_vm8, %v1199_v8  ;;  %2010 = vmatmul.msk.bf16.gmra.mxu2 %vm1222_vm8, %v2531_v9 }
 0x145   : > { %1968 = vmatmul.msk.bf16.gmra.mxu0 %vm1222_vm8, %v1201_v0 }
 0x147   : > { %v1475_v16 = vpop.f32.mrf.mxu2 }
 0x148   : > { %v2615_v19 = vpop.f32.mrf.mxu3  ;;  %v2617_v24 = vadd.f32 %v1475_v16, %v1376_v15 }
 0x149   : > { %v1377_v20 = vpop.f32.mrf.mxu1 }
 0x14a   : > { %v1795_v21 = vpack.c.bf16 %v2617_v24, %v2617_v24  ;;  %v1280_v48 = vpop.f32.mrf.mxu0 }
 0x14b   : > { %v1378_v23 = vadd.f32 %v1377_v20, %v1280_v48 }
 0x14c   : > { %1828 = vst.msk [vmem:[%s2571_s26 + $0x10] sm:$0xf] %vm1823_vm9, %v1795_v21 }
 0x14d   : > { %2014 = vmatmul.msk.bf16.gmra.mxu3 %vm1222_vm8, %v2518_v22 }
 0x14f   : > { %v1477_v27 = vpop.f32.mrf.mxu2 }
 0x150   : > { %v2625_v29 = vpop.f32.mrf.mxu3  ;;  %v2627_v38 = vadd.f32 %v1477_v27, %v1378_v23 }
 0x151   : > { %v1380_v31 = vpop.f32.mrf.mxu1 }
 0x152   : > { %v1796_v33 = vpack.c.bf16 %v2627_v38, %v2627_v38  ;;  %v1283_v34 = vpop.f32.mrf.mxu0 }
 0x153   : > { %v1381_v22 = vadd.f32 %v1380_v31, %v1283_v34 }
 0x154   : > { %1829 = vst.msk [vmem:[%s2571_s26 + $0x14] sm:$0xf] %vm1823_vm9, %v1796_v33  ;;  %1989 = vmatmul.msk.bf16.gmra.mxu1 %vm1222_vm8, %v1201_v0  ;;  %2011 = vmatmul.msk.bf16.gmra.mxu2 %vm1222_vm8, %v2478_v62 }
 0x155   : > { %1969 = vmatmul.msk.bf16.gmra.mxu0 %vm1222_vm8, %v2531_v9 }
 0x157   : > { %v1480_v35 = vpop.f32.mrf.mxu2 }
 0x158   : > { %v2638_v59 = vpop.f32.mrf.mxu3  ;;  %v2640_v36 = vadd.f32 %v1480_v35, %v1381_v22 }
 0x159   : > { %v1382_v28 = vpop.f32.mrf.mxu1 }
 0x15a   : > { %v1797_v37 = vpack.c.bf16 %v2640_v36, %v2640_v36  ;;  %v1285_v47 = vpop.f32.mrf.mxu0 }
 0x15b   : > { %v1383_v62 = vadd.f32 %v1382_v28, %v1285_v47 }
 0x15c   : > { %1830 = vst.msk [vmem:[%s2571_s26 + $0x18] sm:$0xf] %vm1823_vm9, %v1797_v37 }
 0x15d   : > { %2015 = vmatmul.msk.bf16.gmra.mxu3 %vm1222_vm8, %v2505_v10 }
 0x15f   : > { %v1482_v9 = vpop.f32.mrf.mxu2 }
 0x160   : > { %v2648_v40 = vpop.f32.mrf.mxu3  ;;  %v2650_v41 = vadd.f32 %v1482_v9, %v1383_v62 }
 0x161   : > { %v1385_v14 = vpop.f32.mrf.mxu1 }
 0x162   : > { %v1798_v42 = vpack.c.bf16 %v2650_v41, %v2650_v41  ;;  %v1288_v32 = vpop.f32.mrf.mxu0 }
 0x163   : > { %v1386_v43 = vadd.f32 %v1385_v14, %v1288_v32 }
 0x164   : > { %1831 = vst.msk [vmem:[%s2571_s26 + $0x1c] sm:$0xf] %vm1823_vm9, %v1798_v42 }
 0x167   : > { %v1485_v44 = vpop.f32.mrf.mxu2 }
 0x168   : > { %v2656_v8 = vpop.f32.mrf.mxu3  ;;  %v2658_v10 = vadd.f32 %v1485_v44, %v1386_v43 }
 0x169   : > { %v1387_v39 = vpop.f32.mrf.mxu1 }
 0x16a   : > { %v1799_v60 = vpack.c.bf16 %v2658_v10, %v2658_v10  ;;  %v1290_v49 = vpop.f32.mrf.mxu0 }
 0x16b   : > { %v1388_v46 = vadd.f32 %v1387_v39, %v1290_v49 }
 0x16c   : > { %1832 = vst.msk [vmem:[%s2571_s26 + $0x20] sm:$0xf] %vm1823_vm9, %v1799_v60 }
 0x16f   : > { %v1487_v51 = vpop.f32.mrf.mxu2 }
 0x170   : > { %v2664_v53 = vpop.f32.mrf.mxu3  ;;  %v2666_v54 = vadd.f32 %v1487_v51, %v1388_v46 }
 0x171   : > { %v1390_v55 = vpop.f32.mrf.mxu1 }
 0x172   : > { %v1800_v45 = vpack.c.bf16 %v2666_v54, %v2666_v54  ;;  %v1293_v11 = vpop.f32.mrf.mxu0 }
 0x173   : > { %v1391_v57 = vadd.f32 %v1390_v55, %v1293_v11 }
 0x174   : > { %1833 = vst.msk [vmem:[%s2571_s26 + $0x24] sm:$0xf] %vm1823_vm9, %v1800_v45 }
 0x177   : > { %v1490_v61 = vpop.f32.mrf.mxu2 }
 0x178   : > { %v2672_v0 = vpop.f32.mrf.mxu3  ;;  %v2674_v52 = vadd.f32 %v1490_v61, %v1391_v57 }
 0x179   : > { %v1392_v63 = vpop.f32.mrf.mxu1 }
 0x17a   : > { %v1801_v30 = vpack.c.bf16 %v2674_v52, %v2674_v52  ;;  %v1295_v17 = vpop.f32.mrf.mxu0 }
 0x17b   : > { %v1393_v4 = vadd.f32 %v1392_v63, %v1295_v17 }
 0x17c   : > { %1834 = vst.msk [vmem:[%s2571_s26 + $0x28] sm:$0xf] %vm1823_vm9, %v1801_v30 }
 0x17f   : > { %v1492_v25 = vpop.f32.mrf.mxu2 }
 0x180   : > { %v2680_v26 = vpop.f32.mrf.mxu3  ;;  %v2682_v1 = vadd.f32 %v1492_v25, %v1393_v4  ;;  %v1426_v4 = vadd.f32 %v2664_v53, %v2581_v18  ;;  %v1577_v18 = vsel %vm1146_vm6, %v2566_v50, 0.0  ;;  %v1580_v53 = vsel %vm1146_vm6, %v2595_v3, 0.0 }
 0x181   : > { %v1395_v5 = vpop.f32.mrf.mxu1 }
 0x182   : > { %v1802_v7 = vpack.c.bf16 %v2682_v1, %v2682_v1  ;;  %v1298_v12 = vpop.f32.mrf.mxu0 }
 0x183   : > { %v1396_v13 = vadd.f32 %v1395_v5, %v1298_v12 }
 0x184   : > { %1835 = vst.msk [vmem:[%s2571_s26 + $0x2c] sm:$0xf] %vm1823_vm9, %v1802_v7 }
 0x187   : > { %v1495_v15 = vpop.f32.mrf.mxu2 }
 0x188   : > { %v2688_v16 = vpop.f32.mrf.mxu3  ;;  %v2690_v20 = vadd.f32 %v1495_v15, %v1396_v13 }
 0x189   : > { %v1397_v21 = vpop.f32.mrf.mxu1 }
 0x18a   : > { %v1803_v48 = vpack.c.bf16 %v2690_v20, %v2690_v20  ;;  %v1300_v23 = vpop.f32.mrf.mxu0 }
 0x18b   : > { %v1398_v27 = vadd.f32 %v1397_v21, %v1300_v23  ;;  %v1578_v23 = vsel %vm1146_vm6, %v2583_v58, 0.0 }
 0x18c   : > { %1836 = vst.msk [vmem:[%s2571_s26 + $0x30] sm:$0xf] %vm1823_vm9, %v1803_v48 }
 0x18f   : > { %v1497_v31 = vpop.f32.mrf.mxu2 }
 0x190   : > { %v2696_v33 = vpop.f32.mrf.mxu3  ;;  %v2698_v34 = vadd.f32 %v1497_v31, %v1398_v27  ;;  %v1579_v31 = vadd.f32 %v1578_v23, %v1577_v18  ;;  %v1594_v18 = vsel %vm1146_vm6, %v2666_v54, 0.0 }
 0x191   : > { %v1400_v22 = vpop.f32.mrf.mxu1 }
 0x192   : > { %v1804_v35 = vpack.c.bf16 %v2698_v34, %v2698_v34  ;;  %v1303_v28 = vpop.f32.mrf.mxu0 }
 0x193   : > { %v1401_v37 = vadd.f32 %v1400_v22, %v1303_v28  ;;  %v1428_v22 = vadd.f32 %v2672_v0, %v2593_v2  ;;  %v1582_v28 = vsel %vm1146_vm6, %v2605_v6, 0.0 }
 0x194   : > { %1837 = vst.msk [vmem:[%s2571_s26 + $0x34] sm:$0xf] %vm1823_vm9, %v1804_v35 }
 0x197   : > { %v1500_v47 = vpop.f32.mrf.mxu2 }
 0x198   : > { %v2704_v62 = vpop.f32.mrf.mxu3  ;;  %v2706_v9 = vadd.f32 %v1500_v47, %v1401_v37 }
 0x199   : > { %v1402_v14 = vpop.f32.mrf.mxu1 }
 0x19a   : > { %v1805_v42 = vpack.c.bf16 %v2706_v9, %v2706_v9  ;;  %v1305_v32 = vpop.f32.mrf.mxu0 }
 0x19b   : > { %v1403_v43 = vadd.f32 %v1402_v14, %v1305_v32  ;;  %v1581_v14 = vadd.f32 %v1580_v53, %v1579_v31 }
 0x19c   : > { %1838 = vst.msk [vmem:[%s2571_s26 + $0x38] sm:$0xf] %vm1823_vm9, %v1805_v42 }
 0x19d   : > { %v1583_v2 = vadd.f32 %v1582_v28, %v1581_v14 }
 0x19f   : > { %v1502_v44 = vpop.f32.mrf.mxu2 }
 0x1a0   : > { %v2712_v39 = vpop.f32.mrf.mxu3  ;;  %v2714_v60 = vadd.f32 %v1502_v44, %v1403_v43  ;;  %v1584_v43 = vsel %vm1146_vm6, %v2617_v24, 0.0 }
 0x1a1   : > { %v1405_v49 = vpop.f32.mrf.mxu1 }
 0x1a2   : > { %v1806_v46 = vpack.c.bf16 %v2714_v60, %v2714_v60  ;;  %v1308_v51 = vpop.f32.mrf.mxu0 }
 0x1a3   : > { %v1406_v55 = vadd.f32 %v1405_v49, %v1308_v51  ;;  %v1585_v51 = vadd.f32 %v1584_v43, %v1583_v2  ;;  %v1600_v2 = vsel %vm1146_vm6, %v2690_v20, 0.0 }
 0x1a4   : > { %1839 = vst.msk [vmem:[%s2571_s26 + $0x3c] sm:$0xf] %vm1823_vm9, %v1806_v46  ;;  %v1586_v46 = vsel %vm1146_vm6, %v2627_v38, 0.0 }
 0x1a7   : > { %v1505_v45 = vpop.f32.mrf.mxu2 }
 0x1a8   : > { %v2720_v11 = vpop.f32.mrf.mxu3  ;;  %v2722_v57 = vadd.f32 %v1505_v45, %v1406_v55  ;;  %v1588_v55 = vsel %vm1146_vm6, %v2640_v36, 0.0 }
 0x1a9   : > { %v1407_v61 = vpop.f32.mrf.mxu1 }
 0x1aa   : > { %v1807_v63 = vpack.c.bf16 %v2722_v57, %v2722_v57  ;;  %v1310_v30 = vpop.f32.mrf.mxu0 }
 0x1ab   : > { %v1408_v17 = vadd.f32 %v1407_v61, %v1310_v30  ;;  %v1587_v61 = vadd.f32 %v1586_v46, %v1585_v51  ;;  %v1602_v51 = vsel %vm1146_vm6, %v2698_v34, 0.0 }
 0x1ac   : > { %1840 = vst.msk [vmem:[%s2571_s26 + $0x40] sm:$0xf] %vm1823_vm9, %v1807_v63  ;;  %v1431_v63 = vadd.f32 %v2680_v26, %v2603_v56 }
 0x1af   : > { %v1507_v25 = vpop.f32.mrf.mxu2 }
 0x1b0   : > { %v2730_v5 = vadd.f32 %v1507_v25, %v1408_v17  ;;  %v1525_v7 = vpop.f32.mrf.mxu3  ;;  %v1590_v17 = vsel %vm1146_vm6, %v2650_v41, 0.0 }
 0x1b1   : > { %v2732_v12 = vadd.f32 %v1525_v7, %v1426_v4  ;;  %v1410_v13 = vpop.f32.mrf.mxu1  ;;  %v1589_v7 = vadd.f32 %v1588_v55, %v1587_v61 }
 0x1b2   : > { %v1808_v15 = vpack.c.bf16 %v2730_v5, %v2730_v5  ;;  %v1313_v21 = vpop.f32.mrf.mxu0 }
 0x1b3   : > { %v1815_v48 = vpack.c.bf16 %v2732_v12, %v2732_v12  ;;  %v1411_v27 = vadd.f32 %v1410_v13, %v1313_v21  ;;  %v1592_v21 = vsel %vm1146_vm6, %v2658_v10, 0.0  ;;  %v1591_v56 = vadd.f32 %v1590_v17, %v1589_v7 }
 0x1b4   : > { %1841 = vst.msk [vmem:[%s2571_s26 + $0x44] sm:$0xf] %vm1823_vm9, %v1808_v15 }
 0x1b5   : > { %1848 = vst.msk [vmem:[%s2571_s26 + $0x60] sm:$0xf] %vm1823_vm9, %v1815_v48  ;;  %v1593_v53 = vadd.f32 %v1592_v21, %v1591_v56  ;;  %v1608_v56 = vsel %vm1146_vm6, %v2722_v57, 0.0 }
 0x1b7   : > { %v1510_v35 = vpop.f32.mrf.mxu2 }
 0x1b8   : > { %v2752_v37 = vadd.f32 %v1510_v35, %v1411_v27  ;;  %v1527_v47 = vpop.f32.mrf.mxu3  ;;  %v1596_v27 = vsel %vm1146_vm6, %v2674_v52, 0.0  ;;  %v1433_v35 = vadd.f32 %v2688_v16, %v2615_v19 }
 0x1b9   : > { %v2754_v42 = vadd.f32 %v1527_v47, %v1428_v22  ;;  %v1412_v32 = vpop.f32.mrf.mxu1  ;;  %v1595_v22 = vadd.f32 %v1594_v18, %v1593_v53  ;;  %v1598_v47 = vsel %vm1146_vm6, %v2682_v1, 0.0  ;;  %v1610_v53 = vsel %vm1146_vm6, %v2730_v5, 0.0 }
 0x1ba   : > { %v1809_v44 = vpack.c.bf16 %v2752_v37, %v2752_v37  ;;  %v1315_v49 = vpop.f32.mrf.mxu0 }
 0x1bb   : > { %v1816_v0 = vpack.c.bf16 %v2754_v42, %v2754_v42  ;;  %v1413_v45 = vadd.f32 %v1412_v32, %v1315_v49  ;;  %v1597_v43 = vadd.f32 %v1596_v27, %v1595_v22 }
 0x1bc   : > { %1842 = vst.msk [vmem:[%s2571_s26 + $0x48] sm:$0xf] %vm1823_vm9, %v1809_v44 }
 0x1bd   : > { %1849 = vst.msk [vmem:[%s2571_s26 + $0x64] sm:$0xf] %vm1823_vm9, %v1816_v0  ;;  %v1599_v19 = vadd.f32 %v1598_v47, %v1597_v43 }
 0x1bf   : > { %v1512_v30 = vpop.f32.mrf.mxu2  ;;  %v1601_v55 = vadd.f32 %v1600_v2, %v1599_v19 }
 0x1c0   : > { %v2774_v4 = vadd.f32 %v1512_v30, %v1413_v45  ;;  %v1530_v25 = vpop.f32.mrf.mxu3  ;;  %v1604_v45 = vsel %vm1146_vm6, %v2706_v9, 0.0 }
 0x1c1   : > { %v2776_v13 = vadd.f32 %v1530_v25, %v1431_v63  ;;  %v1415_v15 = vpop.f32.mrf.mxu1  ;;  %v1436_v63 = vadd.f32 %v2696_v33, %v2625_v29  ;;  %v1603_v30 = vadd.f32 %v1602_v51, %v1601_v55  ;;  %v1606_v25 = vsel %vm1146_vm6, %v2714_v60, 0.0 }
 0x1c2   : > { %v1810_v48 = vpack.c.bf16 %v2774_v4, %v2774_v4  ;;  %v1318_v23 = vpop.f32.mrf.mxu0 }
 0x1c3   : > { %v1817_v26 = vpack.c.bf16 %v2776_v13, %v2776_v13  ;;  %v1416_v31 = vadd.f32 %v1415_v15, %v1318_v23  ;;  %v1605_v21 = vadd.f32 %v1604_v45, %v1603_v30  ;;  %v1441_v30 = vadd.f32 %v2712_v39, %v2648_v40 }
 0x1c4   : > { %1843 = vst.msk [vmem:[%s2571_s26 + $0x4c] sm:$0xf] %vm1823_vm9, %v1810_v48  ;;  %v1624_v40 = vsel %vm1146_vm6, %v2732_v12, 0.0 }
 0x1c5   : > { %1850 = vst.msk [vmem:[%s2571_s26 + $0x68] sm:$0xf] %vm1823_vm9, %v1817_v26  ;;  %v1607_v33 = vadd.f32 %v1606_v25, %v1605_v21 }
 0x1c7   : > { %v1515_v28 = vpop.f32.mrf.mxu2  ;;  %v1609_v27 = vadd.f32 %v1608_v56, %v1607_v33 }
 0x1c8   : > { %v2796_v14 = vadd.f32 %v1515_v28, %v1416_v31  ;;  %v1532_v32 = vpop.f32.mrf.mxu3  ;;  %v1612_v31 = vsel %vm1146_vm6, %v2752_v37, 0.0 }
 0x1c9   : > { %v2798_v44 = vadd.f32 %v1532_v32, %v1433_v35  ;;  %v1417_v49 = vpop.f32.mrf.mxu1  ;;  %v1438_v35 = vadd.f32 %v2704_v62, %v2638_v59  ;;  %v1611_v28 = vadd.f32 %v1610_v53, %v1609_v27  ;;  %v1614_v32 = vsel %vm1146_vm6, %v2774_v4, 0.0 }
 0x1ca   : > { %v1811_v0 = vpack.c.bf16 %v2796_v14, %v2796_v14  ;;  %v1320_v46 = vpop.f32.mrf.mxu0  ;;  %v1626_v53 = vsel %vm1146_vm6, %v2754_v42, 0.0  ;;  %v1443_v27 = vadd.f32 %v2720_v11, %v2656_v8 }
 0x1cb   : > { %v1818_v16 = vpack.c.bf16 %v2798_v44, %v2798_v44  ;;  %v1418_v61 = vadd.f32 %v1417_v49, %v1320_v46  ;;  %v1613_v2 = vadd.f32 %v1612_v31, %v1611_v28  ;;  %v1616_v46 = vsel %vm1146_vm6, %v2796_v14, 0.0 }
 0x1cc   : > { %1844 = vst.msk [vmem:[%s2571_s26 + $0x50] sm:$0xf] %vm1823_vm9, %v1811_v0 }
 0x1cd   : > { %1851 = vst.msk [vmem:[%s2571_s26 + $0x6c] sm:$0xf] %vm1823_vm9, %v1818_v16  ;;  %v1615_v16 = vadd.f32 %v1614_v32, %v1613_v2  ;;  %v1630_v32 = vsel %vm1146_vm6, %v2798_v44, 0.0  ;;  %v2053_v2 = vmov 256.0  }
 0x1ce   : > { %2039 = vrcp.f32 %v2053_v2 }
 0x1cf   : > { %v1517_v17 = vpop.f32.mrf.mxu2  ;;  %v1617_v45 = vadd.f32 %v1616_v46, %v1615_v16 }
 0x1d0   : > { %v2818_v7 = vadd.f32 %v1517_v17, %v1418_v61  ;;  %v1535_v15 = vpop.f32.mrf.mxu3 }
 0x1d1   : > { %v2820_v48 = vadd.f32 %v1535_v15, %v1436_v63  ;;  %v1420_v23 = vpop.f32.mrf.mxu1 }
 0x1d2   : > { %v1812_v26 = vpack.c.bf16 %v2818_v7, %v2818_v7  ;;  %v1323_v29 = vpop.f32.mrf.mxu0  ;;  %v1618_v55 = vsel %vm1146_vm6, %v2818_v7, 0.0 }
 0x1d3   : > { %v1819_v18 = vpack.c.bf16 %v2820_v48, %v2820_v48  ;;  %v1421_v22 = vadd.f32 %v1420_v23, %v1323_v29  ;;  %v1619_v17 = vadd.f32 %v1618_v55, %v1617_v45  ;;  %v1632_v8 = vsel %vm1146_vm6, %v2820_v48, 0.0 }
 0x1d4   : > { %1845 = vst.msk [vmem:[%s2571_s26 + $0x54] sm:$0xf] %vm1823_vm9, %v1812_v26 }
 0x1d5   : > { %1852 = vst.msk [vmem:[%s2571_s26 + $0x70] sm:$0xf] %vm1823_vm9, %v1819_v18 }
 0x1d7   : > { %v1520_v47 = vpop.f32.mrf.mxu2 }
 0x1d8   : > { %v2840_v43 = vadd.f32 %v1520_v47, %v1421_v22  ;;  %v1537_v49 = vpop.f32.mrf.mxu3  ;;  %v1628_v22 = vsel %vm1146_vm6, %v2776_v13, 0.0 }
 0x1d9   : > { %v2842_v0 = vadd.f32 %v1537_v49, %v1438_v35  ;;  %v1422_v51 = vpop.f32.mrf.mxu1 }
 0x1da   : > { %v1813_v19 = vpack.c.bf16 %v2840_v43, %v2840_v43  ;;  %v1325_v62 = vpop.f32.mrf.mxu0  ;;  %v1620_v61 = vsel %vm1146_vm6, %v2840_v43, 0.0 }
 0x1db   : > { %v1820_v59 = vpack.c.bf16 %v2842_v0, %v2842_v0  ;;  %v1423_v63 = vadd.f32 %v1422_v51, %v1325_v62  ;;  %v1621_v23 = vadd.f32 %v1620_v61, %v1619_v17  ;;  %v2040_v62 = vpop.eup %2039 }
 0x1dc   : > { %1846 = vst.msk [vmem:[%s2571_s26 + $0x58] sm:$0xf] %vm1823_vm9, %v1813_v19  ;;  %v1634_v19 = vsel %vm1146_vm6, %v2842_v0, 0.0  ;;  %v1647_v61 = vmul.f32 256.0, %v2040_v62  ;;  %vm1651_vm10 = vweird.f32 %v2040_v62 }
 0x1dd   : > { %1853 = vst.msk [vmem:[%s2571_s26 + $0x74] sm:$0xf] %vm1823_vm9, %v1820_v59 }
 0x1de   : > { %v1648_v17 = vsub.f32 1.0, %v1647_v61 }
 0x1df   : > { %v1522_v25 = vpop.f32.mrf.mxu2 }
 0x1e0   : > { %v2860_v15 = vadd.f32 %v1522_v25, %v1423_v63  ;;  %v1540_v21 = vpop.f32.mrf.mxu3 }
 0x1e1   : > { %v2862_v56 = vadd.f32 %v1540_v21, %v1441_v30 }
 0x1e2   : > { %v1622_v26 = vsel %vm1146_vm6, %v2860_v15, 0.0  ;;  %v1814_v29 = vpack.c.bf16 %v2860_v15, %v2860_v15 }
 0x1e3   : > { %v1623_v33 = vadd.f32 %v1622_v26, %v1621_v23  ;;  %v1821_v18 = vpack.c.bf16 %v2862_v56, %v2862_v56  ;;  %v1636_v59 = vsel %vm1146_vm6, %v2862_v56, 0.0  ;;  %v1649_v23 = vmul.f32 %v2040_v62, %v1648_v17 }
 0x1e4   : > { %1847 = vst.msk [vmem:[%s2571_s26 + $0x5c] sm:$0xf] %vm1823_vm9, %v1814_v29 }
 0x1e5   : > { %v1625_v39 = vadd.f32 %v1624_v40, %v1623_v33  ;;  %1854 = vst.msk [vmem:[%s2571_s26 + $0x78] sm:$0xf] %vm1823_vm9, %v1821_v18  ;;  %v1650_v29 = vadd.f32 %v2040_v62, %v1649_v23 }
 0x1e7   : > { %v1627_v31 = vadd.f32 %v1626_v53, %v1625_v39  ;;  %v1652_v18 = vsel %vm1651_vm10, %v2040_v62, %v1650_v29 }
 0x1e8   : > { %v1542_v35 = vpop.f32.mrf.mxu3 }
 0x1e9   : > { %v1629_v28 = vadd.f32 %v1628_v22, %v1627_v31  ;;  %v2882_v47 = vadd.f32 %v1542_v35, %v1443_v27 }
 0x1eb   : > { %v1631_v49 = vadd.f32 %v1630_v32, %v1629_v28  ;;  %v1822_v46 = vpack.c.bf16 %v2882_v47, %v2882_v47  ;;  %v1638_v55 = vsel %vm1146_vm6, %v2882_v47, 0.0 }
 0x1ed   : > { %v1633_v11 = vadd.f32 %v1632_v8, %v1631_v49  ;;  %1855 = vst.msk [vmem:[%s2571_s26 + $0x7c] sm:$0xf] %vm1823_vm9, %v1822_v46 }
 0x1ef   : > { %v1635_v16 = vadd.f32 %v1634_v19, %v1633_v11 }
 0x1f1   : > { %v1637_v51 = vadd.f32 %v1636_v59, %v1635_v16 }
 0x1f3   : > { %v1639_v45 = vadd.f32 %v1638_v55, %v1637_v51 }
 0x1f5   : > { %v1640_v63 = vrot.slane %v1639_v45, 4 }
 0x1f7   : > { %v1641_v30 = vadd.f32 %v1640_v63, %v1639_v45 }
 0x1f9   : > { %v1642_v25 = vrot.slane %v1641_v30, 2 }
 0x1fb   : > { %v1643_v21 = vadd.f32 %v1642_v25, %v1641_v30 }
 0x1fd   : > { %v1644_v26 = vrot.slane %v1643_v21, 1 }
 0x1ff   : > { %v2898_v33 = vadd.f32 %v1644_v26, %v1643_v21 }
 0x201   : > { %v2901_v40 = vmul.f32 %v1652_v18, %v2898_v33 }
 0x203   : > { %v1654_v39 = vsub.f32 %v2566_v50, %v2901_v40  ;;  %v1655_v53 = vsub.f32 %v2583_v58, %v2901_v40  ;;  %v1656_v27 = vsub.f32 %v2595_v3, %v2901_v40  ;;  %v1657_v31 = vsub.f32 %v2605_v6, %v2901_v40 }
 0x204   : > { %v1658_v28 = vsub.f32 %v2617_v24, %v2901_v40  ;;  %v1659_v49 = vsub.f32 %v2627_v38, %v2901_v40  ;;  %v1660_v3 = vsub.f32 %v2640_v36, %v2901_v40  ;;  %v1661_v24 = vsub.f32 %v2650_v41, %v2901_v40 }
 0x205   : > { %v1686_v22 = vmul.f32 %v1654_v39, %v1654_v39  ;;  %v1687_v35 = vmul.f32 %v1655_v53, %v1655_v53  ;;  %v1688_v32 = vmul.f32 %v1656_v27, %v1656_v27  ;;  %v1689_v2 = vmul.f32 %v1657_v31, %v1657_v31 }
 0x206   : > { %v1690_v8 = vmul.f32 %v1658_v28, %v1658_v28  ;;  %v1691_v19 = vmul.f32 %v1659_v49, %v1659_v49  ;;  %v1662_v59 = vsub.f32 %v2658_v10, %v2901_v40  ;;  %v1692_v62 = vmul.f32 %v1660_v3, %v1660_v3 }
 0x207   : > { %v1718_v50 = vsel %vm1146_vm6, %v1686_v22, 0.0  ;;  %v1719_v58 = vsel %vm1146_vm6, %v1687_v35, 0.0  ;;  %v1721_v6 = vsel %vm1146_vm6, %v1688_v32, 0.0  ;;  %v1723_v16 = vsel %vm1146_vm6, %v1689_v2, 0.0 }
 0x208   : > { %v1720_v46 = vadd.f32 %v1719_v58, %v1718_v50  ;;  %v1725_v51 = vsel %vm1146_vm6, %v1690_v8, 0.0  ;;  %v1663_v36 = vsub.f32 %v2666_v54, %v2901_v40  ;;  %v1693_v45 = vmul.f32 %v1661_v24, %v1661_v24 }
 0x209   : > { %v1727_v61 = vsel %vm1146_vm6, %v1691_v19, 0.0  ;;  %v1664_v41 = vsub.f32 %v2674_v52, %v2901_v40  ;;  %v1694_v30 = vmul.f32 %v1662_v59, %v1662_v59  ;;  %v1729_v17 = vsel %vm1146_vm6, %v1692_v62, 0.0 }
 0x20a   : > { %v1722_v11 = vadd.f32 %v1721_v6, %v1720_v46  ;;  %v1665_v10 = vsub.f32 %v2682_v1, %v2901_v40  ;;  %v1695_v21 = vmul.f32 %v1663_v36, %v1663_v36  ;;  %v1731_v23 = vsel %vm1146_vm6, %v1693_v45, 0.0 }
 0x20b   : > { %v1666_v54 = vsub.f32 %v2690_v20, %v2901_v40  ;;  %v1696_v29 = vmul.f32 %v1664_v41, %v1664_v41  ;;  %v1733_v18 = vsel %vm1146_vm6, %v1694_v30, 0.0  ;;  %v1667_v52 = vsub.f32 %v2698_v34, %v2901_v40 }
 0x20c   : > { %v1724_v38 = vadd.f32 %v1723_v16, %v1722_v11  ;;  %v1697_v53 = vmul.f32 %v1665_v10, %v1665_v10  ;;  %v1735_v27 = vsel %vm1146_vm6, %v1695_v21, 0.0  ;;  %v1668_v1 = vsub.f32 %v2706_v9, %v2901_v40 }
 0x20d   : > { %v1698_v22 = vmul.f32 %v1666_v54, %v1666_v54  ;;  %v1737_v35 = vsel %vm1146_vm6, %v1696_v29, 0.0  ;;  %v1669_v20 = vsub.f32 %v2714_v60, %v2901_v40  ;;  %v1699_v32 = vmul.f32 %v1667_v52, %v1667_v52 }
 0x20e   : > { %v1726_v55 = vadd.f32 %v1725_v51, %v1724_v38  ;;  %v1739_v49 = vsel %vm1146_vm6, %v1697_v53, 0.0  ;;  %v1670_v34 = vsub.f32 %v2722_v57, %v2901_v40  ;;  %v1700_v50 = vmul.f32 %v1668_v1, %v1668_v1 }
 0x20f   : > { %v1741_v58 = vsel %vm1146_vm6, %v1698_v22, 0.0  ;;  %v1671_v9 = vsub.f32 %v2730_v5, %v2901_v40  ;;  %v1701_v3 = vmul.f32 %v1669_v20, %v1669_v20  ;;  %v1743_v8 = vsel %vm1146_vm6, %v1699_v32, 0.0 }
 0x210   : > { %v1728_v63 = vadd.f32 %v1727_v61, %v1726_v55  ;;  %v1672_v60 = vsub.f32 %v2752_v37, %v2901_v40  ;;  %v1702_v11 = vmul.f32 %v1670_v34, %v1670_v34  ;;  %v1745_v24 = vsel %vm1146_vm6, %v1700_v50, 0.0 }
 0x211   : > { %v1673_v57 = vsub.f32 %v2774_v4, %v2901_v40  ;;  %v1703_v16 = vmul.f32 %v1671_v9, %v1671_v9  ;;  %v1747_v38 = vsel %vm1146_vm6, %v1701_v3, 0.0  ;;  %v1674_v5 = vsub.f32 %v2796_v14, %v2901_v40 }
 0x212   : > { %v1730_v25 = vadd.f32 %v1729_v17, %v1728_v63  ;;  %v1704_v62 = vmul.f32 %v1672_v60, %v1672_v60  ;;  %v1749_v51 = vsel %vm1146_vm6, %v1702_v11, 0.0  ;;  %v1675_v37 = vsub.f32 %v2818_v7, %v2901_v40 }
 0x213   : > { %v1705_v36 = vmul.f32 %v1673_v57, %v1673_v57  ;;  %v1751_v45 = vsel %vm1146_vm6, %v1703_v16, 0.0  ;;  %v1676_v4 = vsub.f32 %v2840_v43, %v2901_v40  ;;  %v1706_v63 = vmul.f32 %v1674_v5, %v1674_v5 }
 0x214   : > { %v1732_v26 = vadd.f32 %v1731_v23, %v1730_v25  ;;  %v1753_v41 = vsel %vm1146_vm6, %v1704_v62, 0.0  ;;  %v1677_v14 = vsub.f32 %v2860_v15, %v2901_v40  ;;  %v1707_v17 = vmul.f32 %v1675_v37, %v1675_v37 }
 0x215   : > { %v1755_v25 = vsel %vm1146_vm6, %v1705_v36, 0.0  ;;  %v1678_v7 = vsub.f32 %v2732_v12, %v2901_v40  ;;  %v1708_v21 = vmul.f32 %v1676_v4, %v1676_v4  ;;  %v1757_v23 = vsel %vm1146_vm6, %v1706_v63, 0.0 }
 0x216   : > { %v1734_v39 = vadd.f32 %v1733_v18, %v1732_v26  ;;  %v1679_v43 = vsub.f32 %v2754_v42, %v2901_v40  ;;  %v1709_v54 = vmul.f32 %v1677_v14, %v1677_v14  ;;  %v1759_v29 = vsel %vm1146_vm6, %v1707_v17, 0.0 }
 0x217   : > { %v1680_v15 = vsub.f32 %v2776_v13, %v2901_v40  ;;  %v1761_v52 = vsel %vm1146_vm6, %v1708_v21, 0.0  ;;  %v1681_v12 = vsub.f32 %v2798_v44, %v2901_v40  ;;  %v1682_v42 = vsub.f32 %v2820_v48, %v2901_v40 }
 0x218   : > { %v1736_v31 = vadd.f32 %v1735_v27, %v1734_v39  ;;  %v1710_v39 = vmul.f32 %v1678_v7, %v1678_v7  ;;  %v1711_v27 = vmul.f32 %v1679_v43, %v1679_v43  ;;  %v1683_v13 = vsub.f32 %v2842_v0, %v2901_v40 }
 0x219   : > { %v1712_v22 = vmul.f32 %v1680_v15, %v1680_v15  ;;  %v1713_v20 = vmul.f32 %v1681_v12, %v1681_v12  ;;  %v1684_v44 = vsub.f32 %v2862_v56, %v2901_v40  ;;  %v1685_v48 = vsub.f32 %v2882_v47, %v2901_v40 }
 0x21a   : > { %v1738_v28 = vadd.f32 %v1737_v35, %v1736_v31  ;;  %v1763_v31 = vsel %vm1146_vm6, %v1709_v54, 0.0  ;;  %v1765_v35 = vsel %vm1146_vm6, %v1710_v39, 0.0  ;;  %v1767_v32 = vsel %vm1146_vm6, %v1711_v27, 0.0 }
 0x21b   : > { %v1769_v34 = vsel %vm1146_vm6, %v1712_v22, 0.0  ;;  %v1716_v0 = vmul.f32 %v1684_v44, %v1684_v44 }
 0x21c   : > { %v1740_v2 = vadd.f32 %v1739_v49, %v1738_v28 }
 0x21d   : > { %v1777_v11 = vsel %vm1146_vm6, %v1716_v0, 0.0 }
 0x21e   : > { %v1742_v46 = vadd.f32 %v1741_v58, %v1740_v2  ;;  %v1714_v2 = vmul.f32 %v1682_v42, %v1682_v42  ;;  %v1715_v58 = vmul.f32 %v1683_v13, %v1683_v13 }
 0x220   : > { %v1744_v6 = vadd.f32 %v1743_v8, %v1742_v46  ;;  %v1771_v46 = vsel %vm1146_vm6, %v1713_v20, 0.0  ;;  %v1773_v3 = vsel %vm1146_vm6, %v1714_v2, 0.0  ;;  %v1775_v60 = vsel %vm1146_vm6, %v1715_v58, 0.0 }
 0x222   : > { %v1746_v19 = vadd.f32 %v1745_v24, %v1744_v6  ;;  %v1717_v6 = vmul.f32 %v1685_v48, %v1685_v48 }
 0x224   : > { %v1748_v59 = vadd.f32 %v1747_v38, %v1746_v19  ;;  %v1779_v19 = vsel %vm1146_vm6, %v1717_v6, 0.0 }
 0x226   : > { %v1750_v55 = vadd.f32 %v1749_v51, %v1748_v59 }
 0x228   : > { %v1752_v61 = vadd.f32 %v1751_v45, %v1750_v55 }
 0x22a   : > { %v1754_v30 = vadd.f32 %v1753_v41, %v1752_v61 }
 0x22c   : > { %v1756_v10 = vadd.f32 %v1755_v25, %v1754_v30 }
 0x22e   : > { %v1758_v26 = vadd.f32 %v1757_v23, %v1756_v10 }
 0x230   : > { %v1760_v18 = vadd.f32 %v1759_v29, %v1758_v26 }
 0x232   : > { %v1762_v53 = vadd.f32 %v1761_v52, %v1760_v18 }
 0x234   : > { %v1764_v1 = vadd.f32 %v1763_v31, %v1762_v53 }
 0x236   : > { %v1766_v28 = vadd.f32 %v1765_v35, %v1764_v1 }
 0x238   : > { %v1768_v49 = vadd.f32 %v1767_v32, %v1766_v28 }
 0x23a   : > { %v1770_v50 = vadd.f32 %v1769_v34, %v1768_v49 }
 0x23c   : > { %v1772_v9 = vadd.f32 %v1771_v46, %v1770_v50 }
 0x23e   : > { %v1774_v8 = vadd.f32 %v1773_v3, %v1772_v9 }
 0x240   : > { %v1776_v56 = vadd.f32 %v1775_v60, %v1774_v8 }
 0x242   : > { %v1778_v24 = vadd.f32 %v1777_v11, %v1776_v56 }
 0x244   : > { %v1780_v57 = vadd.f32 %v1779_v19, %v1778_v24 }
 0x246   : > { %v1781_v47 = vrot.slane %v1780_v57, 4 }
 0x248   : > { %v1782_v40 = vadd.f32 %v1781_v47, %v1780_v57 }
 0x24a   : > { %v1783_v16 = vrot.slane %v1782_v40, 2 }
 0x24c   : > { %v1784_v38 = vadd.f32 %v1783_v16, %v1782_v40 }
 0x24e   : > { %v1785_v59 = vrot.slane %v1784_v38, 1 }
 0x250   : > { %v1786_v5 = vadd.f32 %v1785_v59, %v1784_v38 }
 0x252   : > { %v1788_v62 = vsel %vm773_vm0, %v2898_v33, %v1786_v5 }
 0x253   : > { %1790 = vst.msk [vmem:[%s235_s30] sm:$0x3] %vm1789_vm11, %v1788_v62 }
 0x254 PF: > { %s16_s18 = sadd.s32 1, %s2049_s18  }
 0x255   : > { %p13_p4 = scmp.ge.s32.totalorder %s16_s18, 4  }
 0x257   :  { %15 = sbr.rel (!%p13_p4) target bundleno = 1 (0x1), region = 80 }

// kernel: resnet_block_pallas.4
= control target key start
LH: loop header
LB: loop body
LE: loop exit
PB: predicated region body
PF: predicated region fallthrough
CT: control target
= control target key end

     0   :  { %s2227_s18 = smov 0   ;;  %s3135_s0 = inlined_call_operand.vmem [shape: bf16[2,16,16,4], index: 0, kind: input, shape index: {}]   ;;  %s3136_s1 = inlined_call_operand.vmem [shape: f32[1,4], index: 1, kind: input, shape index: {}]   ;;  %s3137_s2 = inlined_call_operand.vmem [shape: f32[1,4], index: 2, kind: input, shape index: {}]   ;;  %s3138_s3 = inlined_call_operand.vmem [shape: bf16[3,12,4], index: 3, kind: input, shape index: {}]   ;;  %s3139_s4 = inlined_call_operand.vmem [shape: bf16[2,16,16,4], index: 4, kind: output, shape index: {0}]   ;;  %s3140_s5 = inlined_call_operand.vmem [shape: f32[2,2,4], index: 5, kind: output, shape index: {1}]  }
   0x1 LB: > { %s2006_s19 = sadd.s32 4294967295, %s2192_s18   ;;  %p2010_p0 = scmp.ge.s32.totalorder %s2192_s18, 1  ;;  %s2192_s18 = sphi %s2227_s18, %s16_s18  }
   0x2   : > { %p190_p1 = scmp.lt.s32.totalorder %s2192_s18, 3 }
   0x4   : > { %p191_p2 = pnand %p2010_p0, %p190_p1 }
   0x5   : > { %p222_p3 = scmp.lt.s32.totalorder (!%p191_p2), %s2006_s19, 1  ;;  %s2194_s28 = smov (!%p191_p2), 4  }
   0x6   : > { %194 = sbr.rel (%p191_p2) target bundleno = 600 (0x258), region = 36  ;;  %s2195_s29 = smov (!%p191_p2), 8  }
   0xb   : > { %s3144_s19 = smov (!%p222_p3, %s2006_s19), 1  ;;  %v2248_v0 = vld [vmem:[%s3136_s1] ss:$0 sm:$0xff]  ;;  %vm837_vm0 = vcmask 1040384   ;;  %vm838_vm1 = vsmask.f32 256 }
   0xc   : > { %s2082_s20 = sshll.u32 %s3144_s19, 7  ;;  %v2256_v6 = vld [vmem:[%s3137_s2] ss:$0 sm:$0xff]  ;;  %vm1129_vm2 = vcmask 1046528   ;;  %vm872_vm3 = vsmask.f32 7424  ;;  %vm2279_vm4 = vmand %vm837_vm0, %vm838_vm1 }
   0xd   : > { %s2243_s23 = scalar_lea.vmem %s3135_s0, %s2082_s20  ;;  %vm1319_vm5 = vcmask 1045504   ;;  %vm1210_vm6 = vcmask 31744   ;;  %vm1243_vm7 = vcmask 64512   ;;  %vm1286_vm8 = vcmask 97280   ;;  %s2698_s26 = scalar_lea.vmem %s3139_s4, %s2082_s20 }
   0xe   : > { %v2151_v1 = vld [vmem:[%s2243_s23 + $0x8] sm:$0xff]   ;;  %v2088_v2 = vld [vmem:[%s2243_s23] sm:$0xff]   ;;  %v2152_v3 = vld [vmem:[%s2243_s23 + $0x10] sm:$0xff]   ;;  %vm1887_vm9 = vcmask 27648   ;;  %s2015_s20 = sshll.u32 %s3144_s19, 1  ;;  %vm1853_vm11 = vcmask 25600  }
   0xf   : > { %v2093_v4 = vunpack.c.l.bf16 %v2151_v1  ;;  %v2094_v5 = vunpack.c.h.bf16 %v2151_v1  ;;  %v2089_v7 = vunpack.c.l.bf16 %v2088_v2  ;;  %v2090_v8 = vunpack.c.h.bf16 %v2088_v2  ;;  %v2162_v9 = vld [vmem:[%s2243_s23 + $0x60] sm:$0xff]  }
  0x10   : > { %v2097_v10 = vunpack.c.l.bf16 %v2152_v3  ;;  %v2098_v11 = vunpack.c.h.bf16 %v2152_v3  ;;  %v2137_v12 = vunpack.c.l.bf16 %v2162_v9  ;;  %v2138_v13 = vunpack.c.h.bf16 %v2162_v9 }
  0x11   : > { %v308_v14 = vmul.f32 %v2248_v0, %v2093_v4  ;;  %v309_v15 = vmul.f32 %v2248_v0, %v2094_v5  ;;  %v306_v16 = vmul.f32 %v2248_v0, %v2089_v7  ;;  %v307_v17 = vmul.f32 %v2248_v0, %v2090_v8 }
  0x12   : > { %v310_v18 = vmul.f32 %v2248_v0, %v2097_v10  ;;  %v311_v19 = vmul.f32 %v2248_v0, %v2098_v11  ;;  %v330_v20 = vmul.f32 %v2248_v0, %v2137_v12  ;;  %v331_v21 = vmul.f32 %v2248_v0, %v2138_v13 }
  0x13   : > { %v343_v22 = vadd.f32 %v2256_v6, %v308_v14  ;;  %v344_v23 = vadd.f32 %v2256_v6, %v309_v15  ;;  %v341_v24 = vadd.f32 %v2256_v6, %v306_v16  ;;  %v342_v25 = vadd.f32 %v2256_v6, %v307_v17 }
  0x14   : > { %v345_v26 = vadd.f32 %v2256_v6, %v310_v18  ;;  %v346_v27 = vadd.f32 %v2256_v6, %v311_v19  ;;  %v365_v28 = vadd.f32 %v2256_v6, %v330_v20  ;;  %v366_v29 = vadd.f32 %v2256_v6, %v331_v21 }
  0x15   : > { %v375_v30 = vmax.f32 %v343_v22, 0.0  ;;  %v376_v31 = vmax.f32 %v344_v23, 0.0  ;;  %v373_v32 = vmax.f32 %v341_v24, 0.0  ;;  %v374_v33 = vmax.f32 %v342_v25, 0.0 }
  0x16   : > { %v377_v34 = vmax.f32 %v345_v26, 0.0  ;;  %v378_v35 = vmax.f32 %v346_v27, 0.0  ;;  %v397_v36 = vmax.f32 %v365_v28, 0.0  ;;  %v398_v37 = vmax.f32 %v366_v29, 0.0 }
  0x17   : > { %v407_v38 = vpack.c.bf16 %v375_v30, %v375_v30  ;;  %v408_v39 = vpack.c.bf16 %v376_v31, %v376_v31  ;;  %v405_v40 = vpack.c.bf16 %v373_v32, %v373_v32  ;;  %v406_v41 = vpack.c.bf16 %v374_v33, %v374_v33 }
  0x18   : > { %v409_v42 = vpack.c.bf16 %v377_v34, %v377_v34  ;;  %v410_v43 = vpack.c.bf16 %v378_v35, %v378_v35  ;;  %v429_v44 = vpack.c.bf16 %v397_v36, %v397_v36  ;;  %v430_v45 = vpack.c.bf16 %v398_v37, %v398_v37 }
  0x19   : > { %v453_v46 = vunpack.c.l.b16 %v407_v38  ;;  %v565_v47 = vunpack.c.l.b16 %v408_v39  ;;  %v454_v48 = vunpack.c.l.b16 %v405_v40  ;;  %v566_v49 = vunpack.c.l.b16 %v406_v41 }
  0x1a   : > { %v455_v50 = vunpack.c.l.b16 %v409_v42  ;;  %v567_v51 = vunpack.c.l.b16 %v410_v43  ;;  %v465_v52 = vunpack.c.l.b16 %v429_v44  ;;  %v2275_v53 = vunpack.c.l.b16 %v430_v45 }
  0x1b   : > { %v469_v54 = vpack.c.b16 %v453_v46, %v453_v46  ;;  %v581_v55 = vpack.c.b16 %v565_v47, %v453_v46  ;;  %v741_v56 = vpack.c.b16 %v565_v47, %v565_v47  ;;  %v470_v57 = vpack.c.b16 %v454_v48, %v454_v48 }
  0x1c   : > { %v582_v58 = vpack.c.b16 %v566_v49, %v454_v48  ;;  %v742_v59 = vpack.c.b16 %v566_v49, %v566_v49  ;;  %v471_v60 = vpack.c.b16 %v455_v50, %v455_v50  ;;  %v583_v61 = vpack.c.b16 %v567_v51, %v455_v50 }
  0x1d   : > { %v486_v62 = vshrl.u32 %v469_v54, 16  ;;  %v598_v63 = vshrl.u32 %v581_v55, 16  ;;  %v601_v1 = vshll.u32 %v581_v55, 16  ;;  %v758_v2 = vshll.u32 %v741_v56, 16  ;;  %v2163_v55 = vld [vmem:[%s2243_s23 + $0x68] sm:$0xff]  }
  0x1e   : > { %v489_v3 = vshrl.u32 %v470_v57, 16  ;;  %v605_v4 = vshrl.u32 %v582_v58, 16  ;;  %v608_v5 = vshll.u32 %v582_v58, 16  ;;  %v762_v7 = vshll.u32 %v742_v59, 16 }
  0x1f   : > { %v600_v8 = vrot.slane %v598_v63, 7  ;;  %v760_v9 = vrot.slane %v758_v2, 3  ;;  %v492_v10 = vshrl.u32 %v471_v60, 16  ;;  %v612_v11 = vshrl.u32 %v583_v61, 16  ;;  %v2153_v60 = vld [vmem:[%s2243_s23 + $0x18] sm:$0xff]  }
  0x20   : > { %v607_v13 = vrot.slane %v605_v4, 7  ;;  %v764_v14 = vrot.slane %v762_v7, 3  ;;  %v615_v15 = vshll.u32 %v583_v61, 16  ;;  %v743_v16 = vpack.c.b16 %v567_v51, %v567_v51  ;;  %v2154_v4 = vld [vmem:[%s2243_s23 + $0x20] sm:$0xff]  }
  0x21   : > { %v603_v17 = vor.u32 %v601_v1, %v600_v8  ;;  %v856_v18 = vsel %vm2279_vm4, %v600_v8, %v760_v9  ;;  %v614_v19 = vrot.slane %v612_v11, 7  ;;  %v481_v20 = vpack.c.b16 %v465_v52, %v465_v52 }
  0x22   : > { %v881_v21 = vshll.u32 %v856_v18, 16  ;;  %v610_v22 = vor.u32 %v608_v5, %v607_v13  ;;  %v857_v23 = vsel %vm2279_vm4, %v607_v13, %v764_v14  ;;  %v1131_v24 = vrot.slane %v856_v18, 1 }
  0x23   : > { %v2289_v25 = vsel %vm2279_vm4, %v486_v62, %v603_v17  ;;  %v893_v26 = vshll.u32 %v857_v23, 16  ;;  %v1134_v27 = vrot.slane %v857_v23, 1  ;;  %v617_v28 = vor.u32 %v615_v15, %v614_v19 }
  0x24   : > { %v874_v29 = vshrl.u32 %v2289_v25, 16  ;;  %v876_v30 = vshll.u32 %v2289_v25, 16  ;;  %v883_v31 = vrot.slane %v881_v21, 1  ;;  %v2295_v32 = vsel %vm2279_vm4, %v489_v3, %v610_v22 }
  0x25   : > { %v886_v33 = vshrl.u32 %v2295_v32, 16  ;;  %v888_v34 = vshll.u32 %v2295_v32, 16  ;;  %v895_v35 = vrot.slane %v893_v26, 1  ;;  %v1130_v36 = vrot.slane %v2289_v25, 1 }
  0x26   : > { %v878_v37 = vrot.slane %v876_v30, 1  ;;  %v1133_v38 = vrot.slane %v2295_v32, 1  ;;  %v766_v39 = vshll.u32 %v743_v16, 16  ;;  %v2303_v40 = vsel %vm2279_vm4, %v492_v10, %v617_v28 }
  0x27   : > { %v890_v41 = vrot.slane %v888_v34, 1  ;;  %v1132_v42 = vsel %vm1129_vm2, %v1130_v36, %v1131_v24  ;;  %v1136_v43 = vrot.slane %v2303_v40, 1  ;;  %v522_v44 = vshrl.u32 %v481_v20, 16 }
  0x28   : > { %v879_v45 = vor.u32 %v878_v37, %v874_v29  ;;  %v1135_v46 = vsel %vm1129_vm2, %v1133_v38, %v1134_v27  ;;  %v768_v47 = vrot.slane %v766_v39, 3  ;;  %v593_v48 = vpack.c.b16 %v2275_v53, %v465_v52  ;;  %v2164_v37 = vld [vmem:[%s2243_s23 + $0x70] sm:$0xff]  }
  0x29   : > { %v891_v49 = vor.u32 %v890_v41, %v886_v33  ;;  %v753_v50 = vpack.c.b16 %v2275_v53, %v2275_v53  ;;  %v898_v51 = vshrl.u32 %v2303_v40, 16  ;;  %v900_v54 = vshll.u32 %v2303_v40, 16 }
  0x2a   : > { %v884_v56 = vsel %vm872_vm3, %v879_v45, %v883_v31  ;;  %v858_v57 = vsel %vm2279_vm4, %v614_v19, %v768_v47  ;;  %v682_v58 = vshrl.u32 %v593_v48, 16  ;;  %v685_v59 = vshll.u32 %v593_v48, 16 }
  0x2b   : > { %1065 = vrot.lane.b32.xlu0 %v884_v56, %s2194_s28  ;;  %v896_v52 = vsel %vm872_vm3, %v891_v49, %v895_v35  ;;  %v1137_v53 = vrot.slane %v858_v57, 1  ;;  %v806_v61 = vshll.u32 %v753_v50, 16  ;;  %v902_v62 = vrot.slane %v900_v54, 1 }
  0x2c   : > { %1067 = vrot.lane.b32.xlu1 %v896_v52, %s2194_s28  ;;  %v684_v63 = vrot.slane %v682_v58, 7  ;;  %v905_v1 = vshll.u32 %v858_v57, 16  ;;  %v2141_v2 = vunpack.c.l.bf16 %v2163_v55  ;;  %v2142_v3 = vunpack.c.h.bf16 %v2163_v55 }
  0x2d   : > { %v1138_v5 = vsel %vm1129_vm2, %v1136_v43, %v1137_v53  ;;  %v808_v7 = vrot.slane %v806_v61, 3  ;;  %v903_v8 = vor.u32 %v902_v62, %v898_v51  ;;  %v2101_v9 = vunpack.c.l.bf16 %v2153_v60 }
  0x2e   : > { %v687_v10 = vor.u32 %v685_v59, %v684_v63  ;;  %v907_v11 = vrot.slane %v905_v1, 1  ;;  %v332_v13 = vmul.f32 %v2248_v0, %v2141_v2  ;;  %v333_v14 = vmul.f32 %v2248_v0, %v2142_v3 }
  0x2f   : > { %v868_v15 = vsel %vm2279_vm4, %v684_v63, %v808_v7  ;;  %v2102_v16 = vunpack.c.h.bf16 %v2153_v60  ;;  %v312_v17 = vmul.f32 %v2248_v0, %v2101_v9  ;;  %v2105_v18 = vunpack.c.l.bf16 %v2154_v4 }
  0x30   : > { %v2330_v19 = vsel %vm2279_vm4, %v522_v44, %v687_v10  ;;  %v1167_v20 = vrot.slane %v868_v15, 1  ;;  %v908_v21 = vsel %vm872_vm3, %v903_v8, %v907_v11  ;;  %v367_v22 = vadd.f32 %v2256_v6, %v332_v13 }
  0x31   : > { %v1166_v23 = vrot.slane %v2330_v19, 1  ;;  %1069 = vrot.lane.b32.xlu2 %v908_v21, %s2194_s28  ;;  %v368_v24 = vadd.f32 %v2256_v6, %v333_v14  ;;  %v313_v26 = vmul.f32 %v2248_v0, %v2102_v16  ;;  %v347_v27 = vadd.f32 %v2256_v6, %v312_v17 }
  0x32   : > { %v399_v28 = vmax.f32 %v367_v22, 0.0  ;;  %v1018_v29 = vshrl.u32 %v2330_v19, 16  ;;  %v1020_v30 = vshll.u32 %v2330_v19, 16  ;;  %v1025_v31 = vshll.u32 %v868_v15, 16 }
  0x33   : > { %1178 = vrot.lane.b32.xlu0 %v1132_v42, %s2195_s29  ;;  %v1168_v33 = vsel %vm1129_vm2, %v1166_v23, %v1167_v20  ;;  %v400_v34 = vmax.f32 %v368_v24, 0.0  ;;  %v348_v35 = vadd.f32 %v2256_v6, %v313_v26  ;;  %v379_v36 = vmax.f32 %v347_v27, 0.0 }
  0x34   : > { %1180 = vrot.lane.b32.xlu1 %v1135_v46, %s2195_s29  ;;  %v431_v38 = vpack.c.bf16 %v399_v28, %v399_v28  ;;  %v1022_v39 = vrot.slane %v1020_v30, 1  ;;  %v1027_v41 = vrot.slane %v1025_v31, 1  ;;  %v2106_v43 = vunpack.c.h.bf16 %v2154_v4 }
  0x35   : > { %v432_v44 = vpack.c.bf16 %v400_v34, %v400_v34  ;;  %v380_v45 = vmax.f32 %v348_v35, 0.0  ;;  %v411_v47 = vpack.c.bf16 %v379_v36, %v379_v36  ;;  %v314_v48 = vmul.f32 %v2248_v0, %v2105_v18 }
  0x36   : > { %v466_v49 = vunpack.c.l.b16 %v431_v38  ;;  %v1023_v42 = vor.u32 %v1022_v39, %v1018_v29  ;;  %v315_v50 = vmul.f32 %v2248_v0, %v2106_v43  ;;  %v2145_v51 = vunpack.c.l.bf16 %v2164_v37 }
  0x37   : > { %v578_v54 = vunpack.c.l.b16 %v432_v44  ;;  %v412_v55 = vpack.c.bf16 %v380_v45, %v380_v45  ;;  %v456_v56 = vunpack.c.l.b16 %v411_v47  ;;  %v349_v57 = vadd.f32 %v2256_v6, %v314_v48 }
  0x38   : > { %v482_v46 = vpack.c.b16 %v466_v49, %v466_v49  ;;  %v1028_v58 = vsel %vm872_vm3, %v1023_v42, %v1027_v41  ;;  %v350_v59 = vadd.f32 %v2256_v6, %v315_v50  ;;  %v2146_v60 = vunpack.c.h.bf16 %v2164_v37 }
  0x39   : > { %v594_v52 = vpack.c.b16 %v578_v54, %v466_v49  ;;  %v754_v53 = vpack.c.b16 %v578_v54, %v578_v54  ;;  %v472_v61 = vpack.c.b16 %v456_v56, %v456_v56  ;;  %v568_v62 = vunpack.c.l.b16 %v412_v55  ;;  %1089 = vrot.lane.b32.xlu2 %v1028_v58, %s2194_s28 }
  0x3a   : > { %v525_v63 = vshrl.u32 %v482_v46, 16  ;;  %v381_v1 = vmax.f32 %v349_v57, 0.0  ;;  %v382_v2 = vmax.f32 %v350_v59, 0.0  ;;  %v334_v3 = vmul.f32 %v2248_v0, %v2145_v51 }
  0x3b   : > { %1182 = vrot.lane.b32.xlu0 %v1138_v5, %s2195_s29  ;;  %v689_v4 = vshrl.u32 %v594_v52, 16  ;;  %v692_v7 = vshll.u32 %v594_v52, 16  ;;  %v810_v8 = vshll.u32 %v754_v53, 16  ;;  %v495_v9 = vshrl.u32 %v472_v61, 16 }
  0x3c   : > { %1202 = vrot.lane.b32.xlu1 %v1168_v33, %s2195_s29  ;;  %v584_v10 = vpack.c.b16 %v568_v62, %v456_v56  ;;  %v744_v11 = vpack.c.b16 %v568_v62, %v568_v62  ;;  %v413_v13 = vpack.c.bf16 %v381_v1, %v381_v1  ;;  %v414_v14 = vpack.c.bf16 %v382_v2, %v382_v2 }
  0x3d   : > { %v691_v15 = vrot.slane %v689_v4, 7  ;;  %v812_v16 = vrot.slane %v810_v8, 3  ;;  %v335_v17 = vmul.f32 %v2248_v0, %v2146_v60  ;;  %v369_v18 = vadd.f32 %v2256_v6, %v334_v3 }
  0x3e   : > { %v619_v20 = vshrl.u32 %v584_v10, 16  ;;  %v622_v21 = vshll.u32 %v584_v10, 16  ;;  %v770_v22 = vshll.u32 %v744_v11, 16  ;;  %v457_v5 = vunpack.c.l.b16 %v413_v13 }
  0x3f   : > { %v694_v23 = vor.u32 %v692_v7, %v691_v15  ;;  %v2359_v24 = vsel %vm2279_vm4, %v691_v15, %v812_v16  ;;  %v569_v26 = vunpack.c.l.b16 %v414_v14  ;;  %v370_v27 = vadd.f32 %v2256_v6, %v335_v17  ;;  %v2155_v14 = vld [vmem:[%s2243_s23 + $0x28] sm:$0xff]  }
  0x40   : > { %v1037_v28 = vshll.u32 %v2359_v24, 16  ;;  %v621_v29 = vrot.slane %v619_v20, 7  ;;  %v772_v30 = vrot.slane %v770_v22, 3  ;;  %v473_v31 = vpack.c.b16 %v457_v5, %v457_v5  ;;  %v2165_v20 = vld [vmem:[%s2243_s23 + $0x78] sm:$0xff]  }
  0x41   : > { %v2365_v33 = vsel %vm2279_vm4, %v525_v63, %v694_v23  ;;  %v585_v34 = vpack.c.b16 %v569_v26, %v457_v5  ;;  %v745_v35 = vpack.c.b16 %v569_v26, %v569_v26  ;;  %v401_v36 = vmax.f32 %v369_v18, 0.0 }
  0x42   : > { %v1030_v37 = vshrl.u32 %v2365_v33, 16  ;;  %v1032_v38 = vshll.u32 %v2365_v33, 16  ;;  %v1039_v39 = vrot.slane %v1037_v28, 1  ;;  %v624_v41 = vor.u32 %v622_v21, %v621_v29 }
  0x43   : > { %v859_v43 = vsel %vm2279_vm4, %v621_v29, %v772_v30  ;;  %v498_v44 = vshrl.u32 %v473_v31, 16  ;;  %v626_v45 = vshrl.u32 %v585_v34, 16  ;;  %v629_v47 = vshll.u32 %v585_v34, 16  ;;  %v2161_v30 = vld [vmem:[%s2243_s23 + $0x58] sm:$0xff]  }
  0x44   : > { %v1034_v48 = vrot.slane %v1032_v38, 1  ;;  %v2373_v49 = vsel %vm2279_vm4, %v495_v9, %v624_v41  ;;  %v1140_v42 = vrot.slane %v859_v43, 1  ;;  %v774_v50 = vshll.u32 %v745_v35, 16 }
  0x45   : > { %v1139_v51 = vrot.slane %v2373_v49, 1  ;;  %v628_v54 = vrot.slane %v626_v45, 7  ;;  %v402_v55 = vmax.f32 %v370_v27, 0.0  ;;  %v433_v56 = vpack.c.bf16 %v401_v36, %v401_v36 }
  0x46   : > { %v1035_v57 = vor.u32 %v1034_v48, %v1030_v37  ;;  %v776_v46 = vrot.slane %v774_v50, 3  ;;  %v910_v58 = vshrl.u32 %v2373_v49, 16  ;;  %v912_v59 = vshll.u32 %v2373_v49, 16 }
  0x47   : > { %v1141_v60 = vsel %vm1129_vm2, %v1139_v51, %v1140_v42  ;;  %v631_v52 = vor.u32 %v629_v47, %v628_v54  ;;  %v434_v53 = vpack.c.bf16 %v402_v55, %v402_v55  ;;  %v467_v61 = vunpack.c.l.b16 %v433_v56 }
  0x48   : > { %v1040_v62 = vsel %vm872_vm3, %v1035_v57, %v1039_v39  ;;  %1184 = vrot.lane.b32.xlu1 %v1141_v60, %s2195_s29  ;;  %v2383_v63 = vsel %vm2279_vm4, %v628_v54, %v776_v46  ;;  %v914_v1 = vrot.slane %v912_v59, 1  ;;  %v917_v2 = vshll.u32 %v859_v43, 16 }
  0x49   : > { %1091 = vrot.lane.b32.xlu0 %v1040_v62, %s2194_s28  ;;  %v2388_v3 = vsel %vm2279_vm4, %v498_v44, %v631_v52  ;;  %v929_v4 = vshll.u32 %v2383_v63, 16  ;;  %v483_v7 = vpack.c.b16 %v467_v61, %v467_v61  ;;  %v579_v8 = vunpack.c.l.b16 %v434_v53 }
  0x4a   : > { %v922_v9 = vshrl.u32 %v2388_v3, 16  ;;  %v924_v10 = vshll.u32 %v2388_v3, 16  ;;  %v915_v11 = vor.u32 %v914_v1, %v910_v58  ;;  %v919_v13 = vrot.slane %v917_v2, 1 }
  0x4b   : > { %v931_v15 = vrot.slane %v929_v4, 1  ;;  %v528_v16 = vshrl.u32 %v483_v7, 16  ;;  %v595_v17 = vpack.c.b16 %v579_v8, %v467_v61  ;;  %v755_v18 = vpack.c.b16 %v579_v8, %v579_v8 }
  0x4c   : > { %v926_v21 = vrot.slane %v924_v10, 1  ;;  %v920_v22 = vsel %vm872_vm3, %v915_v11, %v919_v13  ;;  %v1169_v5 = vrot.slane %v2365_v33, 1  ;;  %v1170_v23 = vrot.slane %v2359_v24, 1 }
  0x4d   : > { %v696_v26 = vshrl.u32 %v595_v17, 16  ;;  %v699_v27 = vshll.u32 %v595_v17, 16  ;;  %v814_v28 = vshll.u32 %v755_v18, 16  ;;  %1071 = vrot.lane.b32.xlu2 %v920_v22, %s2194_s28  ;;  %v2109_v29 = vunpack.c.l.bf16 %v2155_v14 }
  0x4e   : > { %v927_v31 = vor.u32 %v926_v21, %v922_v9  ;;  %v1171_v34 = vsel %vm1129_vm2, %v1169_v5, %v1170_v23  ;;  %v2110_v35 = vunpack.c.h.bf16 %v2155_v14  ;;  %v2149_v36 = vunpack.c.l.bf16 %v2165_v20 }
  0x4f   : > { %v698_v37 = vrot.slane %v696_v26, 7  ;;  %v816_v38 = vrot.slane %v814_v28, 3  ;;  %v316_v39 = vmul.f32 %v2248_v0, %v2109_v29  ;;  %v2150_v41 = vunpack.c.h.bf16 %v2165_v20  ;;  %v2156_v20 = vld [vmem:[%s2243_s23 + $0x30] sm:$0xff]  }
  0x50   : > { %v932_v43 = vsel %vm872_vm3, %v927_v31, %v931_v15  ;;  %v317_v24 = vmul.f32 %v2248_v0, %v2110_v35  ;;  %v336_v44 = vmul.f32 %v2248_v0, %v2149_v36  ;;  %v2133_v45 = vunpack.c.l.bf16 %v2161_v30 }
  0x51   : > { %1073 = vrot.lane.b32.xlu0 %v932_v43, %s2194_s28  ;;  %v701_v47 = vor.u32 %v699_v27, %v698_v37  ;;  %v870_v48 = vsel %vm2279_vm4, %v698_v37, %v816_v38  ;;  %v351_v42 = vadd.f32 %v2256_v6, %v316_v39  ;;  %v337_v50 = vmul.f32 %v2248_v0, %v2150_v41 }
  0x52   : > { %v1049_v51 = vshll.u32 %v870_v48, 16  ;;  %v1173_v54 = vrot.slane %v870_v48, 1  ;;  %v352_v55 = vadd.f32 %v2256_v6, %v317_v24  ;;  %v371_v56 = vadd.f32 %v2256_v6, %v336_v44 }
  0x53   : > { %v2414_v57 = vsel %vm2279_vm4, %v528_v16, %v701_v47  ;;  %v383_v46 = vmax.f32 %v351_v42, 0.0  ;;  %v372_v58 = vadd.f32 %v2256_v6, %v337_v50  ;;  %v1142_v59 = vrot.slane %v2388_v3, 1 }
  0x54   : > { %v1042_v60 = vshrl.u32 %v2414_v57, 16  ;;  %v1044_v52 = vshll.u32 %v2414_v57, 16  ;;  %v1051_v53 = vrot.slane %v1049_v51, 1  ;;  %v1172_v61 = vrot.slane %v2414_v57, 1 }
  0x55   : > { %1204 = vrot.lane.b32.xlu2 %v1171_v34, %s2195_s29  ;;  %v384_v62 = vmax.f32 %v352_v55, 0.0  ;;  %v415_v1 = vpack.c.bf16 %v383_v46, %v383_v46  ;;  %v403_v2 = vmax.f32 %v371_v56, 0.0  ;;  %v404_v4 = vmax.f32 %v372_v58, 0.0 }
  0x56   : > { %v1046_v7 = vrot.slane %v1044_v52, 1  ;;  %v1174_v8 = vsel %vm1129_vm2, %v1172_v61, %v1173_v54  ;;  %v1143_v9 = vrot.slane %v2383_v63, 1  ;;  %v2134_v10 = vunpack.c.h.bf16 %v2161_v30 }
  0x57   : > { %v416_v11 = vpack.c.bf16 %v384_v62, %v384_v62  ;;  %v458_v13 = vunpack.c.l.b16 %v415_v1  ;;  %v435_v14 = vpack.c.bf16 %v403_v2, %v403_v2  ;;  %v436_v15 = vpack.c.bf16 %v404_v4, %v404_v4 }
  0x58   : > { %v1047_v16 = vor.u32 %v1046_v7, %v1042_v60  ;;  %v328_v17 = vmul.f32 %v2248_v0, %v2133_v45  ;;  %v329_v18 = vmul.f32 %v2248_v0, %v2134_v10  ;;  %v1144_v63 = vsel %vm1129_vm2, %v1142_v59, %v1143_v9 }
  0x59   : > { %1206 = vrot.lane.b32.xlu0 %v1174_v8, %s2195_s29  ;;  %v474_v21 = vpack.c.b16 %v458_v13, %v458_v13  ;;  %v570_v22 = vunpack.c.l.b16 %v416_v11  ;;  %v468_v5 = vunpack.c.l.b16 %v435_v14  ;;  %v580_v23 = vunpack.c.l.b16 %v436_v15 }
  0x5a   : > { %v1052_v26 = vsel %vm872_vm3, %v1047_v16, %v1051_v53  ;;  %v363_v27 = vadd.f32 %v2256_v6, %v328_v17  ;;  %v364_v28 = vadd.f32 %v2256_v6, %v329_v18  ;;  %v2113_v34 = vunpack.c.l.bf16 %v2156_v20 }
  0x5b   : > { %1093 = vrot.lane.b32.xlu1 %v1052_v26, %s2194_s28  ;;  %v586_v29 = vpack.c.b16 %v570_v22, %v458_v13  ;;  %v746_v30 = vpack.c.b16 %v570_v22, %v570_v22  ;;  %v484_v31 = vpack.c.b16 %v468_v5, %v468_v5  ;;  %v596_v35 = vpack.c.b16 %v580_v23, %v468_v5 }
  0x5c   : > { %v756_v36 = vpack.c.b16 %v580_v23, %v580_v23  ;;  %v395_v37 = vmax.f32 %v363_v27, 0.0  ;;  %v396_v38 = vmax.f32 %v364_v28, 0.0  ;;  %v501_v39 = vshrl.u32 %v474_v21, 16  ;;  %v2157_v28 = vld [vmem:[%s2243_s23 + $0x38] sm:$0xff]  }
  0x5d   : > { %v633_v41 = vshrl.u32 %v586_v29, 16  ;;  %v636_v43 = vshll.u32 %v586_v29, 16  ;;  %v778_v24 = vshll.u32 %v746_v30, 16  ;;  %1186 = vrot.lane.b32.xlu2 %v1144_v63, %s2195_s29  ;;  %v703_v44 = vshrl.u32 %v596_v35, 16 }
  0x5e   : > { %v706_v45 = vshll.u32 %v596_v35, 16  ;;  %v818_v47 = vshll.u32 %v756_v36, 16  ;;  %v427_v48 = vpack.c.bf16 %v395_v37, %v395_v37  ;;  %v428_v51 = vpack.c.bf16 %v396_v38, %v396_v38 }
  0x5f   : > { %v635_v42 = vrot.slane %v633_v41, 7  ;;  %v780_v50 = vrot.slane %v778_v24, 3  ;;  %v2114_v54 = vunpack.c.h.bf16 %v2156_v20  ;;  %v531_v55 = vshrl.u32 %v484_v31, 16 }
  0x60   : > { %v705_v56 = vrot.slane %v703_v44, 7  ;;  %v820_v46 = vrot.slane %v818_v47, 3  ;;  %v464_v58 = vunpack.c.l.b16 %v427_v48  ;;  %v576_v52 = vunpack.c.l.b16 %v428_v51 }
  0x61   : > { %v638_v59 = vor.u32 %v636_v43, %v635_v42  ;;  %v861_v60 = vsel %vm2279_vm4, %v635_v42, %v780_v50  ;;  %v318_v53 = vmul.f32 %v2248_v0, %v2113_v34  ;;  %v319_v2 = vmul.f32 %v2248_v0, %v2114_v54 }
  0x62   : > { %v941_v61 = vshll.u32 %v861_v60, 16  ;;  %v708_v62 = vor.u32 %v706_v45, %v705_v56  ;;  %v871_v1 = vsel %vm2279_vm4, %v705_v56, %v820_v46  ;;  %v1146_v7 = vrot.slane %v861_v60, 1 }
  0x63   : > { %v2442_v4 = vsel %vm2279_vm4, %v501_v39, %v638_v59  ;;  %v480_v8 = vpack.c.b16 %v464_v58, %v464_v58  ;;  %v592_v9 = vpack.c.b16 %v576_v52, %v464_v58  ;;  %v1176_v14 = vrot.slane %v871_v1, 1 }
  0x64   : > { %v934_v10 = vshrl.u32 %v2442_v4, 16  ;;  %v936_v11 = vshll.u32 %v2442_v4, 16  ;;  %v2448_v13 = vsel %vm2279_vm4, %v531_v55, %v708_v62  ;;  %v943_v15 = vrot.slane %v941_v61, 1 }
  0x65   : > { %v1175_v16 = vrot.slane %v2448_v13, 1  ;;  %v1145_v17 = vrot.slane %v2442_v4, 1  ;;  %v675_v18 = vshrl.u32 %v592_v9, 16  ;;  %v678_v21 = vshll.u32 %v592_v9, 16 }
  0x66   : > { %v938_v20 = vrot.slane %v936_v11, 1  ;;  %v752_v22 = vpack.c.b16 %v576_v52, %v576_v52  ;;  %v353_v5 = vadd.f32 %v2256_v6, %v318_v53  ;;  %v519_v26 = vshrl.u32 %v480_v8, 16 }
  0x67   : > { %v1147_v23 = vsel %vm1129_vm2, %v1145_v17, %v1146_v7  ;;  %v677_v63 = vrot.slane %v675_v18, 7  ;;  %v354_v27 = vadd.f32 %v2256_v6, %v319_v2  ;;  %v1054_v34 = vshrl.u32 %v2448_v13, 16 }
  0x68   : > { %v939_v29 = vor.u32 %v938_v20, %v934_v10  ;;  %1188 = vrot.lane.b32.xlu0 %v1147_v23, %s2195_s29  ;;  %v802_v30 = vshll.u32 %v752_v22, 16  ;;  %v385_v31 = vmax.f32 %v353_v5, 0.0  ;;  %v1056_v37 = vshll.u32 %v2448_v13, 16 }
  0x69   : > { %v680_v35 = vor.u32 %v678_v21, %v677_v63  ;;  %v386_v36 = vmax.f32 %v354_v27, 0.0  ;;  %v1061_v38 = vshll.u32 %v871_v1, 16  ;;  %v2117_v24 = vunpack.c.l.bf16 %v2157_v28  ;;  %v2158_v21 = vld [vmem:[%s2243_s23 + $0x40] sm:$0xff]  }
  0x6a   : > { %v944_v39 = vsel %vm872_vm3, %v939_v29, %v943_v15  ;;  %v804_v41 = vrot.slane %v802_v30, 3  ;;  %v417_v43 = vpack.c.bf16 %v385_v31, %v385_v31  ;;  %v1058_v47 = vrot.slane %v1056_v37, 1 }
  0x6b   : > { %1075 = vrot.lane.b32.xlu1 %v944_v39, %s2194_s28  ;;  %v2463_v44 = vsel %vm2279_vm4, %v519_v26, %v680_v35  ;;  %v418_v45 = vpack.c.bf16 %v386_v36, %v386_v36  ;;  %v1063_v48 = vrot.slane %v1061_v38, 1  ;;  %v2118_v58 = vunpack.c.h.bf16 %v2157_v28 }
  0x6c   : > { %v2467_v42 = vsel %vm2279_vm4, %v677_v63, %v804_v41  ;;  %v1006_v50 = vshrl.u32 %v2463_v44, 16  ;;  %v1008_v51 = vshll.u32 %v2463_v44, 16  ;;  %v459_v54 = vunpack.c.l.b16 %v417_v43 }
  0x6d   : > { %v1013_v55 = vshll.u32 %v2467_v42, 16  ;;  %v571_v56 = vunpack.c.l.b16 %v418_v45  ;;  %v1059_v46 = vor.u32 %v1058_v47, %v1054_v34  ;;  %v320_v52 = vmul.f32 %v2248_v0, %v2117_v24 }
  0x6e   : > { %v1010_v59 = vrot.slane %v1008_v51, 1  ;;  %v475_v60 = vpack.c.b16 %v459_v54, %v459_v54  ;;  %v1177_v2 = vsel %vm1129_vm2, %v1175_v16, %v1176_v14  ;;  %v321_v8 = vmul.f32 %v2248_v0, %v2118_v58 }
  0x6f   : > { %v1015_v53 = vrot.slane %v1013_v55, 1  ;;  %v587_v61 = vpack.c.b16 %v571_v56, %v459_v54  ;;  %v747_v62 = vpack.c.b16 %v571_v56, %v571_v56  ;;  %v1064_v1 = vsel %vm872_vm3, %v1059_v46, %v1063_v48 }
  0x70   : > { %v1011_v7 = vor.u32 %v1010_v59, %v1006_v50  ;;  %1095 = vrot.lane.b32.xlu2 %v1064_v1, %s2194_s28  ;;  %v355_v9 = vadd.f32 %v2256_v6, %v320_v52  ;;  %v356_v18 = vadd.f32 %v2256_v6, %v321_v8  ;;  %v504_v14 = vshrl.u32 %v475_v60, 16 }
  0x71   : > { %v640_v10 = vshrl.u32 %v587_v61, 16  ;;  %v643_v11 = vshll.u32 %v587_v61, 16  ;;  %v782_v15 = vshll.u32 %v747_v62, 16  ;;  %v2121_v5 = vunpack.c.l.bf16 %v2158_v21  ;;  %v2159_v62 = vld [vmem:[%s2243_s23 + $0x48] sm:$0xff]  }
  0x72   : > { %v1016_v17 = vsel %vm872_vm3, %v1011_v7, %v1015_v53  ;;  %v387_v20 = vmax.f32 %v355_v9, 0.0  ;;  %v388_v23 = vmax.f32 %v356_v18, 0.0  ;;  %v2122_v63 = vunpack.c.h.bf16 %v2158_v21 }
  0x73   : > { %1208 = vrot.lane.b32.xlu1 %v1177_v2, %s2195_s29  ;;  %1087 = vrot.lane.b32.xlu0 %v1016_v17, %s2194_s28  ;;  %v642_v16 = vrot.slane %v640_v10, 7  ;;  %v784_v22 = vrot.slane %v782_v15, 3  ;;  %v322_v29 = vmul.f32 %v2248_v0, %v2121_v5  ;;  %v1163_v24 = vrot.slane %v2463_v44, 1  ;;  %v2085_v15 = vld [vmem:[%s3138_s3 + $0x8] sm:$0x30] }
  0x74   : > { %v419_v26 = vpack.c.bf16 %v387_v20, %v387_v20  ;;  %v420_v34 = vpack.c.bf16 %v388_v23, %v388_v23  ;;  %v323_v37 = vmul.f32 %v2248_v0, %v2122_v63  ;;  %v1164_v47 = vrot.slane %v2467_v42, 1  ;;  %v2040_v23 = vld [vmem:[%s3138_s3] sm:$0xf]  ;;  %v2062_v63 = vld [vmem:[%s3138_s3 + $0x10] sm:$0xf] }
  0x75   : > { %v645_v27 = vor.u32 %v643_v11, %v642_v16  ;;  %v862_v28 = vsel %vm2279_vm4, %v642_v16, %v784_v22  ;;  %v357_v38 = vadd.f32 %v2256_v6, %v322_v29  ;;  %v2020_v11 = vld [vmem:[%s3138_s3 + $0x8] sm:$0xf]  ;;  %v2125_v17 = vunpack.c.l.bf16 %v2159_v62 }
  0x76   : > { %v1149_v30 = vrot.slane %v862_v28, 1  ;;  %v953_v31 = vshll.u32 %v862_v28, 16  ;;  %v460_v36 = vunpack.c.l.b16 %v419_v26  ;;  %v572_v45 = vunpack.c.l.b16 %v420_v34  ;;  %v2084_v26 = vld [vmem:[%s3138_s3] sm:$0x30] }
  0x77   : > { %v2488_v35 = vsel %vm2279_vm4, %v504_v14, %v645_v27  ;;  %v358_v48 = vadd.f32 %v2256_v6, %v323_v37  ;;  %v389_v50 = vmax.f32 %v357_v38, 0.0  ;;  %v1165_v2 = vsel %vm1129_vm2, %v1163_v24, %v1164_v47 }
  0x78   : > { %v1148_v39 = vrot.slane %v2488_v35, 1  ;;  %v946_v41 = vshrl.u32 %v2488_v35, 16  ;;  %v948_v43 = vshll.u32 %v2488_v35, 16  ;;  %v955_v54 = vrot.slane %v953_v31, 1  ;;  %v2086_v31 = vld [vmem:[%s3138_s3 + $0x10] sm:$0x30] }
  0x79   : > { %v476_v55 = vpack.c.b16 %v460_v36, %v460_v36  ;;  %v588_v56 = vpack.c.b16 %v572_v45, %v460_v36  ;;  %v748_v46 = vpack.c.b16 %v572_v45, %v572_v45  ;;  %v390_v58 = vmax.f32 %v358_v48, 0.0 }
  0x7a   : > { %v1150_v51 = vsel %vm1129_vm2, %v1148_v39, %v1149_v30  ;;  %v950_v0 = vrot.slane %v948_v43, 1  ;;  %v421_v60 = vpack.c.bf16 %v389_v50, %v389_v50  ;;  %v2021_v20 = vor.u32 %v2085_v15, %v2020_v11  ;;  %v2160_v11 = vld [vmem:[%s2243_s23 + $0x50] sm:$0xff]  }
  0x7b   : > { %1190 = vrot.lane.b32.xlu1 %v1150_v51, %s2195_s29  ;;  %v647_v52 = vshrl.u32 %v588_v56, 16  ;;  %v650_v53 = vshll.u32 %v588_v56, 16  ;;  %v786_v61 = vshll.u32 %v748_v46, 16  ;;  %v422_v42 = vpack.c.bf16 %v390_v58, %v390_v58 }
  0x7c   : > { %v951_v59 = vor.u32 %v950_v0, %v946_v41  ;;  %v507_v1 = vshrl.u32 %v476_v55, 16  ;;  %v461_v7 = vunpack.c.l.b16 %v421_v60  ;;  %v2126_v21 = vunpack.c.h.bf16 %v2159_v62 }
  0x7d   : > { %v649_v8 = vrot.slane %v647_v52, 7  ;;  %v788_v9 = vrot.slane %v786_v61, 3  ;;  %v573_v10 = vunpack.c.l.b16 %v422_v42  ;;  %v1321_v30 = vsel %vm1319_vm5, %v2021_v20, 0  ;;  %v2185_v52 = vld [vmem:[%s3137_s2] ss:$0 sm:$0xff] }
  0x7e   : > { %v956_v6 = vsel %vm872_vm3, %v951_v59, %v955_v54  ;;  %v477_v18 = vpack.c.b16 %v461_v7, %v461_v7  ;;  %1330 = vmatpush.bf16.msra.mxu0 %v1321_v30  ;;  %2166 = vmatpush.bf16.msra.mxu3 %v1321_v30  ;;  %v2041_v48 = vor.u32 %v2084_v26, %v2040_v23  ;;  %v2184_v54 = vld [vmem:[%s3136_s1] ss:$0 sm:$0xff] }
  0x7f   : > { %1077 = vrot.lane.b32.xlu2 %v956_v6, %s2194_s28  ;;  %v652_v14 = vor.u32 %v650_v53, %v649_v8  ;;  %v863_v16 = vsel %vm2279_vm4, %v649_v8, %v788_v9  ;;  %v589_v22 = vpack.c.b16 %v573_v10, %v461_v7  ;;  %v749_v5 = vpack.c.b16 %v573_v10, %v573_v10 }
  0x80   : > { %v965_v27 = vshll.u32 %v863_v16, 16  ;;  %v1152_v28 = vrot.slane %v863_v16, 1  ;;  %v510_v29 = vshrl.u32 %v477_v18, 16  ;;  %v2063_v50 = vor.u32 %v2086_v31, %v2062_v63 }
  0x81   : > { %v2527_v34 = vsel %vm2279_vm4, %v507_v1, %v652_v14  ;;  %v654_v36 = vshrl.u32 %v589_v22, 16  ;;  %v657_v37 = vshll.u32 %v589_v22, 16  ;;  %v790_v38 = vshll.u32 %v749_v5, 16 }
  0x82   : > { %v958_v39 = vshrl.u32 %v2527_v34, 16  ;;  %v960_v41 = vshll.u32 %v2527_v34, 16  ;;  %v967_v43 = vrot.slane %v965_v27, 1  ;;  %v1151_v24 = vrot.slane %v2527_v34, 1 }
  0x83   : > { %v656_v45 = vrot.slane %v654_v36, 7  ;;  %v792_v47 = vrot.slane %v790_v38, 3  ;;  %v324_v55 = vmul.f32 %v2184_v54, %v2125_v17  ;;  %v325_v56 = vmul.f32 %v2184_v54, %v2126_v21 }
  0x84   : > { %v962_v51 = vrot.slane %v960_v41, 1  ;;  %v1153_v0 = vsel %vm1129_vm2, %v1151_v24, %v1152_v28  ;;  %v1418_v58 = vsel %vm1319_vm5, %v2041_v48, 0  ;;  %v2540_v59 = vsel %vm1319_vm5, %v2063_v50, 0 }
  0x85   : > { %1192 = vrot.lane.b32.xlu1 %v1153_v0, %s2195_s29  ;;  %v659_v46 = vor.u32 %v657_v37, %v656_v45  ;;  %1427 = vmatpush.bf16.msra.mxu1 %v1418_v58  ;;  %v359_v53 = vadd.f32 %v2185_v52, %v324_v55  ;;  %v864_v42 = vsel %vm2279_vm4, %v656_v45, %v792_v47  ;;  %v2129_v17 = vunpack.c.l.bf16 %v2160_v11 }
  0x86   : > { %v963_v60 = vor.u32 %v962_v51, %v958_v39  ;;  %1527 = vmatpush.bf16.msra.mxu2 %v2540_v59  ;;  %v360_v62 = vadd.f32 %v2185_v52, %v325_v56  ;;  %2167 = vmatpush.bf16.msrb.mxu3 %v1418_v58  ;;  %v1155_v8 = vrot.slane %v864_v42, 1  ;;  %v2130_v18 = vunpack.c.h.bf16 %v2160_v11 }
  0x87   : > { %1200 = vrot.lane.b32.xlu2 %v1165_v2, %s2195_s29  ;;  %v2548_v61 = vsel %vm2279_vm4, %v510_v29, %v659_v46  ;;  %v391_v1 = vmax.f32 %v359_v53, 0.0  ;;  %v326_v14 = vmul.f32 %v2184_v54, %v2129_v17  ;;  %v977_v50 = vshll.u32 %v864_v42, 16 }
  0x88   : > { %v968_v6 = vsel %vm872_vm3, %v963_v60, %v967_v43  ;;  %v392_v2 = vmax.f32 %v360_v62, 0.0  ;;  %v1154_v7 = vrot.slane %v2548_v61, 1  ;;  %v327_v16 = vmul.f32 %v2184_v54, %v2130_v18 }
  0x89   : > { %1079 = vrot.lane.b32.xlu0 %v968_v6, %s2194_s28  ;;  %v423_v9 = vpack.c.bf16 %v391_v1, %v391_v1  ;;  %v361_v26 = vadd.f32 %v2185_v52, %v326_v14  ;;  %v970_v47 = vshrl.u32 %v2548_v61, 16  ;;  %v972_v48 = vshll.u32 %v2548_v61, 16 }
  0x8a   : > { %v424_v10 = vpack.c.bf16 %v392_v2, %v392_v2  ;;  %v1156_v21 = vsel %vm1129_vm2, %v1154_v7, %v1155_v8  ;;  %v362_v63 = vadd.f32 %v2185_v52, %v327_v16  ;;  %v979_v58 = vrot.slane %v977_v50, 1 }
  0x8b   : > { %v462_v15 = vunpack.c.l.b16 %v423_v9  ;;  %v393_v30 = vmax.f32 %v361_v26, 0.0  ;;  %v974_v46 = vrot.slane %v972_v48, 1  ;;  %v1070_v52 = vpop.permute.xlu2 %1069 }
  0x8c   : > { %v574_v20 = vunpack.c.l.b16 %v424_v10  ;;  %v394_v31 = vmax.f32 %v362_v63, 0.0 }
  0x8d   : > { %v478_v22 = vpack.c.b16 %v462_v15, %v462_v15  ;;  %v425_v39 = vpack.c.bf16 %v393_v30, %v393_v30  ;;  %v975_v6 = vor.u32 %v974_v46, %v970_v47 }
  0x8e   : > { %v590_v5 = vpack.c.b16 %v574_v20, %v462_v15  ;;  %v750_v23 = vpack.c.b16 %v574_v20, %v574_v20  ;;  %v426_v41 = vpack.c.bf16 %v394_v31, %v394_v31 }
  0x8f   : > { %v513_v36 = vshrl.u32 %v478_v22, 16  ;;  %v463_v0 = vunpack.c.l.b16 %v425_v39  ;;  %v980_v8 = vsel %vm872_vm3, %v975_v6, %v979_v58 }
  0x90   : > { %v661_v27 = vshrl.u32 %v590_v5, 16  ;;  %v664_v28 = vshll.u32 %v590_v5, 16  ;;  %v794_v29 = vshll.u32 %v750_v23, 16  ;;  %v575_v54 = vunpack.c.l.b16 %v426_v41  ;;  %1081 = vrot.lane.b32.xlu2 %v980_v8, %s2194_s28 }
  0x91   : > { %1194 = vrot.lane.b32.xlu0 %v1156_v21, %s2195_s29  ;;  %v479_v9 = vpack.c.b16 %v463_v0, %v463_v0 }
  0x92   : > { %v663_v37 = vrot.slane %v661_v27, 7  ;;  %v796_v38 = vrot.slane %v794_v29, 3  ;;  %v591_v60 = vpack.c.b16 %v575_v54, %v463_v0  ;;  %v751_v15 = vpack.c.b16 %v575_v54, %v575_v54 }
  0x93   : > { %v516_v18 = vshrl.u32 %v479_v9, 16  ;;  %v1090_v31 = vpop.permute.xlu2 %1089 }
  0x94   : > { %v666_v43 = vor.u32 %v664_v28, %v663_v37  ;;  %v2560_v24 = vsel %vm2279_vm4, %v663_v37, %v796_v38  ;;  %v668_v2 = vshrl.u32 %v591_v60, 16  ;;  %v671_v11 = vshll.u32 %v591_v60, 16 }
  0x95   : > { %v989_v45 = vshll.u32 %v2560_v24, 16  ;;  %v798_v21 = vshll.u32 %v751_v15, 16  ;;  %v1236_v48 = vsel %vm1210_vm6, %v2330_v19, %v1090_v31 }
  0x96   : > { %v2567_v51 = vsel %vm2279_vm4, %v513_v36, %v666_v43  ;;  %v670_v10 = vrot.slane %v668_v2, 7  ;;  %v1158_v43 = vrot.slane %v2560_v24, 1  ;;  %v1216_v24 = vsel %vm1210_vm6, %v2303_v40, %v1070_v52 }
  0x97   : > { %v982_v55 = vshrl.u32 %v2567_v51, 16  ;;  %v984_v56 = vshll.u32 %v2567_v51, 16  ;;  %v991_v62 = vrot.slane %v989_v45, 1  ;;  %v800_v14 = vrot.slane %v798_v21, 3 }
  0x98   : > { %v673_v20 = vor.u32 %v671_v11, %v670_v10  ;;  %v1157_v41 = vrot.slane %v2567_v51, 1 }
  0x99   : > { %v986_v53 = vrot.slane %v984_v56, 1  ;;  %v866_v28 = vsel %vm2279_vm4, %v670_v10, %v800_v14 }
  0x9a   : > { %v2577_v16 = vsel %vm2279_vm4, %v516_v18, %v673_v20  ;;  %v1001_v37 = vshll.u32 %v866_v28, 16  ;;  %v1161_v38 = vrot.slane %v866_v28, 1  ;;  %v1159_v47 = vsel %vm1129_vm2, %v1157_v41, %v1158_v43 }
  0x9b   : > { %v987_v7 = vor.u32 %v986_v53, %v982_v55  ;;  %v994_v22 = vshrl.u32 %v2577_v16, 16  ;;  %v996_v5 = vshll.u32 %v2577_v16, 16  ;;  %v1160_v23 = vrot.slane %v2577_v16, 1  ;;  %1196 = vrot.lane.b32.xlu2 %v1159_v47, %s2195_s29 }
  0x9d   : > { %v1066_v1 = vpop.permute.xlu0 %1065  ;;  %v992_v17 = vsel %vm872_vm3, %v987_v7, %v991_v62  ;;  %v998_v36 = vrot.slane %v996_v5, 1  ;;  %v1162_v12 = vsel %vm1129_vm2, %v1160_v23, %v1161_v38 }
  0x9e   : > { %v1068_v42 = vpop.permute.xlu1 %1067  ;;  %1083 = vrot.lane.b32.xlu1 %v992_v17, %s2194_s28  ;;  %v1212_v26 = vsel %vm1210_vm6, %v2289_v25, %v1066_v1 }
  0x9f   : > { %v1214_v63 = vsel %vm1210_vm6, %v2295_v32, %v1068_v42  ;;  %v999_v25 = vor.u32 %v998_v36, %v994_v22  ;;  %v1003_v32 = vrot.slane %v1001_v37, 1 }
  0xa1   : > { %v1004_v45 = vsel %vm872_vm3, %v999_v25, %v1003_v32 }
  0xa2   : > { %1085 = vrot.lane.b32.xlu0 %v1004_v45, %s2194_s28 }
  0xa5   : > { %v1179_v27 = vpop.permute.xlu0 %1178 }
  0xa6   : > { %v1245_v29 = vsel %vm1243_vm7, %v1212_v26, %v1179_v27  ;;  %v1181_v30 = vpop.permute.xlu1 %1180  ;;  %1198 = vrot.lane.b32.xlu1 %v1162_v12, %s2195_s29  ;;  %s235_s29 = scalar_lea.vmem %s3140_s5, %s2015_s20 }
  0xa7   : > { %v1247_v39 = vsel %vm1243_vm7, %v1214_v63, %v1181_v30  ;;  %2042 = vmatmul.msk.bf16.vlgmr.msra.gmra.mxu1 %vm1286_vm8, %v1245_v29  ;;  %2064 = vmatmul.msk.bf16.vlgmr.msra.gmra.mxu2 %vm1286_vm8, %v1245_v29  ;;  %v1072_v54 = vpop.permute.xlu2 %1071 }
  0xa8   : > { %2022 = vmatmul.msk.bf16.vlgmr.msra.gmra.mxu0 %vm1286_vm8, %v1247_v39  ;;  %v1218_v40 = vsel %vm1210_vm6, %v2373_v49, %v1072_v54 }
  0xad   : > { %v1183_v55 = vpop.permute.xlu0 %1182 }
  0xae   : > { %v1203_v50 = vpop.permute.xlu1 %1202  ;;  %v1249_v56 = vsel %vm1243_vm7, %v1216_v24, %v1183_v55 }
  0xaf   : > { %v2604_v0 = vsel %vm1243_vm7, %v1236_v48, %v1203_v50  ;;  %v1205_v19 = vpop.permute.xlu2 %1204 }
  0xb0   : > { %2034 = vmatmul.msk.bf16.vlgmr.msra.gmra.mxu3 %vm1286_vm8, %v2604_v0 }
  0xb1   : > { %2168 = vmatpush.bf16.msra.mxu3 %v2540_v59 }
  0xb7   : > { %2043 = vmatmul.msk.bf16.gmra.mxu1 %vm1286_vm8, %v1247_v39  ;;  %2065 = vmatmul.msk.bf16.gmra.mxu2 %vm1286_vm8, %v1249_v56  ;;  %v1187_v2 = vpop.permute.xlu2 %1186 }
  0xb8   : > { %2023 = vmatmul.msk.bf16.gmra.mxu0 %vm1286_vm8, %v1245_v29 }
  0xba   : > { %v1185_v59 = vpop.permute.xlu1 %1184 }
  0xbb   : > { %v1092_v46 = vpop.permute.xlu0 %1091  ;;  %v1251_v53 = vsel %vm1243_vm7, %v1218_v40, %v1185_v59 }
  0xbc   : > { %v1238_v58 = vsel %vm1210_vm6, %v2365_v33, %v1092_v46 }
  0xbd   : > { %v2618_v60 = vsel %vm1243_vm7, %v1238_v58, %v1205_v19 }
  0xc0   : > { %2035 = vmatmul.msk.bf16.gmra.mxu3 %vm1286_vm8, %v2618_v60 }
  0xc3   : > { %v1074_v52 = vpop.permute.xlu0 %1073 }
  0xc4   : > { %v1220_v49 = vsel %vm1210_vm6, %v2388_v3, %v1074_v52 }
  0xc5   : > { %v1253_v42 = vsel %vm1243_vm7, %v1220_v49, %v1187_v2 }
  0xc7   : > { %2044 = vmatmul.msk.bf16.gmra.mxu1 %vm1286_vm8, %v1245_v29  ;;  %2066 = vmatmul.msk.bf16.gmra.mxu2 %vm1286_vm8, %v1251_v53 }
  0xc8   : > { %2024 = vmatmul.msk.bf16.gmra.mxu0 %vm1286_vm8, %v1249_v56 }
  0xcb   : > { %v1207_v33 = vpop.permute.xlu0 %1206 }
  0xcd   : > { %v1094_v62 = vpop.permute.xlu1 %1093 }
  0xce   : > { %v1240_v6 = vsel %vm1210_vm6, %v2414_v57, %v1094_v62  ;;  %v1096_v57 = vpop.permute.xlu2 %1095 }
  0xcf   : > { %v2631_v1 = vsel %vm1243_vm7, %v1240_v6, %v1207_v33  ;;  %v1242_v8 = vsel %vm1210_vm6, %v2448_v13, %v1096_v57 }
  0xd0   : > { %2036 = vmatmul.msk.bf16.gmra.mxu3 %vm1286_vm8, %v2631_v1 }
  0xd7   : > { %2045 = vmatmul.msk.bf16.gmra.mxu1 %vm1286_vm8, %v1249_v56  ;;  %2067 = vmatmul.msk.bf16.gmra.mxu2 %vm1286_vm8, %v1253_v42 }
  0xd8   : > { %2025 = vmatmul.msk.bf16.gmra.mxu0 %vm1286_vm8, %v1251_v53 }
  0xd9   : > { %v1078_v15 = vpop.permute.xlu2 %1077 }
  0xda   : > { %v1189_v10 = vpop.permute.xlu0 %1188  ;;  %v1224_v20 = vsel %vm1210_vm6, %v2488_v35, %v1078_v15 }
  0xdd   : > { %v1076_v7 = vpop.permute.xlu1 %1075 }
  0xde   : > { %v1222_v9 = vsel %vm1210_vm6, %v2442_v4, %v1076_v7 }
  0xdf   : > { %v1255_v17 = vsel %vm1243_vm7, %v1222_v9, %v1189_v10 }
  0xe1   : > { %v1201_v18 = vpop.permute.xlu2 %1200 }
  0xe5   : > { %v1209_v11 = vpop.permute.xlu1 %1208  ;;  %v1088_v13 = vpop.permute.xlu0 %1087 }
  0xe6   : > { %v2646_v3 = vsel %vm1243_vm7, %v1242_v8, %v1209_v11  ;;  %v1234_v4 = vsel %vm1210_vm6, %v2463_v44, %v1088_v13 }
  0xe7   : > { %2037 = vmatmul.msk.bf16.gmra.mxu3 %vm1286_vm8, %v2646_v3  ;;  %2046 = vmatmul.msk.bf16.gmra.mxu1 %vm1286_vm8, %v1251_v53  ;;  %v2659_v21 = vsel %vm1243_vm7, %v1234_v4, %v1201_v18 }
  0xe8   : > { %2026 = vmatmul.msk.bf16.gmra.mxu0 %vm1286_vm8, %v1253_v42  ;;  %2068 = vmatmul.msk.bf16.gmra.mxu2 %vm1286_vm8, %v1255_v17 }
  0xea   : > { %v1082_v26 = vpop.permute.xlu2 %1081 }
  0xeb   : > { %v1228_v63 = vsel %vm1210_vm6, %v2548_v61, %v1082_v26 }
  0xed   : > { %v1191_v14 = vpop.permute.xlu1 %1190 }
  0xee   : > { %v1257_v22 = vsel %vm1243_vm7, %v1224_v20, %v1191_v14 }
  0xf5   : > { %v1197_v30 = vpop.permute.xlu2 %1196 }
  0xf7   : > { %2054 = vmatmul.msk.bf16.vlgmr.msrb.gmra.mxu3 %vm1286_vm8, %v2659_v21  ;;  %2047 = vmatmul.msk.bf16.gmra.mxu1 %vm1286_vm8, %v1253_v42  ;;  %v1193_v35 = vpop.permute.xlu1 %1192 }
  0xf8   : > { %2027 = vmatmul.msk.bf16.gmra.mxu0 %vm1286_vm8, %v1255_v17  ;;  %2069 = vmatmul.msk.bf16.gmra.mxu2 %vm1286_vm8, %v1257_v22 }
  0xfb   : > { %v1080_v44 = vpop.permute.xlu0 %1079 }
  0xfc   : > { %v1226_v5 = vsel %vm1210_vm6, %v2527_v34, %v1080_v44 }
  0xfd   : > { %v1259_v23 = vsel %vm1243_vm7, %v1226_v5, %v1193_v35 }
 0x103   : > { %v1195_v27 = vpop.permute.xlu0 %1194 }
 0x104   : > { %v1261_v28 = vsel %vm1243_vm7, %v1228_v63, %v1195_v27 }
 0x107   : > { %2055 = vmatmul.msk.bf16.gmra.mxu3 %vm1286_vm8, %v2604_v0  ;;  %2048 = vmatmul.msk.bf16.gmra.mxu1 %vm1286_vm8, %v1255_v17 }
 0x108   : > { %2028 = vmatmul.msk.bf16.gmra.mxu0 %vm1286_vm8, %v1257_v22  ;;  %2070 = vmatmul.msk.bf16.gmra.mxu2 %vm1286_vm8, %v1259_v23 }
 0x110   : > { %v1084_v34 = vpop.permute.xlu1 %1083 }
 0x111   : > { %v1230_v29 = vsel %vm1210_vm6, %v2567_v51, %v1084_v34 }
 0x112   : > { %v1263_v36 = vsel %vm1243_vm7, %v1230_v29, %v1197_v30 }
 0x114   : > { %v1086_v12 = vpop.permute.xlu0 %1085 }
 0x115   : > { %v1232_v45 = vsel %vm1210_vm6, %v2577_v16, %v1086_v12 }
 0x117   : > { %2056 = vmatmul.msk.bf16.gmra.mxu3 %vm1286_vm8, %v2618_v60  ;;  %2049 = vmatmul.msk.bf16.gmra.mxu1 %vm1286_vm8, %v1257_v22 }
 0x118   : > { %2029 = vmatmul.msk.bf16.gmra.mxu0 %vm1286_vm8, %v1259_v23  ;;  %2071 = vmatmul.msk.bf16.gmra.mxu2 %vm1286_vm8, %v1261_v28  ;;  %v1199_v47 = vpop.permute.xlu1 %1198 }
 0x119   : > { %v1265_v56 = vsel %vm1243_vm7, %v1232_v45, %v1199_v47 }
 0x124   : > { %v1429_v31 = vpop.f32.mrf.mxu1 }
 0x125   : > { %v1332_v61 = vpop.f32.mrf.mxu0 }
 0x126   : > { %v1430_v37 = vadd.f32 %v1429_v31, %v1332_v61 }
 0x127   : > { %2057 = vmatmul.msk.bf16.gmra.mxu3 %vm1286_vm8, %v2631_v1  ;;  %2050 = vmatmul.msk.bf16.gmra.mxu1 %vm1286_vm8, %v1259_v23 }
 0x128   : > { %2030 = vmatmul.msk.bf16.gmra.mxu0 %vm1286_vm8, %v1261_v28  ;;  %2072 = vmatmul.msk.bf16.gmra.mxu2 %vm1286_vm8, %v1263_v36 }
 0x12a   : > { %v1529_v38 = vpop.f32.mrf.mxu2 }
 0x12b   : > { %v2691_v39 = vadd.f32 %v1529_v38, %v1430_v37 }
 0x12c   : > { %v1431_v51 = vpop.f32.mrf.mxu1 }
 0x12d   : > { %v1855_v25 = vpack.c.bf16 %v2691_v39, %v2691_v39  ;;  %v1334_v32 = vpop.f32.mrf.mxu0 }
 0x12e   : > { %v1432_v41 = vadd.f32 %v1431_v51, %v1334_v32 }
 0x12f   : > { %1888 = vst.msk [vmem:[%s2698_s26] sm:$0xf] %vm1887_vm9, %v1855_v25 }
 0x132   : > { %v1531_v43 = vpop.f32.mrf.mxu2 }
 0x133   : > { %v2706_v48 = vpop.f32.mrf.mxu3  ;;  %v2708_v50 = vadd.f32 %v1531_v43, %v1432_v41 }
 0x134   : > { %v1434_v54 = vpop.f32.mrf.mxu1 }
 0x135   : > { %v1856_v24 = vpack.c.bf16 %v2708_v50, %v2708_v50  ;;  %v1337_v55 = vpop.f32.mrf.mxu0 }
 0x136   : > { %v1435_v16 = vadd.f32 %v1434_v54, %v1337_v55 }
 0x137   : > { %2076 = vmatmul.msk.bf16.vlgmr.msra.gmra.mxu3 %vm1286_vm8, %v2618_v60  ;;  %1889 = vst.msk [vmem:[%s2698_s26 + $0x4] sm:$0xf] %vm1887_vm9, %v1856_v24  ;;  %2051 = vmatmul.msk.bf16.gmra.mxu1 %vm1286_vm8, %v1261_v28 }
 0x138   : > { %2031 = vmatmul.msk.bf16.gmra.mxu0 %vm1286_vm8, %v1263_v36  ;;  %2073 = vmatmul.msk.bf16.gmra.mxu2 %vm1286_vm8, %v1265_v56 }
 0x13a   : > { %v1534_v19 = vpop.f32.mrf.mxu2 }
 0x13b   : > { %v2720_v46 = vpop.f32.mrf.mxu3  ;;  %v2722_v58 = vadd.f32 %v1534_v19, %v1435_v16 }
 0x13c   : > { %v1436_v40 = vpop.f32.mrf.mxu1 }
 0x13d   : > { %v1857_v59 = vpack.c.bf16 %v2722_v58, %v2722_v58  ;;  %v1339_v60 = vpop.f32.mrf.mxu0 }
 0x13e   : > { %v1437_v52 = vadd.f32 %v1436_v40, %v1339_v60 }
 0x13f   : > { %1890 = vst.msk [vmem:[%s2698_s26 + $0x8] sm:$0xf] %vm1887_vm9, %v1857_v59 }
 0x142   : > { %v1536_v53 = vpop.f32.mrf.mxu2 }
 0x143   : > { %v2728_v33 = vpop.f32.mrf.mxu3  ;;  %v2730_v62 = vadd.f32 %v1536_v53, %v1437_v52 }
 0x144   : > { %v1439_v6 = vpop.f32.mrf.mxu1 }
 0x145   : > { %v1858_v49 = vpack.c.bf16 %v2730_v62, %v2730_v62  ;;  %v1342_v2 = vpop.f32.mrf.mxu0 }
 0x146   : > { %v1440_v42 = vadd.f32 %v1439_v6, %v1342_v2 }
 0x147   : > { %2077 = vmatmul.msk.bf16.gmra.mxu3 %vm1286_vm8, %v2631_v1  ;;  %1891 = vst.msk [vmem:[%s2698_s26 + $0xc] sm:$0xf] %vm1887_vm9, %v1858_v49  ;;  %2052 = vmatmul.msk.bf16.gmra.mxu1 %vm1286_vm8, %v1263_v36 }
 0x148   : > { %2032 = vmatmul.msk.bf16.gmra.mxu0 %vm1286_vm8, %v1265_v56  ;;  %2074 = vmatmul.msk.bf16.gmra.mxu2 %vm1286_vm8, %v2659_v21 }
 0x14a   : > { %v1539_v7 = vpop.f32.mrf.mxu2 }
 0x14b   : > { %v2742_v57 = vadd.f32 %v1539_v7, %v1440_v42  ;;  %v2744_v8 = vpop.f32.mrf.mxu3 }
 0x14c   : > { %v1441_v9 = vpop.f32.mrf.mxu1 }
 0x14d   : > { %v1859_v10 = vpack.c.bf16 %v2742_v57, %v2742_v57  ;;  %v1344_v11 = vpop.f32.mrf.mxu0 }
 0x14e   : > { %v1442_v15 = vadd.f32 %v1441_v9, %v1344_v11 }
 0x14f   : > { %1892 = vst.msk [vmem:[%s2698_s26 + $0x10] sm:$0xf] %vm1887_vm9, %v1859_v10 }
 0x152   : > { %v1541_v17 = vpop.f32.mrf.mxu2 }
 0x153   : > { %v2750_v13 = vadd.f32 %v1541_v17, %v1442_v15  ;;  %v2754_v14 = vpop.f32.mrf.mxu3 }
 0x154   : > { %v1444_v4 = vpop.f32.mrf.mxu1 }
 0x155   : > { %v1860_v18 = vpack.c.bf16 %v2750_v13, %v2750_v13  ;;  %v1347_v20 = vpop.f32.mrf.mxu0 }
 0x156   : > { %v1445_v22 = vadd.f32 %v1444_v4, %v1347_v20 }
 0x157   : > { %2078 = vmatmul.msk.bf16.gmra.mxu3 %vm1286_vm8, %v2646_v3  ;;  %1893 = vst.msk [vmem:[%s2698_s26 + $0x14] sm:$0xf] %vm1887_vm9, %v1860_v18  ;;  %2053 = vmatmul.msk.bf16.gmra.mxu1 %vm1286_vm8, %v1265_v56 }
 0x158   : > { %2033 = vmatmul.msk.bf16.gmra.mxu0 %vm1286_vm8, %v2659_v21  ;;  %2075 = vmatmul.msk.bf16.gmra.mxu2 %vm1286_vm8, %v2604_v0 }
 0x15a   : > { %v1544_v44 = vpop.f32.mrf.mxu2 }
 0x15b   : > { %v2765_v5 = vadd.f32 %v1544_v44, %v1445_v22  ;;  %v2771_v26 = vpop.f32.mrf.mxu3 }
 0x15c   : > { %v1446_v35 = vpop.f32.mrf.mxu1 }
 0x15d   : > { %v1861_v23 = vpack.c.bf16 %v2765_v5, %v2765_v5  ;;  %v1349_v3 = vpop.f32.mrf.mxu0 }
 0x15e   : > { %v1447_v63 = vadd.f32 %v1446_v35, %v1349_v3 }
 0x15f   : > { %1894 = vst.msk [vmem:[%s2698_s26 + $0x18] sm:$0xf] %vm1887_vm9, %v1861_v23 }
 0x162   : > { %v1546_v21 = vpop.f32.mrf.mxu2 }
 0x163   : > { %v2773_v27 = vadd.f32 %v1546_v21, %v1447_v63 }
 0x164   : > { %v1449_v0 = vpop.f32.mrf.mxu1 }
 0x165   : > { %v1862_v28 = vpack.c.bf16 %v2773_v27, %v2773_v27  ;;  %v1352_v34 = vpop.f32.mrf.mxu0 }
 0x166   : > { %v1450_v30 = vadd.f32 %v1449_v0, %v1352_v34 }
 0x167   : > { %2079 = vmatmul.msk.bf16.gmra.mxu3 %vm1286_vm8, %v2631_v1  ;;  %1895 = vst.msk [vmem:[%s2698_s26 + $0x1c] sm:$0xf] %vm1887_vm9, %v1862_v28 }
 0x16a   : > { %v2781_v29 = vpop.f32.mrf.mxu3 }
 0x16b   : > { %v1549_v31 = vpop.f32.mrf.mxu2 }
 0x16c   : > { %v2783_v61 = vadd.f32 %v1549_v31, %v1450_v30  ;;  %v1451_v36 = vpop.f32.mrf.mxu1 }
 0x16d   : > { %v1354_v37 = vpop.f32.mrf.mxu0 }
 0x16e   : > { %v1863_v38 = vpack.c.bf16 %v2783_v61, %v2783_v61  ;;  %v1452_v1 = vadd.f32 %v1451_v36, %v1354_v37 }
 0x170   : > { %1896 = vst.msk [vmem:[%s2698_s26 + $0x20] sm:$0xf] %vm1887_vm9, %v1863_v38 }
 0x172   : > { %v2789_v51 = vpop.f32.mrf.mxu3 }
 0x173   : > { %v1551_v25 = vpop.f32.mrf.mxu2 }
 0x174   : > { %v2791_v32 = vadd.f32 %v1551_v25, %v1452_v1  ;;  %v1454_v12 = vpop.f32.mrf.mxu1 }
 0x175   : > { %v1357_v41 = vpop.f32.mrf.mxu0 }
 0x176   : > { %v1864_v43 = vpack.c.bf16 %v2791_v32, %v2791_v32  ;;  %v1455_v47 = vadd.f32 %v1454_v12, %v1357_v41 }
 0x178   : > { %1897 = vst.msk [vmem:[%s2698_s26 + $0x24] sm:$0xf] %vm1887_vm9, %v1864_v43 }
 0x17a   : > { %v2797_v45 = vpop.f32.mrf.mxu3 }
 0x17b   : > { %v1554_v54 = vpop.f32.mrf.mxu2 }
 0x17c   : > { %v2799_v24 = vadd.f32 %v1554_v54, %v1455_v47  ;;  %v1456_v55 = vpop.f32.mrf.mxu1 }
 0x17d   : > { %v1359_v56 = vpop.f32.mrf.mxu0 }
 0x17e   : > { %v1865_v16 = vpack.c.bf16 %v2799_v24, %v2799_v24  ;;  %v1457_v40 = vadd.f32 %v1456_v55, %v1359_v56 }
 0x180   : > { %1898 = vst.msk [vmem:[%s2698_s26 + $0x28] sm:$0xf] %vm1887_vm9, %v1865_v16 }
 0x182   : > { %v2805_v19 = vpop.f32.mrf.mxu3 }
 0x183   : > { %v1556_v59 = vpop.f32.mrf.mxu2 }
 0x184   : > { %v2807_v60 = vadd.f32 %v1556_v59, %v1457_v40  ;;  %v1459_v52 = vpop.f32.mrf.mxu1 }
 0x185   : > { %v1362_v53 = vpop.f32.mrf.mxu0 }
 0x186   : > { %v1866_v6 = vpack.c.bf16 %v2807_v60, %v2807_v60  ;;  %v1460_v2 = vadd.f32 %v1459_v52, %v1362_v53 }
 0x188   : > { %1899 = vst.msk [vmem:[%s2698_s26 + $0x2c] sm:$0xf] %vm1887_vm9, %v1866_v6 }
 0x18a   : > { %v2813_v49 = vpop.f32.mrf.mxu3 }
 0x18b   : > { %v1559_v42 = vpop.f32.mrf.mxu2 }
 0x18c   : > { %v2815_v7 = vadd.f32 %v1559_v42, %v1460_v2  ;;  %v1461_v9 = vpop.f32.mrf.mxu1  ;;  %v1642_v2 = vsel %vm1210_vm6, %v2708_v50, 0.0  ;;  %v1490_v42 = vadd.f32 %v2797_v45, %v2706_v48 }
 0x18d   : > { %v1364_v10 = vpop.f32.mrf.mxu0 }
 0x18e   : > { %v1867_v11 = vpack.c.bf16 %v2815_v7, %v2815_v7  ;;  %v1462_v17 = vadd.f32 %v1461_v9, %v1364_v10  ;;  %v1641_v9 = vsel %vm1210_vm6, %v2691_v39, 0.0  ;;  %v1644_v10 = vsel %vm1210_vm6, %v2722_v58, 0.0 }
 0x190   : > { %1900 = vst.msk [vmem:[%s2698_s26 + $0x30] sm:$0xf] %vm1887_vm9, %v1867_v11 }
 0x192   : > { %v2821_v15 = vpop.f32.mrf.mxu3 }
 0x193   : > { %v1561_v4 = vpop.f32.mrf.mxu2 }
 0x194   : > { %v2823_v18 = vadd.f32 %v1561_v4, %v1462_v17  ;;  %v1464_v20 = vpop.f32.mrf.mxu1  ;;  %v1643_v4 = vadd.f32 %v1642_v2, %v1641_v9  ;;  %v1658_v9 = vsel %vm1210_vm6, %v2791_v32, 0.0 }
 0x195   : > { %v1367_v22 = vpop.f32.mrf.mxu0 }
 0x196   : > { %v1868_v44 = vpack.c.bf16 %v2823_v18, %v2823_v18  ;;  %v1465_v23 = vadd.f32 %v1464_v20, %v1367_v22  ;;  %v1645_v45 = vadd.f32 %v1644_v10, %v1643_v4 }
 0x198   : > { %1901 = vst.msk [vmem:[%s2698_s26 + $0x34] sm:$0xf] %vm1887_vm9, %v1868_v44  ;;  %v1646_v44 = vsel %vm1210_vm6, %v2730_v62, 0.0 }
 0x19a   : > { %v2829_v35 = vpop.f32.mrf.mxu3 }
 0x19b   : > { %v1564_v3 = vpop.f32.mrf.mxu2 }
 0x19c   : > { %v2831_v63 = vadd.f32 %v1564_v3, %v1465_v23  ;;  %v1466_v21 = vpop.f32.mrf.mxu1 }
 0x19d   : > { %v1369_v0 = vpop.f32.mrf.mxu0 }
 0x19e   : > { %v1869_v28 = vpack.c.bf16 %v2831_v63, %v2831_v63  ;;  %v1467_v30 = vadd.f32 %v1466_v21, %v1369_v0  ;;  %v1648_v0 = vsel %vm1210_vm6, %v2742_v57, 0.0 }
 0x1a0   : > { %1902 = vst.msk [vmem:[%s2698_s26 + $0x38] sm:$0xf] %vm1887_vm9, %v1869_v28 }
 0x1a2   : > { %v2837_v34 = vpop.f32.mrf.mxu3 }
 0x1a3   : > { %v1566_v31 = vpop.f32.mrf.mxu2 }
 0x1a4   : > { %v2839_v36 = vadd.f32 %v1566_v31, %v1467_v30  ;;  %v1469_v37 = vpop.f32.mrf.mxu1  ;;  %v1647_v30 = vadd.f32 %v1646_v44, %v1645_v45  ;;  %v1650_v31 = vsel %vm1210_vm6, %v2750_v13, 0.0 }
 0x1a5   : > { %v1372_v38 = vpop.f32.mrf.mxu0 }
 0x1a6   : > { %v1870_v1 = vpack.c.bf16 %v2839_v36, %v2839_v36  ;;  %v1470_v12 = vadd.f32 %v1469_v37, %v1372_v38  ;;  %v1649_v37 = vadd.f32 %v1648_v0, %v1647_v30  ;;  %v1492_v38 = vadd.f32 %v2805_v19, %v2720_v46 }
 0x1a7   : > { %v1664_v30 = vsel %vm1210_vm6, %v2815_v7, 0.0 }
 0x1a8   : > { %1903 = vst.msk [vmem:[%s2698_s26 + $0x3c] sm:$0xf] %vm1887_vm9, %v1870_v1  ;;  %v1652_v1 = vsel %vm1210_vm6, %v2765_v5, 0.0 }
 0x1aa   : > { %v2845_v25 = vpop.f32.mrf.mxu3 }
 0x1ab   : > { %v1569_v41 = vpop.f32.mrf.mxu2 }
 0x1ac   : > { %v2847_v43 = vadd.f32 %v1569_v41, %v1470_v12  ;;  %v1471_v47 = vpop.f32.mrf.mxu1 }
 0x1ad   : > { %v1374_v54 = vpop.f32.mrf.mxu0 }
 0x1ae   : > { %v1871_v55 = vpack.c.bf16 %v2847_v43, %v2847_v43  ;;  %v1472_v16 = vadd.f32 %v1471_v47, %v1374_v54  ;;  %v1651_v47 = vadd.f32 %v1650_v31, %v1649_v37 }
 0x1b0   : > { %1904 = vst.msk [vmem:[%s2698_s26 + $0x40] sm:$0xf] %vm1887_vm9, %v1871_v55 }
 0x1b2   : > { %v2853_v56 = vpop.f32.mrf.mxu3 }
 0x1b3   : > { %v1571_v40 = vpop.f32.mrf.mxu2 }
 0x1b4   : > { %v2855_v59 = vadd.f32 %v1571_v40, %v1472_v16  ;;  %v1474_v52 = vpop.f32.mrf.mxu1  ;;  %v1654_v16 = vsel %vm1210_vm6, %v2773_v27, 0.0 }
 0x1b5   : > { %v1377_v53 = vpop.f32.mrf.mxu0 }
 0x1b6   : > { %v1872_v6 = vpack.c.bf16 %v2855_v59, %v2855_v59  ;;  %v1475_v17 = vadd.f32 %v1474_v52, %v1377_v53  ;;  %v1653_v53 = vadd.f32 %v1652_v1, %v1651_v47  ;;  %v1497_v1 = vadd.f32 %v2821_v15, %v2744_v8 }
 0x1b8   : > { %1905 = vst.msk [vmem:[%s2698_s26 + $0x44] sm:$0xf] %vm1887_vm9, %v1872_v6  ;;  %v1656_v6 = vsel %vm1210_vm6, %v2783_v61, 0.0 }
 0x1ba   : > { %v1589_v11 = vpop.f32.mrf.mxu3 }
 0x1bb   : > { %v2869_v20 = vadd.f32 %v1589_v11, %v1490_v42  ;;  %v1574_v22 = vpop.f32.mrf.mxu2  ;;  %v1655_v42 = vadd.f32 %v1654_v16, %v1653_v53  ;;  %v1495_v11 = vadd.f32 %v2813_v49, %v2728_v33 }
 0x1bc   : > { %v2873_v23 = vadd.f32 %v1574_v22, %v1475_v17  ;;  %v1476_v48 = vpop.f32.mrf.mxu1  ;;  %v1660_v17 = vsel %vm1210_vm6, %v2799_v24, 0.0 }
 0x1bd   : > { %v1879_v3 = vpack.c.bf16 %v2869_v20, %v2869_v20  ;;  %v1379_v21 = vpop.f32.mrf.mxu0  ;;  %v1657_v10 = vadd.f32 %v1656_v6, %v1655_v42  ;;  %v1672_v42 = vsel %vm1210_vm6, %v2847_v43, 0.0 }
 0x1be   : > { %v1873_v28 = vpack.c.bf16 %v2873_v23, %v2873_v23  ;;  %v1477_v41 = vadd.f32 %v1476_v48, %v1379_v21 }
 0x1bf   : > { %1912 = vst.msk [vmem:[%s2698_s26 + $0x60] sm:$0xf] %vm1887_vm9, %v1879_v3  ;;  %v1659_v44 = vadd.f32 %v1658_v9, %v1657_v10  ;;  %v1662_v3 = vsel %vm1210_vm6, %v2807_v60, 0.0 }
 0x1c0   : > { %1906 = vst.msk [vmem:[%s2698_s26 + $0x48] sm:$0xf] %vm1887_vm9, %v1873_v28 }
 0x1c1   : > { %v1661_v28 = vadd.f32 %v1660_v17, %v1659_v44  ;;  %v1500_v17 = vadd.f32 %v2829_v35, %v2754_v14 }
 0x1c2   : > { %v1591_v12 = vpop.f32.mrf.mxu3 }
 0x1c3   : > { %v2891_v54 = vadd.f32 %v1591_v12, %v1492_v38  ;;  %v1576_v55 = vpop.f32.mrf.mxu2  ;;  %v1663_v37 = vadd.f32 %v1662_v3, %v1661_v28  ;;  %v1666_v38 = vsel %vm1210_vm6, %v2823_v18, 0.0 }
 0x1c4   : > { %v2895_v40 = vadd.f32 %v1576_v55, %v1477_v41  ;;  %v1479_v52 = vpop.f32.mrf.mxu1  ;;  %v1668_v41 = vsel %vm1210_vm6, %v2831_v63, 0.0 }
 0x1c5   : > { %v1880_v46 = vpack.c.bf16 %v2891_v54, %v2891_v54  ;;  %v1382_v19 = vpop.f32.mrf.mxu0  ;;  %v1665_v12 = vadd.f32 %v1664_v30, %v1663_v37 }
 0x1c6   : > { %v1874_v2 = vpack.c.bf16 %v2895_v40, %v2895_v40  ;;  %v1480_v22 = vadd.f32 %v1479_v52, %v1382_v19 }
 0x1c7   : > { %1913 = vst.msk [vmem:[%s2698_s26 + $0x64] sm:$0xf] %vm1887_vm9, %v1880_v46  ;;  %v1667_v16 = vadd.f32 %v1666_v38, %v1665_v12  ;;  %v1670_v46 = vsel %vm1210_vm6, %v2839_v36, 0.0 }
 0x1c8   : > { %1907 = vst.msk [vmem:[%s2698_s26 + $0x4c] sm:$0xf] %vm1887_vm9, %v1874_v2 }
 0x1c9   : > { %v1669_v6 = vadd.f32 %v1668_v41, %v1667_v16  ;;  %v1502_v41 = vadd.f32 %v2837_v34, %v2771_v26 }
 0x1ca   : > { %v1594_v4 = vpop.f32.mrf.mxu3 }
 0x1cb   : > { %v2913_v48 = vadd.f32 %v1594_v4, %v1495_v11  ;;  %v1579_v45 = vpop.f32.mrf.mxu2  ;;  %v1671_v10 = vadd.f32 %v1670_v46, %v1669_v6  ;;  %v1674_v11 = vsel %vm1210_vm6, %v2855_v59, 0.0 }
 0x1cc   : > { %v2917_v21 = vadd.f32 %v1579_v45, %v1480_v22  ;;  %v1481_v0 = vpop.f32.mrf.mxu1  ;;  %v1676_v22 = vsel %vm1210_vm6, %v2873_v23, 0.0 }
 0x1cd   : > { %v1881_v33 = vpack.c.bf16 %v2913_v48, %v2913_v48  ;;  %v1384_v49 = vpop.f32.mrf.mxu0  ;;  %v1673_v4 = vadd.f32 %v1672_v42, %v1671_v10  ;;  %v1688_v10 = vsel %vm1210_vm6, %v2869_v20, 0.0 }
 0x1ce   : > { %v1875_v31 = vpack.c.bf16 %v2917_v21, %v2917_v21  ;;  %v1482_v55 = vadd.f32 %v1481_v0, %v1384_v49  ;;  %v1680_v35 = vsel %vm1210_vm6, %v2917_v21, 0.0 }
 0x1cf   : > { %1914 = vst.msk [vmem:[%s2698_s26 + $0x68] sm:$0xf] %vm1887_vm9, %v1881_v33  ;;  %v1675_v3 = vadd.f32 %v1674_v11, %v1673_v4  ;;  %v1678_v33 = vsel %vm1210_vm6, %v2895_v40, 0.0  ;;  %v1505_v11 = vadd.f32 %v2845_v25, %v2781_v29  ;;  %v1690_v4 = vsel %vm1210_vm6, %v2891_v54, 0.0 }
 0x1d0   : > { %1908 = vst.msk [vmem:[%s2698_s26 + $0x50] sm:$0xf] %vm1887_vm9, %v1875_v31  ;;  %v2196_v29 = vmov 256.0  }
 0x1d1   : > { %v1677_v30 = vadd.f32 %v1676_v22, %v1675_v3  ;;  %v1692_v3 = vsel %vm1210_vm6, %v2913_v48, 0.0  ;;  %2182 = vrcp.f32 %v2196_v29 }
 0x1d2   : > { %v1596_v47 = vpop.f32.mrf.mxu3 }
 0x1d3   : > { %v2935_v52 = vadd.f32 %v1596_v47, %v1497_v1  ;;  %v1581_v53 = vpop.f32.mrf.mxu2  ;;  %v1679_v37 = vadd.f32 %v1678_v33, %v1677_v30 }
 0x1d4   : > { %v2939_v19 = vadd.f32 %v1581_v53, %v1482_v55  ;;  %v1484_v2 = vpop.f32.mrf.mxu1 }
 0x1d5   : > { %v1882_v8 = vpack.c.bf16 %v2935_v52, %v2935_v52  ;;  %v1387_v15 = vpop.f32.mrf.mxu0  ;;  %v1681_v47 = vadd.f32 %v1680_v35, %v1679_v37  ;;  %v1694_v30 = vsel %vm1210_vm6, %v2935_v52, 0.0  ;;  %v1507_v35 = vadd.f32 %v2853_v56, %v2789_v51 }
 0x1d6   : > { %v1876_v9 = vpack.c.bf16 %v2939_v19, %v2939_v19  ;;  %v1485_v45 = vadd.f32 %v1484_v2, %v1387_v15  ;;  %v1682_v12 = vsel %vm1210_vm6, %v2939_v19, 0.0 }
 0x1d7   : > { %1915 = vst.msk [vmem:[%s2698_s26 + $0x6c] sm:$0xf] %vm1887_vm9, %v1882_v8  ;;  %v1683_v46 = vadd.f32 %v1682_v12, %v1681_v47  ;;  %v2183_v47 = vpop.eup %2182 }
 0x1d8   : > { %1909 = vst.msk [vmem:[%s2698_s26 + $0x54] sm:$0xf] %vm1887_vm9, %v1876_v9  ;;  %v1711_v56 = vmul.f32 256.0, %v2183_v47  ;;  %vm1715_vm10 = vweird.f32 %v2183_v47 }
 0x1da   : > { %v1599_v44 = vpop.f32.mrf.mxu3 }
 0x1db   : > { %v2957_v0 = vadd.f32 %v1599_v44, %v1500_v17  ;;  %v1584_v28 = vpop.f32.mrf.mxu2 }
 0x1dc   : > { %v2961_v49 = vadd.f32 %v1584_v28, %v1485_v45  ;;  %v1486_v1 = vpop.f32.mrf.mxu1 }
 0x1dd   : > { %v1883_v14 = vpack.c.bf16 %v2957_v0, %v2957_v0  ;;  %v1389_v38 = vpop.f32.mrf.mxu0  ;;  %v1696_v25 = vsel %vm1210_vm6, %v2957_v0, 0.0 }
 0x1de   : > { %v1877_v31 = vpack.c.bf16 %v2961_v49, %v2961_v49  ;;  %v1684_v55 = vsel %vm1210_vm6, %v2961_v49, 0.0  ;;  %v1487_v53 = vadd.f32 %v1486_v1, %v1389_v38 }
 0x1df   : > { %1916 = vst.msk [vmem:[%s2698_s26 + $0x70] sm:$0xf] %vm1887_vm9, %v1883_v14  ;;  %v1685_v2 = vadd.f32 %v1684_v55, %v1683_v46 }
 0x1e0   : > { %1910 = vst.msk [vmem:[%s2698_s26 + $0x58] sm:$0xf] %vm1887_vm9, %v1877_v31 }
 0x1e2   : > { %v1601_v16 = vpop.f32.mrf.mxu3 }
 0x1e3   : > { %v2979_v6 = vadd.f32 %v1601_v16, %v1502_v41  ;;  %v1586_v8 = vpop.f32.mrf.mxu2 }
 0x1e4   : > { %v2981_v15 = vadd.f32 %v1586_v8, %v1487_v53 }
 0x1e5   : > { %v1884_v42 = vpack.c.bf16 %v2979_v6, %v2979_v6  ;;  %v1698_v37 = vsel %vm1210_vm6, %v2979_v6, 0.0 }
 0x1e6   : > { %v1686_v26 = vsel %vm1210_vm6, %v2981_v15, 0.0  ;;  %v1878_v34 = vpack.c.bf16 %v2981_v15, %v2981_v15 }
 0x1e7   : > { %1917 = vst.msk [vmem:[%s2698_s26 + $0x74] sm:$0xf] %vm1887_vm9, %v1884_v42  ;;  %v1687_v9 = vadd.f32 %v1686_v26, %v1685_v2  ;;  %v1712_v2 = vsub.f32 1.0, %v1711_v56 }
 0x1e8   : > { %1911 = vst.msk [vmem:[%s2698_s26 + $0x5c] sm:$0xf] %vm1887_vm9, %v1878_v34 }
 0x1e9   : > { %v1689_v17 = vadd.f32 %v1688_v10, %v1687_v9  ;;  %v1713_v34 = vmul.f32 %v2183_v47, %v1712_v2 }
 0x1ea   : > { %v1604_v22 = vpop.f32.mrf.mxu3 }
 0x1eb   : > { %v1691_v44 = vadd.f32 %v1690_v4, %v1689_v17  ;;  %v2999_v45 = vadd.f32 %v1604_v22, %v1505_v11  ;;  %v1714_v10 = vadd.f32 %v2183_v47, %v1713_v34 }
 0x1ed   : > { %v1693_v28 = vadd.f32 %v1692_v3, %v1691_v44  ;;  %v1885_v33 = vpack.c.bf16 %v2999_v45, %v2999_v45  ;;  %v1700_v41 = vsel %vm1210_vm6, %v2999_v45, 0.0  ;;  %v1716_v17 = vsel %vm1715_vm10, %v2183_v47, %v1714_v10 }
 0x1ef   : > { %v1695_v14 = vadd.f32 %v1694_v30, %v1693_v28  ;;  %1918 = vst.msk [vmem:[%s2698_s26 + $0x78] sm:$0xf] %vm1887_vm9, %v1885_v33 }
 0x1f1   : > { %v1697_v31 = vadd.f32 %v1696_v25, %v1695_v14 }
 0x1f2   : > { %v1606_v38 = vpop.f32.mrf.mxu3 }
 0x1f3   : > { %v1699_v1 = vadd.f32 %v1698_v37, %v1697_v31  ;;  %v3015_v12 = vadd.f32 %v1606_v38, %v1507_v35 }
 0x1f5   : > { %v1701_v55 = vadd.f32 %v1700_v41, %v1699_v1  ;;  %v1886_v16 = vpack.c.bf16 %v3015_v12, %v3015_v12  ;;  %v1702_v53 = vsel %vm1210_vm6, %v3015_v12, 0.0 }
 0x1f7   : > { %v1703_v51 = vadd.f32 %v1702_v53, %v1701_v55  ;;  %1919 = vst.msk [vmem:[%s2698_s26 + $0x7c] sm:$0xf] %vm1887_vm9, %v1886_v16 }
 0x1f9   : > { %v1704_v46 = vrot.slane %v1703_v51, 4 }
 0x1fb   : > { %v1705_v8 = vadd.f32 %v1704_v46, %v1703_v51 }
 0x1fd   : > { %v1706_v42 = vrot.slane %v1705_v8, 2 }
 0x1ff   : > { %v1707_v26 = vadd.f32 %v1706_v42, %v1705_v8 }
 0x201   : > { %v1708_v9 = vrot.slane %v1707_v26, 1 }
 0x203   : > { %v3025_v11 = vadd.f32 %v1708_v9, %v1707_v26 }
 0x205   : > { %v3028_v4 = vmul.f32 %v1716_v17, %v3025_v11 }
 0x207   : > { %v1718_v22 = vsub.f32 %v2691_v39, %v3028_v4  ;;  %v1719_v44 = vsub.f32 %v2708_v50, %v3028_v4  ;;  %v1720_v3 = vsub.f32 %v2722_v58, %v3028_v4  ;;  %v1721_v28 = vsub.f32 %v2730_v62, %v3028_v4 }
 0x208   : > { %v1722_v14 = vsub.f32 %v2742_v57, %v3028_v4  ;;  %v1723_v25 = vsub.f32 %v2750_v13, %v3028_v4  ;;  %v1724_v58 = vsub.f32 %v2765_v5, %v3028_v4  ;;  %v1725_v57 = vsub.f32 %v2773_v27, %v3028_v4 }
 0x209   : > { %v1750_v33 = vmul.f32 %v1718_v22, %v1718_v22  ;;  %v1751_v30 = vmul.f32 %v1719_v44, %v1719_v44  ;;  %v1752_v29 = vmul.f32 %v1720_v3, %v1720_v3  ;;  %v1753_v35 = vmul.f32 %v1721_v28, %v1721_v28 }
 0x20a   : > { %v1754_v37 = vmul.f32 %v1722_v14, %v1722_v14  ;;  %v1755_v1 = vmul.f32 %v1723_v25, %v1723_v25  ;;  %v1726_v47 = vsub.f32 %v2783_v61, %v3028_v4  ;;  %v1756_v55 = vmul.f32 %v1724_v58, %v1724_v58 }
 0x20b   : > { %v1782_v39 = vsel %vm1210_vm6, %v1750_v33, 0.0  ;;  %v1783_v50 = vsel %vm1210_vm6, %v1751_v30, 0.0  ;;  %v1785_v62 = vsel %vm1210_vm6, %v1752_v29, 0.0  ;;  %v1787_v41 = vsel %vm1210_vm6, %v1753_v35, 0.0 }
 0x20c   : > { %v1784_v31 = vadd.f32 %v1783_v50, %v1782_v39  ;;  %v1789_v16 = vsel %vm1210_vm6, %v1754_v37, 0.0  ;;  %v1727_v5 = vsub.f32 %v2791_v32, %v3028_v4  ;;  %v1757_v51 = vmul.f32 %v1725_v57, %v1725_v57 }
 0x20d   : > { %v1791_v56 = vsel %vm1210_vm6, %v1755_v1, 0.0  ;;  %v1728_v27 = vsub.f32 %v2799_v24, %v3028_v4  ;;  %v1758_v8 = vmul.f32 %v1726_v47, %v1726_v47  ;;  %v1793_v2 = vsel %vm1210_vm6, %v1756_v55, 0.0 }
 0x20e   : > { %v1786_v38 = vadd.f32 %v1785_v62, %v1784_v31  ;;  %v1729_v61 = vsub.f32 %v2807_v60, %v3028_v4  ;;  %v1759_v26 = vmul.f32 %v1727_v5, %v1727_v5  ;;  %v1795_v34 = vsel %vm1210_vm6, %v1757_v51, 0.0 }
 0x20f   : > { %v1730_v32 = vsub.f32 %v2815_v7, %v3028_v4  ;;  %v1760_v10 = vmul.f32 %v1728_v27, %v1728_v27  ;;  %v1797_v17 = vsel %vm1210_vm6, %v1758_v8, 0.0  ;;  %v1731_v24 = vsub.f32 %v2823_v18, %v3028_v4 }
 0x210   : > { %v1788_v13 = vadd.f32 %v1787_v41, %v1786_v38  ;;  %v1761_v44 = vmul.f32 %v1729_v61, %v1729_v61  ;;  %v1799_v3 = vsel %vm1210_vm6, %v1759_v26, 0.0  ;;  %v1732_v60 = vsub.f32 %v2831_v63, %v3028_v4 }
 0x211   : > { %v1762_v33 = vmul.f32 %v1730_v32, %v1730_v32  ;;  %v1801_v30 = vsel %vm1210_vm6, %v1760_v10, 0.0  ;;  %v1733_v7 = vsub.f32 %v2839_v36, %v3028_v4  ;;  %v1763_v29 = vmul.f32 %v1731_v24, %v1731_v24 }
 0x212   : > { %v1790_v53 = vadd.f32 %v1789_v16, %v1788_v13  ;;  %v1803_v25 = vsel %vm1210_vm6, %v1761_v44, 0.0  ;;  %v1734_v18 = vsub.f32 %v2847_v43, %v3028_v4  ;;  %v1764_v39 = vmul.f32 %v1732_v60, %v1732_v60 }
 0x213   : > { %v1805_v50 = vsel %vm1210_vm6, %v1762_v33, 0.0  ;;  %v1735_v63 = vsub.f32 %v2855_v59, %v3028_v4  ;;  %v1765_v58 = vmul.f32 %v1733_v7, %v1733_v7  ;;  %v1807_v37 = vsel %vm1210_vm6, %v1763_v29, 0.0 }
 0x214   : > { %v1792_v46 = vadd.f32 %v1791_v56, %v1790_v53  ;;  %v1736_v36 = vsub.f32 %v2873_v23, %v3028_v4  ;;  %v1766_v38 = vmul.f32 %v1734_v18, %v1734_v18  ;;  %v1809_v57 = vsel %vm1210_vm6, %v1764_v39, 0.0 }
 0x215   : > { %v1737_v43 = vsub.f32 %v2895_v40, %v3028_v4  ;;  %v1767_v41 = vmul.f32 %v1735_v63, %v1735_v63  ;;  %v1811_v13 = vsel %vm1210_vm6, %v1765_v58, 0.0  ;;  %v1738_v59 = vsub.f32 %v2917_v21, %v3028_v4 }
 0x216   : > { %v1794_v42 = vadd.f32 %v1793_v2, %v1792_v46  ;;  %v1768_v55 = vmul.f32 %v1736_v36, %v1736_v36  ;;  %v1813_v16 = vsel %vm1210_vm6, %v1766_v38, 0.0  ;;  %v1739_v23 = vsub.f32 %v2939_v19, %v3028_v4 }
 0x217   : > { %v1769_v5 = vmul.f32 %v1737_v43, %v1737_v43  ;;  %v1815_v51 = vsel %vm1210_vm6, %v1767_v41, 0.0  ;;  %v1740_v40 = vsub.f32 %v2961_v49, %v3028_v4  ;;  %v1770_v46 = vmul.f32 %v1738_v59, %v1738_v59 }
 0x218   : > { %v1796_v9 = vadd.f32 %v1795_v34, %v1794_v42  ;;  %v1817_v27 = vsel %vm1210_vm6, %v1768_v55, 0.0  ;;  %v1741_v21 = vsub.f32 %v2981_v15, %v3028_v4  ;;  %v1771_v2 = vmul.f32 %v1739_v23, %v1739_v23 }
 0x219   : > { %v1819_v42 = vsel %vm1210_vm6, %v1769_v5, 0.0  ;;  %v1742_v19 = vsub.f32 %v2869_v20, %v3028_v4  ;;  %v1772_v26 = vmul.f32 %v1740_v40, %v1740_v40  ;;  %v1821_v34 = vsel %vm1210_vm6, %v1770_v46, 0.0 }
 0x21a   : > { %v1798_v22 = vadd.f32 %v1797_v17, %v1796_v9  ;;  %v1743_v49 = vsub.f32 %v2891_v54, %v3028_v4  ;;  %v1773_v32 = vmul.f32 %v1741_v21, %v1741_v21  ;;  %v1823_v10 = vsel %vm1210_vm6, %v1771_v2, 0.0 }
 0x21b   : > { %v1744_v15 = vsub.f32 %v2913_v48, %v3028_v4  ;;  %v1825_v24 = vsel %vm1210_vm6, %v1772_v26, 0.0  ;;  %v1745_v20 = vsub.f32 %v2935_v52, %v3028_v4  ;;  %v1746_v54 = vsub.f32 %v2957_v0, %v3028_v4 }
 0x21c   : > { %v1800_v28 = vadd.f32 %v1799_v3, %v1798_v22  ;;  %v1774_v22 = vmul.f32 %v1742_v19, %v1742_v19  ;;  %v1775_v3 = vmul.f32 %v1743_v49, %v1743_v49  ;;  %v1747_v48 = vsub.f32 %v2979_v6, %v3028_v4 }
 0x21d   : > { %v1776_v33 = vmul.f32 %v1744_v15, %v1744_v15  ;;  %v1777_v7 = vmul.f32 %v1745_v20, %v1745_v20  ;;  %v1748_v52 = vsub.f32 %v2999_v45, %v3028_v4  ;;  %v1749_v0 = vsub.f32 %v3015_v12, %v3028_v4 }
 0x21e   : > { %v1802_v14 = vadd.f32 %v1801_v30, %v1800_v28  ;;  %v1827_v28 = vsel %vm1210_vm6, %v1773_v32, 0.0  ;;  %v1829_v30 = vsel %vm1210_vm6, %v1774_v22, 0.0  ;;  %v1831_v29 = vsel %vm1210_vm6, %v1775_v3, 0.0 }
 0x21f   : > { %v1833_v18 = vsel %vm1210_vm6, %v1776_v33, 0.0  ;;  %v1780_v6 = vmul.f32 %v1748_v52, %v1748_v52 }
 0x220   : > { %v1804_v35 = vadd.f32 %v1803_v25, %v1802_v14 }
 0x221   : > { %v1841_v38 = vsel %vm1210_vm6, %v1780_v6, 0.0 }
 0x222   : > { %v1806_v31 = vadd.f32 %v1805_v50, %v1804_v35  ;;  %v1778_v35 = vmul.f32 %v1746_v54, %v1746_v54  ;;  %v1779_v50 = vmul.f32 %v1747_v48, %v1747_v48 }
 0x224   : > { %v1808_v62 = vadd.f32 %v1807_v37, %v1806_v31  ;;  %v1835_v31 = vsel %vm1210_vm6, %v1777_v7, 0.0  ;;  %v1837_v58 = vsel %vm1210_vm6, %v1778_v35, 0.0  ;;  %v1839_v36 = vsel %vm1210_vm6, %v1779_v50, 0.0 }
 0x226   : > { %v1810_v1 = vadd.f32 %v1809_v57, %v1808_v62  ;;  %v1781_v62 = vmul.f32 %v1749_v0, %v1749_v0 }
 0x228   : > { %v1812_v47 = vadd.f32 %v1811_v13, %v1810_v1  ;;  %v1843_v1 = vsel %vm1210_vm6, %v1781_v62, 0.0 }
 0x22a   : > { %v1814_v53 = vadd.f32 %v1813_v16, %v1812_v47 }
 0x22c   : > { %v1816_v56 = vadd.f32 %v1815_v51, %v1814_v53 }
 0x22e   : > { %v1818_v8 = vadd.f32 %v1817_v27, %v1816_v56 }
 0x230   : > { %v1820_v61 = vadd.f32 %v1819_v42, %v1818_v8 }
 0x232   : > { %v1822_v9 = vadd.f32 %v1821_v34, %v1820_v61 }
 0x234   : > { %v1824_v17 = vadd.f32 %v1823_v10, %v1822_v9 }
 0x236   : > { %v1826_v44 = vadd.f32 %v1825_v24, %v1824_v17 }
 0x238   : > { %v1828_v60 = vadd.f32 %v1827_v28, %v1826_v44 }
 0x23a   : > { %v1830_v14 = vadd.f32 %v1829_v30, %v1828_v60 }
 0x23c   : > { %v1832_v25 = vadd.f32 %v1831_v29, %v1830_v14 }
 0x23e   : > { %v1834_v39 = vadd.f32 %v1833_v18, %v1832_v25 }
 0x240   : > { %v1836_v63 = vadd.f32 %v1835_v31, %v1834_v39 }
 0x242   : > { %v1838_v37 = vadd.f32 %v1837_v58, %v1836_v63 }
 0x244   : > { %v1840_v45 = vadd.f32 %v1839_v36, %v1838_v37 }
 0x246   : > { %v1842_v57 = vadd.f32 %v1841_v38, %v1840_v45 }
 0x248   : > { %v1844_v43 = vadd.f32 %v1843_v1, %v1842_v57 }
 0x24a   : > { %v1845_v12 = vrot.slane %v1844_v43, 4 }
 0x24c   : > { %v1846_v4 = vadd.f32 %v1845_v12, %v1844_v43 }
 0x24e   : > { %v1847_v41 = vrot.slane %v1846_v4, 2 }
 0x250   : > { %v1848_v13 = vadd.f32 %v1847_v41, %v1846_v4 }
 0x252   : > { %v1849_v47 = vrot.slane %v1848_v13, 1 }
 0x254   : > { %v1850_v59 = vadd.f32 %v1849_v47, %v1848_v13 }
 0x256   : > { %v1852_v55 = vsel %vm837_vm0, %v3025_v11, %v1850_v59 }
 0x257   : > { %1854 = vst.msk [vmem:[%s235_s29] sm:$0x3] %vm1853_vm11, %v1852_v55 }
 0x258 PF: > { %s16_s18 = sadd.s32 1, %s2192_s18  }
 0x259   : > { %p13_p4 = scmp.ge.s32.totalorder %s16_s18, 4  }
 0x25b   :  { %15 = sbr.rel (!%p13_p4) target bundleno = 1 (0x1), region = 80 }

</bundles_post_ra>
